<compile_context>
chip_gen: v7x
topology: tpu7x:2x2x1
jax: 0.10.0
libtpu: 0.0.40
codegen_flags: <defaults>
</compile_context>

<pallas_src>
import math
import jax
import jax.numpy as jnp
from jax.experimental import pallas as pl
from jax.experimental.pallas import tpu as pltpu

# ----------------------------- model dimensions ------------------------------
B = 2                       # batch
HOP = 16                    # samples per audio frame
T = 16                      # frames (also text sequence length)
W = T * HOP                 # waveform samples
D = 128                     # model dim
HID = 256                   # MLP hidden dim
VOCAB = 256                 # text vocab
K_SEM = 64                  # semantic codebook size
K_AC = 64                   # acoustic codebook size
NQ = 3                      # residual acoustic quantizers
M = B * T                   # flattened token rows
LANE = 128
assert T & (T - 1) == 0, "T must be a power of two (bitmask batch-block trick)"

ATTN_SCALE = 1.0 / math.sqrt(D)
NEG_INF = -1e30

# -------- packed-slab layout constants --------
HEAD_W = VOCAB + (1 + NQ) * LANE           # 768: text(256)|sem(128)|ac0..2(128 each)
CB_ROWS = K_SEM + NQ * K_AC                # 256: decoder codebook rows
EMB_ROWS = VOCAB + K_SEM + NQ * K_AC       # 512: embedding rows

# w128 slab column offsets (all 128-multiples)
O_ENC = 0                                  # enc_w_pad   (128)
O_QKV = O_ENC + D                          # t_wqkv      (384)
O_WO = O_QKV + 3 * D                       # t_wo        (128)
O_TW1 = O_WO + D                           # t_w1        (256)
O_DW1 = O_TW1 + HID                        # d_w1        (256)
O_HEAD = O_DW1 + HID                       # head_w_pad  (768)
O_DEC = O_HEAD + HEAD_W                    # dec_w_pad   (128)
W128_COLS = O_DEC + LANE                   # 2048

# vec slab row indices (each row is 768 lanes, every vector starts at lane 0)
R_ENC_B, R_DEC_B = 0, 1
R_TG1, R_TBQKV, R_TBO, R_TG2, R_TB1, R_TB2 = 2, 3, 4, 5, 6, 7
R_DG, R_DB1, R_DB2, R_HEADB = 8, 9, 10, 11
R_SEMC2, R_ACC2 = 12, 13                   # ac c2 rows: 13, 14, 15
VEC_ROWS, VEC_W = 16, HEAD_W


# ----------------------------- in-kernel helpers ------------------------------
def _mm(a, b):
    """MXU matmul: bf16 operands, f32 accumulation."""
    return jnp.dot(a.astype(jnp.bfloat16), b.astype(jnp.bfloat16),
                   preferred_element_type=jnp.float32)


def _mm_nt(a, b):
    """a @ b.T with bf16 operands, f32 accumulation."""
    return jax.lax.dot_general(
        a.astype(jnp.bfloat16), b.astype(jnp.bfloat16),
        (((1,), (1,)), ((), ())), preferred_element_type=jnp.float32)


def _rmsnorm(x, g):
    ms = jnp.mean(x * x, axis=-1, keepdims=True)
    return x * jax.lax.rsqrt(ms + 1e-6) * g


def _argmin_rows(d):
    """Row-wise argmin with lowest-index tie-break -> (M, 1) int32."""
    K = d.shape[-1]
    dmin = jnp.min(d, axis=-1, keepdims=True)
    iota = jax.lax.broadcasted_iota(jnp.int32, d.shape, 1)
    return jnp.min(jnp.where(d <= dmin, iota, jnp.int32(K)), axis=-1, keepdims=True)


def _argmax_rows(logits):
    """Row-wise argmax with lowest-index tie-break -> (M, 1) int32."""
    K = logits.shape[-1]
    m = jnp.max(logits, axis=-1, keepdims=True)
    iota = jax.lax.broadcasted_iota(jnp.int32, logits.shape, 1)
    return jnp.min(jnp.where(logits >= m, iota, jnp.int32(K)), axis=-1, keepdims=True)


def _one_hot(idx, K):
    """(M,1) int32 -> (M,K) f32 one-hot."""
    iota = jax.lax.broadcasted_iota(jnp.int32, (idx.shape[0], K), 1)
    return (iota == idx).astype(jnp.float32)


def _multi_one_hot(idx_off_pairs, width, dtype):
    """Several (M,1) indices with segment offsets -> one (M,width) one-hot."""
    rows = idx_off_pairs[0][0].shape[0]
    iota = jax.lax.broadcasted_iota(jnp.int32, (rows, width), 1)
    acc = None
    for idx, off in idx_off_pairs:
        hit = iota == (idx + jnp.int32(off))
        acc = hit if acc is None else jnp.logical_or(acc, hit)
    return acc.astype(dtype)


def _vq(x, cb, c2):
    """Nearest-neighbour VQ (f32 exact). c2 = precomputed row norms of cb, shape (1,K).
    The x^2 term is dropped (argmin is invariant to a per-row constant)."""
    xc = jax.lax.dot_general(x, cb, (((1,), (1,)), ((), ())),
                             preferred_element_type=jnp.float32)
    d = c2 - 2.0 * xc
    idx = _argmin_rows(d)
    q = jnp.dot(_one_hot(idx, cb.shape[0]), cb, preferred_element_type=jnp.float32)
    return idx, q


# ------------------------------ fused forward kernel --------------------------
def _josie_kernel(data_ref, vec_ref, w128_ref, w256_ref, cb_ref, tok_ref, wav_ref):
    data = data_ref[...]                                                  # (M,128) f32

    # ---- JODIO encode: framed linear encoder -> semantic VQ + residual VQ ----
    feats = _mm(data, w128_ref[:, O_ENC:O_ENC + D]) + vec_ref[R_ENC_B:R_ENC_B + 1, 0:D]
    sem_idx, sem_q = _vq(feats, cb_ref[0:K_SEM, :],
                         vec_ref[R_SEMC2:R_SEMC2 + 1, 0:K_SEM])
    residual = feats - sem_q
    ac_idx_enc = []
    for qi in range(NQ):                                                  # static unroll
        lo = K_SEM + qi * K_AC
        idx, q = _vq(residual, cb_ref[lo:lo + K_AC, :],
                     vec_ref[R_ACC2 + qi:R_ACC2 + qi + 1, 0:K_AC])
        residual = residual - q
        ac_idx_enc.append(idx)

    # ---- fused token-embedding lookup: ONE (M,512) bf16 one-hot @ (512,D) ----
    text_idx = data[:, HOP:HOP + 1].astype(jnp.int32)                     # (M,1)
    emb_oh = _multi_one_hot(
        [(text_idx, 0), (sem_idx, VOCAB),
         (ac_idx_enc[0], VOCAB + K_SEM),
         (ac_idx_enc[1], VOCAB + K_SEM + K_AC),
         (ac_idx_enc[2], VOCAB + K_SEM + 2 * K_AC)],
        EMB_ROWS, jnp.bfloat16)
    x = jnp.dot(emb_oh, cb_ref[CB_ROWS:CB_ROWS + EMB_ROWS, :].astype(jnp.bfloat16),
                preferred_element_type=jnp.float32)                       # (M, D)

    # ---- temporal transformer: RMSNorm + fused QKV + causal attn + out-proj ----
    h = _rmsnorm(x, vec_ref[R_TG1:R_TG1 + 1, 0:D])
    qkv = _mm(h, w128_ref[:, O_QKV:O_QKV + 3 * D]) + vec_ref[R_TBQKV:R_TBQKV + 1, 0:3 * D]
    q = qkv[:, 0:D]
    k = qkv[:, D:2 * D]
    v = qkv[:, 2 * D:3 * D]

    # block-diagonal causal mask rebuilt in-kernel (no mask input DMA)
    r = jax.lax.broadcasted_iota(jnp.int32, (M, M), 0)
    c = jax.lax.broadcasted_iota(jnp.int32, (M, M), 1)
    same_batch = jnp.bitwise_and(r, jnp.int32(-T)) == jnp.bitwise_and(c, jnp.int32(-T))
    keep = jnp.logical_and(same_batch, c <= r)
    mask = jnp.where(keep, jnp.float32(0.0), jnp.float32(NEG_INF))

    s = _mm_nt(q, k) * ATTN_SCALE + mask                                  # (M, M)
    s = s - jnp.max(s, axis=-1, keepdims=True)
    p = jnp.exp(s)
    p = p * pl.reciprocal(jnp.sum(p, axis=-1, keepdims=True), approx=True)
    attn = _mm(p, v)
    x = x + _mm(attn, w128_ref[:, O_WO:O_WO + D]) + vec_ref[R_TBO:R_TBO + 1, 0:D]

    # RMSNorm + SiLU MLP + residual
    h = _rmsnorm(x, vec_ref[R_TG2:R_TG2 + 1, 0:D])
    hh = _mm(h, w128_ref[:, O_TW1:O_TW1 + HID]) + vec_ref[R_TB1:R_TB1 + 1, 0:HID]
    hh = hh * jax.nn.sigmoid(hh)
    x = x + _mm(hh, w256_ref[:, 0:D]) + vec_ref[R_TB2:R_TB2 + 1, 0:D]

    # ---- depth transformer: RMSNorm + SiLU MLP + fused 128-aligned argmax heads ----
    h = _rmsnorm(x, vec_ref[R_DG:R_DG + 1, 0:D])
    hh = _mm(h, w128_ref[:, O_DW1:O_DW1 + HID]) + vec_ref[R_DB1:R_DB1 + 1, 0:HID]
    hh = hh * jax.nn.sigmoid(hh)
    x = x + _mm(hh, w256_ref[:, D:2 * D]) + vec_ref[R_DB2:R_DB2 + 1, 0:D]

    logits = _mm(x, w128_ref[:, O_HEAD:O_HEAD + HEAD_W]) \
        + vec_ref[R_HEADB:R_HEADB + 1, 0:HEAD_W]                          # (M, 768)
    text_o = _argmax_rows(logits[:, 0:VOCAB])                             # [0, 256)
    sem_o = _argmax_rows(logits[:, VOCAB:VOCAB + LANE])                   # [256, 384)
    ac_o = []
    for qi in range(NQ):
        lo = VOCAB + (1 + qi) * LANE
        ac_o.append(_argmax_rows(logits[:, lo:lo + LANE]))                # pad lanes never win

    # ---- JODIO decode: ONE fused codebook lookup -> linear decoder -> frames ----
    dec_oh = _multi_one_hot(
        [(sem_o, 0), (ac_o[0], K_SEM), (ac_o[1], K_SEM + K_AC), (ac_o[2], K_SEM + 2 * K_AC)],
        CB_ROWS, jnp.float32)
    z = jnp.dot(dec_oh, cb_ref[0:CB_ROWS, :], preferred_element_type=jnp.float32)
    wav_ref[...] = _mm(z, w128_ref[:, O_DEC:O_DEC + LANE]) \
        + vec_ref[R_DEC_B:R_DEC_B + 1, 0:LANE]                            # (M,128) lane-dense

    # ---- lane-dense packed int32 token output: cols [text, sem, ac0, ac1, ac2, 0...] ----
    col = jax.lax.broadcasted_iota(jnp.int32, (M, LANE), 1)
    packed = jnp.where(col == 0, text_o, 0)
    packed = packed + jnp.where(col == 1, sem_o, 0)
    for qi in range(NQ):
        packed = packed + jnp.where(col == 2 + qi, ac_o[qi], 0)
    tok_ref[...] = packed


# ------------------------------- parameters ----------------------------------
def init_params(key):
    ks = list(jax.random.split(key, 20))
    n = lambda k, s, sc=0.05: (sc * jax.random.normal(k, s)).astype(jnp.float32)
    z = lambda s: jnp.zeros(s, jnp.float32)

    # raw matrices (mathematically identical to separate projections / heads)
    enc_w = n(ks[0], (HOP, D))
    sem_cb = n(ks[1], (K_SEM, D), 0.5)
    ac_cb = n(ks[2], (NQ, K_AC, D), 0.5)
    dec_w = n(ks[3], (D, HOP))
    text_emb = n(ks[4], (VOCAB, D))
    sem_emb = n(ks[5], (K_SEM, D))
    ac_emb = n(ks[6], (NQ, K_AC, D))
    wq, wk, wv = n(ks[7], (D, D)), n(ks[8], (D, D)), n(ks[9], (D, D))
    t_wo = n(ks[10], (D, D))
    t_w1 = n(ks[11], (D, HID))
    t_w2 = n(ks[12], (HID, D))
    d_w1 = n(ks[13], (D, HID))
    d_w2 = n(ks[14], (HID, D))
    text_hw = n(ks[15], (D, VOCAB))
    sem_hw = n(ks[16], (D, K_SEM))
    ac_hw = n(ks[17], (NQ, D, K_AC))

    # ---- w128 slab: all D-row matrices, column-concatenated, bf16 ----
    enc_w_pad = z((D, D)).at[:HOP].set(enc_w)          # padded rows (incl. token col) are zero
    t_wqkv = jnp.concatenate([wq, wk, wv], axis=1)     # (128, 384)
    seg_pad_w = z((D, LANE - K_SEM))                   # 64 zero columns per sub-128 head segment
    head_w = jnp.concatenate(
        [text_hw, sem_hw, seg_pad_w,
         ac_hw[0], seg_pad_w, ac_hw[1], seg_pad_w, ac_hw[2], seg_pad_w], axis=1)   # (128, 768)
    dec_w_pad = jnp.concatenate([dec_w, z((D, LANE - HOP))], axis=1)               # (128, 128)
    w128 = jnp.concatenate(
        [enc_w_pad, t_wqkv, t_wo, t_w1, d_w1, head_w, dec_w_pad], axis=1)
    assert w128.shape == (D, W128_COLS)
    w128 = w128.astype(jnp.bfloat16)

    # ---- w256 slab: HID-row matrices ----
    w256 = jnp.concatenate([t_w2, d_w2], axis=1).astype(jnp.bfloat16)              # (256, 256)

    # ---- cb slab: codebooks (rows 0:256) + embeddings (rows 256:768), f32 ----
    cb = jnp.concatenate(
        [sem_cb, ac_cb[0], ac_cb[1], ac_cb[2],
         text_emb, sem_emb, ac_emb[0], ac_emb[1], ac_emb[2]], axis=0)              # (768, 128)
    assert cb.shape == (CB_ROWS + EMB_ROWS, D)

    # ---- vec slab: every gain / bias vector + precomputed codebook norms ----
    vec = z((VEC_ROWS, VEC_W))
    vec = vec.at[R_TG1, 0:D].set(1.0)
    vec = vec.at[R_TG2, 0:D].set(1.0)
    vec = vec.at[R_DG, 0:D].set(1.0)
    # head bias: real lanes 0, pad lanes -inf so padded columns never win the argmax
    seg_pad_b = jnp.full((LANE - K_SEM,), NEG_INF, jnp.float32)
    head_b = jnp.concatenate(
        [z((VOCAB,)), z((K_SEM,)), seg_pad_b]
        + sum([[z((K_AC,)), seg_pad_b] for _ in range(NQ)], []))
    vec = vec.at[R_HEADB, 0:HEAD_W].set(head_b)
    # precomputed codebook row norms (c2) for the x^2-free VQ distance
    vec = vec.at[R_SEMC2, 0:K_SEM].set(jnp.sum(sem_cb * sem_cb, axis=-1))
    for qi in range(NQ):
        vec = vec.at[R_ACC2 + qi, 0:K_AC].set(jnp.sum(ac_cb[qi] * ac_cb[qi], axis=-1))

    return {"vec": vec, "w128": w128, "w256": w256, "cb": cb}


# ------------------------------ forward wrapper --------------------------------
def josie_forward(p, text_tokens, user_waveform):
    frames = user_waveform.reshape(M, HOP)                         # framing = stride-HOP conv
    text_col = text_tokens.reshape(M, 1).astype(jnp.float32)       # exact for vocab < 2^24
    data = jnp.concatenate(
        [frames, text_col, jnp.zeros((M, LANE - HOP - 1), jnp.float32)], axis=1)   # (M,128)

    tok, wav = pl.pallas_call(
        _josie_kernel,
        out_shape=(
            jax.ShapeDtypeStruct((M, LANE), jnp.int32),    # lane-dense packed token indices
            jax.ShapeDtypeStruct((M, LANE), jnp.float32),  # lane-dense decoded frames
        ),
        compiler_params=pltpu.CompilerParams(vmem_limit_bytes=32 * 1024 * 1024),
    )(data, p["vec"], p["w128"], p["w256"], p["cb"])

    text_token = tok[:, 0].reshape(B, T)
    semantic_token = tok[:, 1].reshape(B, T)
    acoustic_tokens = tok[:, 2:2 + NQ].reshape(B, T, NQ)
    josies_waveform = wav[:, :HOP].reshape(B, W)
    return text_token, semantic_token, acoustic_tokens, josies_waveform


# ----------------------------------- main -------------------------------------
if __name__ == "__main__":
    key = jax.random.PRNGKey(0)
    kp, kt, kw = jax.random.split(key, 3)
    params = init_params(kp)
    text_tokens = jax.random.randint(kt, (B, T), 0, VOCAB, dtype=jnp.int32)
    user_waveform = jax.random.normal(kw, (B, W), dtype=jnp.float32)

    fwd = jax.jit(josie_forward)
    out = jax.block_until_ready(fwd(params, text_tokens, user_waveform))

    text_token, semantic_token, acoustic_tokens, josies_waveform = out
    assert text_token.shape == (B, T) and text_token.dtype == jnp.int32
    assert semantic_token.shape == (B, T) and semantic_token.dtype == jnp.int32
    assert acoustic_tokens.shape == (B, T, NQ) and acoustic_tokens.dtype == jnp.int32
    assert josies_waveform.shape == (B, W) and josies_waveform.dtype == jnp.float32
    assert bool(jnp.all(text_token >= 0)) and bool(jnp.all(text_token < VOCAB))
    assert bool(jnp.all(semantic_token >= 0)) and bool(jnp.all(semantic_token < K_SEM))
    assert bool(jnp.all(acoustic_tokens >= 0)) and bool(jnp.all(acoustic_tokens < K_AC))
    print("KERNEL_OK")
</pallas_src>

<mosaic_0001>
module attributes {stable_mosaic.version = 11 : i64} {
  func.func @_josie_kernel(%arg0: memref<32x128xf32, #tpu.memory_space<vmem>>, %arg1: memref<16x768xf32, #tpu.memory_space<vmem>>, %arg2: memref<128x2048xbf16, #tpu.memory_space<vmem>>, %arg3: memref<256x256xbf16, #tpu.memory_space<vmem>>, %arg4: memref<768x128xf32, #tpu.memory_space<vmem>>, %arg5: memref<32x128xi32, #tpu.memory_space<vmem>>, %arg6: memref<32x128xf32, #tpu.memory_space<vmem>>) attributes {dimension_semantics = [], scalar_prefetch = 0 : i64, scratch_operands = 0 : i64, tpu.core_type = #tpu.core_type<tc>} {
    %c0 = arith.constant 0 : index
    %c0_0 = arith.constant 0 : index
    %0 = vector.load %arg0[%c0, %c0_0] : memref<32x128xf32, #tpu.memory_space<vmem>>, vector<32x128xf32>
    %c0_1 = arith.constant 0 : index
    %c0_2 = arith.constant 0 : index
    %1 = vector.load %arg2[%c0_1, %c0_2] : memref<128x2048xbf16, #tpu.memory_space<vmem>>, vector<128x128xbf16>
    %2 = arith.truncf %0 : vector<32x128xf32> to vector<32x128xbf16>
    %cst = arith.constant dense<0.000000e+00> : vector<32x128xf32>
    %3 = tpu.matmul %2, %1, %cst {dimension_numbers = #tpu.dot_dimension_numbers<[1], [0], [0], [1], [0, 0, 1, 1], [], []>} : vector<32x128xbf16>, vector<128x128xbf16>, vector<32x128xf32> -> vector<32x128xf32>
    %c0_3 = arith.constant 0 : index
    %c0_4 = arith.constant 0 : index
    %4 = vector.load %arg1[%c0_3, %c0_4] : memref<16x768xf32, #tpu.memory_space<vmem>>, vector<1x128xf32>
    %5 = vector.broadcast %4 : vector<1x128xf32> to vector<32x128xf32>
    %6 = arith.addf %3, %5 : vector<32x128xf32>
    %c0_5 = arith.constant 0 : index
    %c0_6 = arith.constant 0 : index
    %7 = vector.load %arg4[%c0_5, %c0_6] : memref<768x128xf32, #tpu.memory_space<vmem>>, vector<64x128xf32>
    %c12 = arith.constant 12 : index
    %c0_7 = arith.constant 0 : index
    %8 = vector.load %arg1[%c12, %c0_7] : memref<16x768xf32, #tpu.memory_space<vmem>>, vector<1x64xf32>
    %cst_8 = arith.constant dense<0.000000e+00> : vector<32x64xf32>
    %9 = tpu.matmul %6, %7, %cst_8 {dimension_numbers = #tpu.dot_dimension_numbers<[1], [1], [0], [0], [0, 0, 1, 0], [], []>} : vector<32x128xf32>, vector<64x128xf32>, vector<32x64xf32> -> vector<32x64xf32>
    %cst_9 = arith.constant 2.000000e+00 : f32
    %10 = vector.broadcast %cst_9 : f32 to vector<32x64xf32>
    %11 = arith.mulf %10, %9 : vector<32x64xf32>
    %12 = vector.broadcast %8 : vector<1x64xf32> to vector<32x64xf32>
    %13 = arith.subf %12, %11 : vector<32x64xf32>
    %cst_10 = arith.constant dense<0x7F800000> : vector<32xf32>
    %14 = vector.multi_reduction <minimumf>, %13, %cst_10 [1] : vector<32x64xf32> to vector<32xf32>
    %15 = vector.shape_cast %14 : vector<32xf32> to vector<32x1xf32>
    %16 = tpu.iota {dimensions = array<i32: 1>} : vector<32x64xi32>
    %17 = vector.broadcast %15 : vector<32x1xf32> to vector<32x64xf32>
    %18 = arith.cmpf ole, %13, %17 : vector<32x64xf32>
    %c64_i32 = arith.constant 64 : i32
    %19 = vector.broadcast %c64_i32 : i32 to vector<32x64xi32>
    %20 = arith.select %18, %16, %19 : vector<32x64xi1>, vector<32x64xi32>
    %cst_11 = arith.constant dense<2147483647> : vector<32xi32>
    %21 = vector.multi_reduction <minsi>, %20, %cst_11 [1] : vector<32x64xi32> to vector<32xi32>
    %22 = vector.shape_cast %21 : vector<32xi32> to vector<32x1xi32>
    %23 = tpu.iota {dimensions = array<i32: 1>} : vector<32x64xi32>
    %24 = vector.broadcast %22 : vector<32x1xi32> to vector<32x64xi32>
    %25 = arith.cmpi eq, %23, %24 : vector<32x64xi32>
    %26 = arith.extui %25 : vector<32x64xi1> to vector<32x64xi32>
    %27 = arith.sitofp %26 : vector<32x64xi32> to vector<32x64xf32>
    %cst_12 = arith.constant dense<0.000000e+00> : vector<32x128xf32>
    %28 = tpu.matmul %27, %7, %cst_12 {dimension_numbers = #tpu.dot_dimension_numbers<[1], [0], [0], [1], [0, 0, 1, 1], [], []>} : vector<32x64xf32>, vector<64x128xf32>, vector<32x128xf32> -> vector<32x128xf32>
    %29 = arith.subf %6, %28 : vector<32x128xf32>
    %c64 = arith.constant 64 : index
    %c0_13 = arith.constant 0 : index
    %30 = vector.load %arg4[%c64, %c0_13] : memref<768x128xf32, #tpu.memory_space<vmem>>, vector<64x128xf32>
    %c13 = arith.constant 13 : index
    %c0_14 = arith.constant 0 : index
    %31 = vector.load %arg1[%c13, %c0_14] : memref<16x768xf32, #tpu.memory_space<vmem>>, vector<1x64xf32>
    %cst_15 = arith.constant dense<0.000000e+00> : vector<32x64xf32>
    %32 = tpu.matmul %29, %30, %cst_15 {dimension_numbers = #tpu.dot_dimension_numbers<[1], [1], [0], [0], [0, 0, 1, 0], [], []>} : vector<32x128xf32>, vector<64x128xf32>, vector<32x64xf32> -> vector<32x64xf32>
    %cst_16 = arith.constant 2.000000e+00 : f32
    %33 = vector.broadcast %cst_16 : f32 to vector<32x64xf32>
    %34 = arith.mulf %33, %32 : vector<32x64xf32>
    %35 = vector.broadcast %31 : vector<1x64xf32> to vector<32x64xf32>
    %36 = arith.subf %35, %34 : vector<32x64xf32>
    %cst_17 = arith.constant dense<0x7F800000> : vector<32xf32>
    %37 = vector.multi_reduction <minimumf>, %36, %cst_17 [1] : vector<32x64xf32> to vector<32xf32>
    %38 = vector.shape_cast %37 : vector<32xf32> to vector<32x1xf32>
    %39 = tpu.iota {dimensions = array<i32: 1>} : vector<32x64xi32>
    %40 = vector.broadcast %38 : vector<32x1xf32> to vector<32x64xf32>
    %41 = arith.cmpf ole, %36, %40 : vector<32x64xf32>
    %c64_i32_18 = arith.constant 64 : i32
    %42 = vector.broadcast %c64_i32_18 : i32 to vector<32x64xi32>
    %43 = arith.select %41, %39, %42 : vector<32x64xi1>, vector<32x64xi32>
    %cst_19 = arith.constant dense<2147483647> : vector<32xi32>
    %44 = vector.multi_reduction <minsi>, %43, %cst_19 [1] : vector<32x64xi32> to vector<32xi32>
    %45 = vector.shape_cast %44 : vector<32xi32> to vector<32x1xi32>
    %46 = tpu.iota {dimensions = array<i32: 1>} : vector<32x64xi32>
    %47 = vector.broadcast %45 : vector<32x1xi32> to vector<32x64xi32>
    %48 = arith.cmpi eq, %46, %47 : vector<32x64xi32>
    %49 = arith.extui %48 : vector<32x64xi1> to vector<32x64xi32>
    %50 = arith.sitofp %49 : vector<32x64xi32> to vector<32x64xf32>
    %cst_20 = arith.constant dense<0.000000e+00> : vector<32x128xf32>
    %51 = tpu.matmul %50, %30, %cst_20 {dimension_numbers = #tpu.dot_dimension_numbers<[1], [0], [0], [1], [0, 0, 1, 1], [], []>} : vector<32x64xf32>, vector<64x128xf32>, vector<32x128xf32> -> vector<32x128xf32>
    %52 = arith.subf %29, %51 : vector<32x128xf32>
    %c128 = arith.constant 128 : index
    %c0_21 = arith.constant 0 : index
    %53 = vector.load %arg4[%c128, %c0_21] : memref<768x128xf32, #tpu.memory_space<vmem>>, vector<64x128xf32>
    %c14 = arith.constant 14 : index
    %c0_22 = arith.constant 0 : index
    %54 = vector.load %arg1[%c14, %c0_22] : memref<16x768xf32, #tpu.memory_space<vmem>>, vector<1x64xf32>
    %cst_23 = arith.constant dense<0.000000e+00> : vector<32x64xf32>
    %55 = tpu.matmul %52, %53, %cst_23 {dimension_numbers = #tpu.dot_dimension_numbers<[1], [1], [0], [0], [0, 0, 1, 0], [], []>} : vector<32x128xf32>, vector<64x128xf32>, vector<32x64xf32> -> vector<32x64xf32>
    %cst_24 = arith.constant 2.000000e+00 : f32
    %56 = vector.broadcast %cst_24 : f32 to vector<32x64xf32>
    %57 = arith.mulf %56, %55 : vector<32x64xf32>
    %58 = vector.broadcast %54 : vector<1x64xf32> to vector<32x64xf32>
    %59 = arith.subf %58, %57 : vector<32x64xf32>
    %cst_25 = arith.constant dense<0x7F800000> : vector<32xf32>
    %60 = vector.multi_reduction <minimumf>, %59, %cst_25 [1] : vector<32x64xf32> to vector<32xf32>
    %61 = vector.shape_cast %60 : vector<32xf32> to vector<32x1xf32>
    %62 = tpu.iota {dimensions = array<i32: 1>} : vector<32x64xi32>
    %63 = vector.broadcast %61 : vector<32x1xf32> to vector<32x64xf32>
    %64 = arith.cmpf ole, %59, %63 : vector<32x64xf32>
    %c64_i32_26 = arith.constant 64 : i32
    %65 = vector.broadcast %c64_i32_26 : i32 to vector<32x64xi32>
    %66 = arith.select %64, %62, %65 : vector<32x64xi1>, vector<32x64xi32>
    %cst_27 = arith.constant dense<2147483647> : vector<32xi32>
    %67 = vector.multi_reduction <minsi>, %66, %cst_27 [1] : vector<32x64xi32> to vector<32xi32>
    %68 = vector.shape_cast %67 : vector<32xi32> to vector<32x1xi32>
    %69 = tpu.iota {dimensions = array<i32: 1>} : vector<32x64xi32>
    %70 = vector.broadcast %68 : vector<32x1xi32> to vector<32x64xi32>
    %71 = arith.cmpi eq, %69, %70 : vector<32x64xi32>
    %72 = arith.extui %71 : vector<32x64xi1> to vector<32x64xi32>
    %73 = arith.sitofp %72 : vector<32x64xi32> to vector<32x64xf32>
    %cst_28 = arith.constant dense<0.000000e+00> : vector<32x128xf32>
    %74 = tpu.matmul %73, %53, %cst_28 {dimension_numbers = #tpu.dot_dimension_numbers<[1], [0], [0], [1], [0, 0, 1, 1], [], []>} : vector<32x64xf32>, vector<64x128xf32>, vector<32x128xf32> -> vector<32x128xf32>
    %75 = arith.subf %52, %74 : vector<32x128xf32>
    %c192 = arith.constant 192 : index
    %c0_29 = arith.constant 0 : index
    %76 = vector.load %arg4[%c192, %c0_29] : memref<768x128xf32, #tpu.memory_space<vmem>>, vector<64x128xf32>
    %c15 = arith.constant 15 : index
    %c0_30 = arith.constant 0 : index
    %77 = vector.load %arg1[%c15, %c0_30] : memref<16x768xf32, #tpu.memory_space<vmem>>, vector<1x64xf32>
    %cst_31 = arith.constant dense<0.000000e+00> : vector<32x64xf32>
    %78 = tpu.matmul %75, %76, %cst_31 {dimension_numbers = #tpu.dot_dimension_numbers<[1], [1], [0], [0], [0, 0, 1, 0], [], []>} : vector<32x128xf32>, vector<64x128xf32>, vector<32x64xf32> -> vector<32x64xf32>
    %cst_32 = arith.constant 2.000000e+00 : f32
    %79 = vector.broadcast %cst_32 : f32 to vector<32x64xf32>
    %80 = arith.mulf %79, %78 : vector<32x64xf32>
    %81 = vector.broadcast %77 : vector<1x64xf32> to vector<32x64xf32>
    %82 = arith.subf %81, %80 : vector<32x64xf32>
    %cst_33 = arith.constant dense<0x7F800000> : vector<32xf32>
    %83 = vector.multi_reduction <minimumf>, %82, %cst_33 [1] : vector<32x64xf32> to vector<32xf32>
    %84 = vector.shape_cast %83 : vector<32xf32> to vector<32x1xf32>
    %85 = tpu.iota {dimensions = array<i32: 1>} : vector<32x64xi32>
    %86 = vector.broadcast %84 : vector<32x1xf32> to vector<32x64xf32>
    %87 = arith.cmpf ole, %82, %86 : vector<32x64xf32>
    %c64_i32_34 = arith.constant 64 : i32
    %88 = vector.broadcast %c64_i32_34 : i32 to vector<32x64xi32>
    %89 = arith.select %87, %85, %88 : vector<32x64xi1>, vector<32x64xi32>
    %cst_35 = arith.constant dense<2147483647> : vector<32xi32>
    %90 = vector.multi_reduction <minsi>, %89, %cst_35 [1] : vector<32x64xi32> to vector<32xi32>
    %91 = vector.shape_cast %90 : vector<32xi32> to vector<32x1xi32>
    %92 = vector.extract_strided_slice %0 {offsets = [0, 16], sizes = [32, 1], strides = [1, 1]} : vector<32x128xf32> to vector<32x1xf32>
    %93 = arith.fptosi %92 : vector<32x1xf32> to vector<32x1xi32>
    %94 = tpu.iota {dimensions = array<i32: 1>} : vector<32x512xi32>
    %c0_i32 = arith.constant 0 : i32
    %95 = vector.broadcast %c0_i32 : i32 to vector<32x1xi32>
    %96 = arith.addi %93, %95 : vector<32x1xi32>
    %97 = vector.broadcast %96 : vector<32x1xi32> to vector<32x512xi32>
    %98 = arith.cmpi eq, %94, %97 : vector<32x512xi32>
    %c256_i32 = arith.constant 256 : i32
    %99 = vector.broadcast %c256_i32 : i32 to vector<32x1xi32>
    %100 = arith.addi %22, %99 : vector<32x1xi32>
    %101 = vector.broadcast %100 : vector<32x1xi32> to vector<32x512xi32>
    %102 = arith.cmpi eq, %94, %101 : vector<32x512xi32>
    %103 = arith.ori %98, %102 : vector<32x512xi1>
    %c320_i32 = arith.constant 320 : i32
    %104 = vector.broadcast %c320_i32 : i32 to vector<32x1xi32>
    %105 = arith.addi %45, %104 : vector<32x1xi32>
    %106 = vector.broadcast %105 : vector<32x1xi32> to vector<32x512xi32>
    %107 = arith.cmpi eq, %94, %106 : vector<32x512xi32>
    %108 = arith.ori %103, %107 : vector<32x512xi1>
    %c384_i32 = arith.constant 384 : i32
    %109 = vector.broadcast %c384_i32 : i32 to vector<32x1xi32>
    %110 = arith.addi %68, %109 : vector<32x1xi32>
    %111 = vector.broadcast %110 : vector<32x1xi32> to vector<32x512xi32>
    %112 = arith.cmpi eq, %94, %111 : vector<32x512xi32>
    %113 = arith.ori %108, %112 : vector<32x512xi1>
    %c448_i32 = arith.constant 448 : i32
    %114 = vector.broadcast %c448_i32 : i32 to vector<32x1xi32>
    %115 = arith.addi %91, %114 : vector<32x1xi32>
    %116 = vector.broadcast %115 : vector<32x1xi32> to vector<32x512xi32>
    %117 = arith.cmpi eq, %94, %116 : vector<32x512xi32>
    %118 = arith.ori %113, %117 : vector<32x512xi1>
    %119 = arith.extui %118 : vector<32x512xi1> to vector<32x512xi32>
    %120 = arith.sitofp %119 : vector<32x512xi32> to vector<32x512xf32>
    %121 = arith.truncf %120 : vector<32x512xf32> to vector<32x512xbf16>
    %c256 = arith.constant 256 : index
    %c0_36 = arith.constant 0 : index
    %122 = vector.load %arg4[%c256, %c0_36] : memref<768x128xf32, #tpu.memory_space<vmem>>, vector<512x128xf32>
    %123 = arith.truncf %122 : vector<512x128xf32> to vector<512x128xbf16>
    %cst_37 = arith.constant dense<0.000000e+00> : vector<32x128xf32>
    %124 = tpu.matmul %121, %123, %cst_37 {dimension_numbers = #tpu.dot_dimension_numbers<[1], [0], [0], [1], [0, 0, 1, 1], [], []>} : vector<32x512xbf16>, vector<512x128xbf16>, vector<32x128xf32> -> vector<32x128xf32>
    %c2 = arith.constant 2 : index
    %c0_38 = arith.constant 0 : index
    %125 = vector.load %arg1[%c2, %c0_38] : memref<16x768xf32, #tpu.memory_space<vmem>>, vector<1x128xf32>
    %126 = arith.mulf %124, %124 : vector<32x128xf32>
    %cst_39 = arith.constant dense<0.000000e+00> : vector<32xf32>
    %127 = vector.multi_reduction <add>, %126, %cst_39 [1] : vector<32x128xf32> to vector<32xf32>
    %128 = vector.shape_cast %127 : vector<32xf32> to vector<32x1xf32>
    %cst_40 = arith.constant 1.280000e+02 : f32
    %129 = vector.broadcast %cst_40 : f32 to vector<32x1xf32>
    %130 = arith.divf %128, %129 : vector<32x1xf32>
    %cst_41 = arith.constant 9.99999997E-7 : f32
    %131 = vector.broadcast %cst_41 : f32 to vector<32x1xf32>
    %132 = arith.addf %130, %131 : vector<32x1xf32>
    %133 = math.rsqrt %132 : vector<32x1xf32>
    %134 = vector.broadcast %133 : vector<32x1xf32> to vector<32x128xf32>
    %135 = arith.mulf %124, %134 : vector<32x128xf32>
    %136 = vector.broadcast %125 : vector<1x128xf32> to vector<32x128xf32>
    %137 = arith.mulf %135, %136 : vector<32x128xf32>
    %c0_42 = arith.constant 0 : index
    %c128_43 = arith.constant 128 : index
    %138 = vector.load %arg2[%c0_42, %c128_43] : memref<128x2048xbf16, #tpu.memory_space<vmem>>, vector<128x384xbf16>
    %139 = arith.truncf %137 : vector<32x128xf32> to vector<32x128xbf16>
    %cst_44 = arith.constant dense<0.000000e+00> : vector<32x384xf32>
    %140 = tpu.matmul %139, %138, %cst_44 {dimension_numbers = #tpu.dot_dimension_numbers<[1], [0], [0], [1], [0, 0, 1, 1], [], []>} : vector<32x128xbf16>, vector<128x384xbf16>, vector<32x384xf32> -> vector<32x384xf32>
    %c3 = arith.constant 3 : index
    %c0_45 = arith.constant 0 : index
    %141 = vector.load %arg1[%c3, %c0_45] : memref<16x768xf32, #tpu.memory_space<vmem>>, vector<1x384xf32>
    %142 = vector.broadcast %141 : vector<1x384xf32> to vector<32x384xf32>
    %143 = arith.addf %140, %142 : vector<32x384xf32>
    %144 = vector.extract_strided_slice %143 {offsets = [0, 0], sizes = [32, 128], strides = [1, 1]} : vector<32x384xf32> to vector<32x128xf32>
    %145 = vector.extract_strided_slice %143 {offsets = [0, 128], sizes = [32, 128], strides = [1, 1]} : vector<32x384xf32> to vector<32x128xf32>
    %146 = vector.extract_strided_slice %143 {offsets = [0, 256], sizes = [32, 128], strides = [1, 1]} : vector<32x384xf32> to vector<32x128xf32>
    %147 = tpu.iota {dimensions = array<i32: 0>} : vector<32x32xi32>
    %148 = tpu.iota {dimensions = array<i32: 1>} : vector<32x32xi32>
    %c-16_i32 = arith.constant -16 : i32
    %149 = vector.broadcast %c-16_i32 : i32 to vector<32x32xi32>
    %150 = arith.andi %147, %149 : vector<32x32xi32>
    %c-16_i32_46 = arith.constant -16 : i32
    %151 = vector.broadcast %c-16_i32_46 : i32 to vector<32x32xi32>
    %152 = arith.andi %148, %151 : vector<32x32xi32>
    %153 = arith.cmpi eq, %150, %152 : vector<32x32xi32>
    %154 = arith.cmpi sle, %148, %147 : vector<32x32xi32>
    %155 = arith.andi %153, %154 : vector<32x32xi1>
    %cst_47 = arith.constant 0.000000e+00 : f32
    %cst_48 = arith.constant -1.000000e+30 : f32
    %156 = vector.broadcast %cst_47 : f32 to vector<32x32xf32>
    %157 = vector.broadcast %cst_48 : f32 to vector<32x32xf32>
    %158 = arith.select %155, %156, %157 : vector<32x32xi1>, vector<32x32xf32>
    %159 = arith.truncf %144 : vector<32x128xf32> to vector<32x128xbf16>
    %160 = arith.truncf %145 : vector<32x128xf32> to vector<32x128xbf16>
    %cst_49 = arith.constant dense<0.000000e+00> : vector<32x32xf32>
    %161 = tpu.matmul %159, %160, %cst_49 {dimension_numbers = #tpu.dot_dimension_numbers<[1], [1], [0], [0], [0, 0, 1, 0], [], []>} : vector<32x128xbf16>, vector<32x128xbf16>, vector<32x32xf32> -> vector<32x32xf32>
    %cst_50 = arith.constant 0.0883883461 : f32
    %162 = vector.broadcast %cst_50 : f32 to vector<32x32xf32>
    %163 = arith.mulf %161, %162 : vector<32x32xf32>
    %164 = arith.addf %163, %158 : vector<32x32xf32>
    %cst_51 = arith.constant dense<0xFF800000> : vector<32xf32>
    %165 = vector.multi_reduction <maximumf>, %164, %cst_51 [1] : vector<32x32xf32> to vector<32xf32>
    %166 = vector.shape_cast %165 : vector<32xf32> to vector<32x1xf32>
    %167 = vector.broadcast %166 : vector<32x1xf32> to vector<32x32xf32>
    %168 = arith.subf %164, %167 : vector<32x32xf32>
    %169 = math.exp %168 : vector<32x32xf32>
    %cst_52 = arith.constant dense<0.000000e+00> : vector<32xf32>
    %170 = vector.multi_reduction <add>, %169, %cst_52 [1] : vector<32x32xf32> to vector<32xf32>
    %171 = vector.shape_cast %170 : vector<32xf32> to vector<32x1xf32>
    %172 = tpu.reciprocal %171 {approx = true} : vector<32x1xf32> -> vector<32x1xf32>
    %173 = vector.broadcast %172 : vector<32x1xf32> to vector<32x32xf32>
    %174 = arith.mulf %169, %173 : vector<32x32xf32>
    %175 = arith.truncf %174 : vector<32x32xf32> to vector<32x32xbf16>
    %176 = arith.truncf %146 : vector<32x128xf32> to vector<32x128xbf16>
    %cst_53 = arith.constant dense<0.000000e+00> : vector<32x128xf32>
    %177 = tpu.matmul %175, %176, %cst_53 {dimension_numbers = #tpu.dot_dimension_numbers<[1], [0], [0], [1], [0, 0, 1, 1], [], []>} : vector<32x32xbf16>, vector<32x128xbf16>, vector<32x128xf32> -> vector<32x128xf32>
    %c0_54 = arith.constant 0 : index
    %c512 = arith.constant 512 : index
    %178 = vector.load %arg2[%c0_54, %c512] : memref<128x2048xbf16, #tpu.memory_space<vmem>>, vector<128x128xbf16>
    %179 = arith.truncf %177 : vector<32x128xf32> to vector<32x128xbf16>
    %cst_55 = arith.constant dense<0.000000e+00> : vector<32x128xf32>
    %180 = tpu.matmul %179, %178, %cst_55 {dimension_numbers = #tpu.dot_dimension_numbers<[1], [0], [0], [1], [0, 0, 1, 1], [], []>} : vector<32x128xbf16>, vector<128x128xbf16>, vector<32x128xf32> -> vector<32x128xf32>
    %181 = arith.addf %124, %180 : vector<32x128xf32>
    %c4 = arith.constant 4 : index
    %c0_56 = arith.constant 0 : index
    %182 = vector.load %arg1[%c4, %c0_56] : memref<16x768xf32, #tpu.memory_space<vmem>>, vector<1x128xf32>
    %183 = vector.broadcast %182 : vector<1x128xf32> to vector<32x128xf32>
    %184 = arith.addf %181, %183 : vector<32x128xf32>
    %c5 = arith.constant 5 : index
    %c0_57 = arith.constant 0 : index
    %185 = vector.load %arg1[%c5, %c0_57] : memref<16x768xf32, #tpu.memory_space<vmem>>, vector<1x128xf32>
    %186 = arith.mulf %184, %184 : vector<32x128xf32>
    %cst_58 = arith.constant dense<0.000000e+00> : vector<32xf32>
    %187 = vector.multi_reduction <add>, %186, %cst_58 [1] : vector<32x128xf32> to vector<32xf32>
    %188 = vector.shape_cast %187 : vector<32xf32> to vector<32x1xf32>
    %cst_59 = arith.constant 1.280000e+02 : f32
    %189 = vector.broadcast %cst_59 : f32 to vector<32x1xf32>
    %190 = arith.divf %188, %189 : vector<32x1xf32>
    %cst_60 = arith.constant 9.99999997E-7 : f32
    %191 = vector.broadcast %cst_60 : f32 to vector<32x1xf32>
    %192 = arith.addf %190, %191 : vector<32x1xf32>
    %193 = math.rsqrt %192 : vector<32x1xf32>
    %194 = vector.broadcast %193 : vector<32x1xf32> to vector<32x128xf32>
    %195 = arith.mulf %184, %194 : vector<32x128xf32>
    %196 = vector.broadcast %185 : vector<1x128xf32> to vector<32x128xf32>
    %197 = arith.mulf %195, %196 : vector<32x128xf32>
    %c0_61 = arith.constant 0 : index
    %c640 = arith.constant 640 : index
    %198 = vector.load %arg2[%c0_61, %c640] : memref<128x2048xbf16, #tpu.memory_space<vmem>>, vector<128x256xbf16>
    %199 = arith.truncf %197 : vector<32x128xf32> to vector<32x128xbf16>
    %cst_62 = arith.constant dense<0.000000e+00> : vector<32x256xf32>
    %200 = tpu.matmul %199, %198, %cst_62 {dimension_numbers = #tpu.dot_dimension_numbers<[1], [0], [0], [1], [0, 0, 1, 1], [], []>} : vector<32x128xbf16>, vector<128x256xbf16>, vector<32x256xf32> -> vector<32x256xf32>
    %c6 = arith.constant 6 : index
    %c0_63 = arith.constant 0 : index
    %201 = vector.load %arg1[%c6, %c0_63] : memref<16x768xf32, #tpu.memory_space<vmem>>, vector<1x256xf32>
    %202 = vector.broadcast %201 : vector<1x256xf32> to vector<32x256xf32>
    %203 = arith.addf %200, %202 : vector<32x256xf32>
    %204 = arith.negf %203 : vector<32x256xf32>
    %205 = math.exp %204 : vector<32x256xf32>
    %cst_64 = arith.constant 1.000000e+00 : f32
    %206 = vector.broadcast %cst_64 : f32 to vector<32x256xf32>
    %207 = arith.addf %206, %205 : vector<32x256xf32>
    %208 = arith.divf %206, %207 : vector<32x256xf32>
    %209 = arith.mulf %203, %208 : vector<32x256xf32>
    %c0_65 = arith.constant 0 : index
    %c0_66 = arith.constant 0 : index
    %210 = vector.load %arg3[%c0_65, %c0_66] : memref<256x256xbf16, #tpu.memory_space<vmem>>, vector<256x128xbf16>
    %211 = arith.truncf %209 : vector<32x256xf32> to vector<32x256xbf16>
    %cst_67 = arith.constant dense<0.000000e+00> : vector<32x128xf32>
    %212 = tpu.matmul %211, %210, %cst_67 {dimension_numbers = #tpu.dot_dimension_numbers<[1], [0], [0], [1], [0, 0, 1, 1], [], []>} : vector<32x256xbf16>, vector<256x128xbf16>, vector<32x128xf32> -> vector<32x128xf32>
    %213 = arith.addf %184, %212 : vector<32x128xf32>
    %c7 = arith.constant 7 : index
    %c0_68 = arith.constant 0 : index
    %214 = vector.load %arg1[%c7, %c0_68] : memref<16x768xf32, #tpu.memory_space<vmem>>, vector<1x128xf32>
    %215 = vector.broadcast %214 : vector<1x128xf32> to vector<32x128xf32>
    %216 = arith.addf %213, %215 : vector<32x128xf32>
    %c8 = arith.constant 8 : index
    %c0_69 = arith.constant 0 : index
    %217 = vector.load %arg1[%c8, %c0_69] : memref<16x768xf32, #tpu.memory_space<vmem>>, vector<1x128xf32>
    %218 = arith.mulf %216, %216 : vector<32x128xf32>
    %cst_70 = arith.constant dense<0.000000e+00> : vector<32xf32>
    %219 = vector.multi_reduction <add>, %218, %cst_70 [1] : vector<32x128xf32> to vector<32xf32>
    %220 = vector.shape_cast %219 : vector<32xf32> to vector<32x1xf32>
    %cst_71 = arith.constant 1.280000e+02 : f32
    %221 = vector.broadcast %cst_71 : f32 to vector<32x1xf32>
    %222 = arith.divf %220, %221 : vector<32x1xf32>
    %cst_72 = arith.constant 9.99999997E-7 : f32
    %223 = vector.broadcast %cst_72 : f32 to vector<32x1xf32>
    %224 = arith.addf %222, %223 : vector<32x1xf32>
    %225 = math.rsqrt %224 : vector<32x1xf32>
    %226 = vector.broadcast %225 : vector<32x1xf32> to vector<32x128xf32>
    %227 = arith.mulf %216, %226 : vector<32x128xf32>
    %228 = vector.broadcast %217 : vector<1x128xf32> to vector<32x128xf32>
    %229 = arith.mulf %227, %228 : vector<32x128xf32>
    %c0_73 = arith.constant 0 : index
    %c896 = arith.constant 896 : index
    %230 = vector.load %arg2[%c0_73, %c896] : memref<128x2048xbf16, #tpu.memory_space<vmem>>, vector<128x256xbf16>
    %231 = arith.truncf %229 : vector<32x128xf32> to vector<32x128xbf16>
    %cst_74 = arith.constant dense<0.000000e+00> : vector<32x256xf32>
    %232 = tpu.matmul %231, %230, %cst_74 {dimension_numbers = #tpu.dot_dimension_numbers<[1], [0], [0], [1], [0, 0, 1, 1], [], []>} : vector<32x128xbf16>, vector<128x256xbf16>, vector<32x256xf32> -> vector<32x256xf32>
    %c9 = arith.constant 9 : index
    %c0_75 = arith.constant 0 : index
    %233 = vector.load %arg1[%c9, %c0_75] : memref<16x768xf32, #tpu.memory_space<vmem>>, vector<1x256xf32>
    %234 = vector.broadcast %233 : vector<1x256xf32> to vector<32x256xf32>
    %235 = arith.addf %232, %234 : vector<32x256xf32>
    %236 = arith.negf %235 : vector<32x256xf32>
    %237 = math.exp %236 : vector<32x256xf32>
    %cst_76 = arith.constant 1.000000e+00 : f32
    %238 = vector.broadcast %cst_76 : f32 to vector<32x256xf32>
    %239 = arith.addf %238, %237 : vector<32x256xf32>
    %240 = arith.divf %238, %239 : vector<32x256xf32>
    %241 = arith.mulf %235, %240 : vector<32x256xf32>
    %c0_77 = arith.constant 0 : index
    %c128_78 = arith.constant 128 : index
    %242 = vector.load %arg3[%c0_77, %c128_78] : memref<256x256xbf16, #tpu.memory_space<vmem>>, vector<256x128xbf16>
    %243 = arith.truncf %241 : vector<32x256xf32> to vector<32x256xbf16>
    %cst_79 = arith.constant dense<0.000000e+00> : vector<32x128xf32>
    %244 = tpu.matmul %243, %242, %cst_79 {dimension_numbers = #tpu.dot_dimension_numbers<[1], [0], [0], [1], [0, 0, 1, 1], [], []>} : vector<32x256xbf16>, vector<256x128xbf16>, vector<32x128xf32> -> vector<32x128xf32>
    %245 = arith.addf %216, %244 : vector<32x128xf32>
    %c10 = arith.constant 10 : index
    %c0_80 = arith.constant 0 : index
    %246 = vector.load %arg1[%c10, %c0_80] : memref<16x768xf32, #tpu.memory_space<vmem>>, vector<1x128xf32>
    %247 = vector.broadcast %246 : vector<1x128xf32> to vector<32x128xf32>
    %248 = arith.addf %245, %247 : vector<32x128xf32>
    %c0_81 = arith.constant 0 : index
    %c1152 = arith.constant 1152 : index
    %249 = vector.load %arg2[%c0_81, %c1152] : memref<128x2048xbf16, #tpu.memory_space<vmem>>, vector<128x768xbf16>
    %250 = arith.truncf %248 : vector<32x128xf32> to vector<32x128xbf16>
    %cst_82 = arith.constant dense<0.000000e+00> : vector<32x768xf32>
    %251 = tpu.matmul %250, %249, %cst_82 {dimension_numbers = #tpu.dot_dimension_numbers<[1], [0], [0], [1], [0, 0, 1, 1], [], []>} : vector<32x128xbf16>, vector<128x768xbf16>, vector<32x768xf32> -> vector<32x768xf32>
    %c11 = arith.constant 11 : index
    %c0_83 = arith.constant 0 : index
    %252 = vector.load %arg1[%c11, %c0_83] : memref<16x768xf32, #tpu.memory_space<vmem>>, vector<1x768xf32>
    %253 = vector.broadcast %252 : vector<1x768xf32> to vector<32x768xf32>
    %254 = arith.addf %251, %253 : vector<32x768xf32>
    %255 = vector.extract_strided_slice %254 {offsets = [0, 0], sizes = [32, 256], strides = [1, 1]} : vector<32x768xf32> to vector<32x256xf32>
    %cst_84 = arith.constant dense<0xFF800000> : vector<32xf32>
    %256 = vector.multi_reduction <maximumf>, %255, %cst_84 [1] : vector<32x256xf32> to vector<32xf32>
    %257 = vector.shape_cast %256 : vector<32xf32> to vector<32x1xf32>
    %258 = tpu.iota {dimensions = array<i32: 1>} : vector<32x256xi32>
    %259 = vector.broadcast %257 : vector<32x1xf32> to vector<32x256xf32>
    %260 = arith.cmpf oge, %255, %259 : vector<32x256xf32>
    %c256_i32_85 = arith.constant 256 : i32
    %261 = vector.broadcast %c256_i32_85 : i32 to vector<32x256xi32>
    %262 = arith.select %260, %258, %261 : vector<32x256xi1>, vector<32x256xi32>
    %cst_86 = arith.constant dense<2147483647> : vector<32xi32>
    %263 = vector.multi_reduction <minsi>, %262, %cst_86 [1] : vector<32x256xi32> to vector<32xi32>
    %264 = vector.shape_cast %263 : vector<32xi32> to vector<32x1xi32>
    %265 = vector.extract_strided_slice %254 {offsets = [0, 256], sizes = [32, 128], strides = [1, 1]} : vector<32x768xf32> to vector<32x128xf32>
    %cst_87 = arith.constant dense<0xFF800000> : vector<32xf32>
    %266 = vector.multi_reduction <maximumf>, %265, %cst_87 [1] : vector<32x128xf32> to vector<32xf32>
    %267 = vector.shape_cast %266 : vector<32xf32> to vector<32x1xf32>
    %268 = tpu.iota {dimensions = array<i32: 1>} : vector<32x128xi32>
    %269 = vector.broadcast %267 : vector<32x1xf32> to vector<32x128xf32>
    %270 = arith.cmpf oge, %265, %269 : vector<32x128xf32>
    %c128_i32 = arith.constant 128 : i32
    %271 = vector.broadcast %c128_i32 : i32 to vector<32x128xi32>
    %272 = arith.select %270, %268, %271 : vector<32x128xi1>, vector<32x128xi32>
    %cst_88 = arith.constant dense<2147483647> : vector<32xi32>
    %273 = vector.multi_reduction <minsi>, %272, %cst_88 [1] : vector<32x128xi32> to vector<32xi32>
    %274 = vector.shape_cast %273 : vector<32xi32> to vector<32x1xi32>
    %275 = vector.extract_strided_slice %254 {offsets = [0, 384], sizes = [32, 128], strides = [1, 1]} : vector<32x768xf32> to vector<32x128xf32>
    %cst_89 = arith.constant dense<0xFF800000> : vector<32xf32>
    %276 = vector.multi_reduction <maximumf>, %275, %cst_89 [1] : vector<32x128xf32> to vector<32xf32>
    %277 = vector.shape_cast %276 : vector<32xf32> to vector<32x1xf32>
    %278 = tpu.iota {dimensions = array<i32: 1>} : vector<32x128xi32>
    %279 = vector.broadcast %277 : vector<32x1xf32> to vector<32x128xf32>
    %280 = arith.cmpf oge, %275, %279 : vector<32x128xf32>
    %c128_i32_90 = arith.constant 128 : i32
    %281 = vector.broadcast %c128_i32_90 : i32 to vector<32x128xi32>
    %282 = arith.select %280, %278, %281 : vector<32x128xi1>, vector<32x128xi32>
    %cst_91 = arith.constant dense<2147483647> : vector<32xi32>
    %283 = vector.multi_reduction <minsi>, %282, %cst_91 [1] : vector<32x128xi32> to vector<32xi32>
    %284 = vector.shape_cast %283 : vector<32xi32> to vector<32x1xi32>
    %285 = vector.extract_strided_slice %254 {offsets = [0, 512], sizes = [32, 128], strides = [1, 1]} : vector<32x768xf32> to vector<32x128xf32>
    %cst_92 = arith.constant dense<0xFF800000> : vector<32xf32>
    %286 = vector.multi_reduction <maximumf>, %285, %cst_92 [1] : vector<32x128xf32> to vector<32xf32>
    %287 = vector.shape_cast %286 : vector<32xf32> to vector<32x1xf32>
    %288 = tpu.iota {dimensions = array<i32: 1>} : vector<32x128xi32>
    %289 = vector.broadcast %287 : vector<32x1xf32> to vector<32x128xf32>
    %290 = arith.cmpf oge, %285, %289 : vector<32x128xf32>
    %c128_i32_93 = arith.constant 128 : i32
    %291 = vector.broadcast %c128_i32_93 : i32 to vector<32x128xi32>
    %292 = arith.select %290, %288, %291 : vector<32x128xi1>, vector<32x128xi32>
    %cst_94 = arith.constant dense<2147483647> : vector<32xi32>
    %293 = vector.multi_reduction <minsi>, %292, %cst_94 [1] : vector<32x128xi32> to vector<32xi32>
    %294 = vector.shape_cast %293 : vector<32xi32> to vector<32x1xi32>
    %295 = vector.extract_strided_slice %254 {offsets = [0, 640], sizes = [32, 128], strides = [1, 1]} : vector<32x768xf32> to vector<32x128xf32>
    %cst_95 = arith.constant dense<0xFF800000> : vector<32xf32>
    %296 = vector.multi_reduction <maximumf>, %295, %cst_95 [1] : vector<32x128xf32> to vector<32xf32>
    %297 = vector.shape_cast %296 : vector<32xf32> to vector<32x1xf32>
    %298 = tpu.iota {dimensions = array<i32: 1>} : vector<32x128xi32>
    %299 = vector.broadcast %297 : vector<32x1xf32> to vector<32x128xf32>
    %300 = arith.cmpf oge, %295, %299 : vector<32x128xf32>
    %c128_i32_96 = arith.constant 128 : i32
    %301 = vector.broadcast %c128_i32_96 : i32 to vector<32x128xi32>
    %302 = arith.select %300, %298, %301 : vector<32x128xi1>, vector<32x128xi32>
    %cst_97 = arith.constant dense<2147483647> : vector<32xi32>
    %303 = vector.multi_reduction <minsi>, %302, %cst_97 [1] : vector<32x128xi32> to vector<32xi32>
    %304 = vector.shape_cast %303 : vector<32xi32> to vector<32x1xi32>
    %305 = tpu.iota {dimensions = array<i32: 1>} : vector<32x256xi32>
    %c0_i32_98 = arith.constant 0 : i32
    %306 = vector.broadcast %c0_i32_98 : i32 to vector<32x1xi32>
    %307 = arith.addi %274, %306 : vector<32x1xi32>
    %308 = vector.broadcast %307 : vector<32x1xi32> to vector<32x256xi32>
    %309 = arith.cmpi eq, %305, %308 : vector<32x256xi32>
    %c64_i32_99 = arith.constant 64 : i32
    %310 = vector.broadcast %c64_i32_99 : i32 to vector<32x1xi32>
    %311 = arith.addi %284, %310 : vector<32x1xi32>
    %312 = vector.broadcast %311 : vector<32x1xi32> to vector<32x256xi32>
    %313 = arith.cmpi eq, %305, %312 : vector<32x256xi32>
    %314 = arith.ori %309, %313 : vector<32x256xi1>
    %c128_i32_100 = arith.constant 128 : i32
    %315 = vector.broadcast %c128_i32_100 : i32 to vector<32x1xi32>
    %316 = arith.addi %294, %315 : vector<32x1xi32>
    %317 = vector.broadcast %316 : vector<32x1xi32> to vector<32x256xi32>
    %318 = arith.cmpi eq, %305, %317 : vector<32x256xi32>
    %319 = arith.ori %314, %318 : vector<32x256xi1>
    %c192_i32 = arith.constant 192 : i32
    %320 = vector.broadcast %c192_i32 : i32 to vector<32x1xi32>
    %321 = arith.addi %304, %320 : vector<32x1xi32>
    %322 = vector.broadcast %321 : vector<32x1xi32> to vector<32x256xi32>
    %323 = arith.cmpi eq, %305, %322 : vector<32x256xi32>
    %324 = arith.ori %319, %323 : vector<32x256xi1>
    %325 = arith.extui %324 : vector<32x256xi1> to vector<32x256xi32>
    %326 = arith.sitofp %325 : vector<32x256xi32> to vector<32x256xf32>
    %c0_101 = arith.constant 0 : index
    %c0_102 = arith.constant 0 : index
    %327 = vector.load %arg4[%c0_101, %c0_102] : memref<768x128xf32, #tpu.memory_space<vmem>>, vector<256x128xf32>
    %cst_103 = arith.constant dense<0.000000e+00> : vector<32x128xf32>
    %328 = tpu.matmul %326, %327, %cst_103 {dimension_numbers = #tpu.dot_dimension_numbers<[1], [0], [0], [1], [0, 0, 1, 1], [], []>} : vector<32x256xf32>, vector<256x128xf32>, vector<32x128xf32> -> vector<32x128xf32>
    %c0_104 = arith.constant 0 : index
    %c1920 = arith.constant 1920 : index
    %329 = vector.load %arg2[%c0_104, %c1920] : memref<128x2048xbf16, #tpu.memory_space<vmem>>, vector<128x128xbf16>
    %330 = arith.truncf %328 : vector<32x128xf32> to vector<32x128xbf16>
    %cst_105 = arith.constant dense<0.000000e+00> : vector<32x128xf32>
    %331 = tpu.matmul %330, %329, %cst_105 {dimension_numbers = #tpu.dot_dimension_numbers<[1], [0], [0], [1], [0, 0, 1, 1], [], []>} : vector<32x128xbf16>, vector<128x128xbf16>, vector<32x128xf32> -> vector<32x128xf32>
    %c1 = arith.constant 1 : index
    %c0_106 = arith.constant 0 : index
    %332 = vector.load %arg1[%c1, %c0_106] : memref<16x768xf32, #tpu.memory_space<vmem>>, vector<1x128xf32>
    %333 = vector.broadcast %332 : vector<1x128xf32> to vector<32x128xf32>
    %334 = arith.addf %331, %333 : vector<32x128xf32>
    %c0_107 = arith.constant 0 : index
    %c0_108 = arith.constant 0 : index
    %335 = vector.load %arg6[%c0_107, %c0_108] : memref<32x128xf32, #tpu.memory_space<vmem>>, vector<32x128xf32>
    tpu.vector_store %arg6[%c0_107, %c0_108], %334 {strides = array<i32>} : memref<32x128xf32, #tpu.memory_space<vmem>>, vector<32x128xf32>,
    %336 = tpu.iota {dimensions = array<i32: 1>} : vector<32x128xi32>
    %c0_i32_109 = arith.constant 0 : i32
    %337 = vector.broadcast %c0_i32_109 : i32 to vector<32x128xi32>
    %338 = arith.cmpi eq, %336, %337 : vector<32x128xi32>
    %c0_i32_110 = arith.constant 0 : i32
    %339 = vector.shape_cast %264 : vector<32x1xi32> to vector<32x1xi32>
    %340 = vector.broadcast %339 : vector<32x1xi32> to vector<32x128xi32>
    %341 = vector.broadcast %c0_i32_110 : i32 to vector<32x128xi32>
    %342 = arith.select %338, %340, %341 : vector<32x128xi1>, vector<32x128xi32>
    %c1_i32 = arith.constant 1 : i32
    %343 = vector.broadcast %c1_i32 : i32 to vector<32x128xi32>
    %344 = arith.cmpi eq, %336, %343 : vector<32x128xi32>
    %c0_i32_111 = arith.constant 0 : i32
    %345 = vector.shape_cast %274 : vector<32x1xi32> to vector<32x1xi32>
    %346 = vector.broadcast %345 : vector<32x1xi32> to vector<32x128xi32>
    %347 = vector.broadcast %c0_i32_111 : i32 to vector<32x128xi32>
    %348 = arith.select %344, %346, %347 : vector<32x128xi1>, vector<32x128xi32>
    %349 = arith.addi %342, %348 : vector<32x128xi32>
    %c2_i32 = arith.constant 2 : i32
    %350 = vector.broadcast %c2_i32 : i32 to vector<32x128xi32>
    %351 = arith.cmpi eq, %336, %350 : vector<32x128xi32>
    %c0_i32_112 = arith.constant 0 : i32
    %352 = vector.shape_cast %284 : vector<32x1xi32> to vector<32x1xi32>
    %353 = vector.broadcast %352 : vector<32x1xi32> to vector<32x128xi32>
    %354 = vector.broadcast %c0_i32_112 : i32 to vector<32x128xi32>
    %355 = arith.select %351, %353, %354 : vector<32x128xi1>, vector<32x128xi32>
    %356 = arith.addi %349, %355 : vector<32x128xi32>
    %c3_i32 = arith.constant 3 : i32
    %357 = vector.broadcast %c3_i32 : i32 to vector<32x128xi32>
    %358 = arith.cmpi eq, %336, %357 : vector<32x128xi32>
    %c0_i32_113 = arith.constant 0 : i32
    %359 = vector.shape_cast %294 : vector<32x1xi32> to vector<32x1xi32>
    %360 = vector.broadcast %359 : vector<32x1xi32> to vector<32x128xi32>
    %361 = vector.broadcast %c0_i32_113 : i32 to vector<32x128xi32>
    %362 = arith.select %358, %360, %361 : vector<32x128xi1>, vector<32x128xi32>
    %363 = arith.addi %356, %362 : vector<32x128xi32>
    %c4_i32 = arith.constant 4 : i32
    %364 = vector.broadcast %c4_i32 : i32 to vector<32x128xi32>
    %365 = arith.cmpi eq, %336, %364 : vector<32x128xi32>
    %c0_i32_114 = arith.constant 0 : i32
    %366 = vector.shape_cast %304 : vector<32x1xi32> to vector<32x1xi32>
    %367 = vector.broadcast %366 : vector<32x1xi32> to vector<32x128xi32>
    %368 = vector.broadcast %c0_i32_114 : i32 to vector<32x128xi32>
    %369 = arith.select %365, %367, %368 : vector<32x128xi1>, vector<32x128xi32>
    %370 = arith.addi %363, %369 : vector<32x128xi32>
    %c0_115 = arith.constant 0 : index
    %c0_116 = arith.constant 0 : index
    %371 = vector.load %arg5[%c0_115, %c0_116] : memref<32x128xi32, #tpu.memory_space<vmem>>, vector<32x128xi32>
    tpu.vector_store %arg5[%c0_115, %c0_116], %370 {strides = array<i32>} : memref<32x128xi32, #tpu.memory_space<vmem>>, vector<32x128xi32>,
    return
  }
}

</mosaic_0001>

<bundles_post_ra>
// kernel: squeeze.3
= control target key start
LH: loop header
LB: loop body
LE: loop exit
PB: predicated region body
PF: predicated region fallthrough
CT: control target
= control target key end

     0   :  { %s85_s0 = inlined_call_operand.vmem [shape: s32[32], index: 0, kind: input, shape index: {}]   ;;  %s86_s1 = inlined_call_operand.hbm [shape: s32[2,16], index: 1, kind: output, shape index: {}]  }
   0x1   :  { %v5_v0 = vld [vmem:[%s85_s0] sm:$0x1] }
   0x2   :  { %2 = vsyncpa [#allocation1], 0  ;;  %6 = vst [vmem:[#allocation3] sm:$0x1] %v5_v0  ;;  %vm8_vm0 = vcmask 130048   ;;  %s58_s0 = smov 112  }
   0x3   :  { %s59_s8 = smov [#allocation0]  }
   0x4   :  { %s26_s9 = sshll.u32 %s59_s8, 4  ;;  %s27_s9 = int_to_ptr.vmem [resolvable:$true] %s26_s9 }
   0x5   :  { %s34_s10 = scalar_lea.vmem %s27_s9, 32  ;;  %p39_p1 = scmp.lt.s32.totalorder %s27_s9, %s27_s9 }
   0x6   :  { %p35_p0 = scmp.ne.s32.totalorder %s27_s9, %s34_s10  ;;  %p40_p2 = scmp.lt.s32.totalorder %s34_s10, %s34_s10 }
   0x8   :  { %p41_p3 = por %p40_p2, %p39_p1 }
   0x9   :  { %v10_v1 = vld [vmem:[#allocation3] sm:$0x1]  }
   0xa   :  { %v7_v2 = vld [vmem:[#allocation3] sm:$0x1]   ;;  %11 = vrot.lane.b32.xlu0 %v10_v1, %s58_s0  ;;  %p42_p4 = pnand %p41_p3, %p35_p0 }
   0xb   :  { %9 = vst.msk [vmem:[#allocation2] sm:$0x1] %vm8_vm0, %v7_v2  }
  0x7c   :  { %v12_v3 = vpop.permute.xlu0 %11  }
  0x7d   :  { %15 = vst.msk [vmem:[#allocation2 + $0x1] sm:$0x1] %vm8_vm0, %v12_v3  }
  0x84   :  { %v19_v4 = vld [vmem:[#allocation2] sm:$0x3] }
  0x85   :  { %21 = vst [vmem:[#allocation0] sm:$0x3] %v19_v4 }
  0x86   :  { %45 = shalt.err (!%p42_p4)
}
  0x87   :  { %s46_s13 = scalar_lea.hbm %s86_s1, 32 }
  0x88   :  { %p47_p5 = scmp.ne.s32.totalorder %s86_s1, %s46_s13  ;;  %p50_p6 = scmp.lt.u32.totalorder %s46_s13, %s86_s1 }
  0x8a   :  { %p52_p7 = pnand %p50_p6, %p47_p5 }
  0x8c   :  { %55 = shalt.err (!%p52_p7)
}
  0x8d   :  { %29 = dma.vmem_to_hbm [thread:$0]  %s27_s9, 32, %s86_s1, [#allocation1]  }
  0x8e   :  { %56 = dma.done.wait [#allocation1], 32  }
  0x8f   :  { %57 = vsyncadd [#allocation1], 4294967264 }
  0x90   :  { %31 = vsyncpa [#allocation1], 1 }

// kernel: josie_forward.1
= control target key start
LH: loop header
LB: loop body
LE: loop exit
PB: predicated region body
PF: predicated region fallthrough
CT: control target
= control target key end

     0   :  { %12 = vsyncpa [#allocation3], 0  ;;  %s6962_s0 = inlined_call_operand.vmem [shape: f32[32,128], index: 0, kind: input, shape index: {}]   ;;  %s6963_s1 = inlined_call_operand.vmem [shape: f32[16,768], index: 1, kind: input, shape index: {}]   ;;  %s6964_s2 = inlined_call_operand.hbm [shape: bf16[128,2048], index: 2, kind: input, shape index: {}]   ;;  %s6965_s3 = inlined_call_operand.hbm [shape: bf16[256,256], index: 3, kind: input, shape index: {}]   ;;  %s6966_s4 = inlined_call_operand.hbm [shape: f32[768,128], index: 4, kind: input, shape index: {}]   ;;  %s6967_s5 = inlined_call_operand.vmem [shape: s32[32,128], index: 5, kind: output, shape index: {0}]   ;;  %s6968_s6 = inlined_call_operand.vmem [shape: f32[32,128], index: 6, kind: output, shape index: {1}]  }
   0x1   :  { %13 = vsyncpa [#allocation5], 0  ;;  %s5569_s21 = smov [#allocation4]   ;;  %s5499_s25 = scalar_lea.hbm %s6965_s3, 4096 }
   0x2   :  { %s35_s22 = sshll.u32 %s5569_s21, 4  ;;  %p5500_p0 = scmp.ne.s32.totalorder %s6965_s3, %s5499_s25  ;;  %s36_s22 = int_to_ptr.vmem [resolvable:$true] %s35_s22 }
   0x3   :  { %p5503_p1 = scmp.lt.u32.totalorder %s5499_s25, %s6965_s3 }
   0x5   :  { %p5505_p2 = pnand %p5503_p1, %p5500_p0 }
   0x7   :  { %5508 = shalt.err (!%p5505_p2)
}
   0x8   :  { %s5509_s30 = scalar_lea.vmem %s36_s22, 4096  ;;  %p5514_p4 = scmp.lt.s32.totalorder %s36_s22, %s36_s22 }
   0x9   :  { %p5510_p3 = scmp.ne.s32.totalorder %s36_s22, %s5509_s30  ;;  %p5515_p5 = scmp.lt.s32.totalorder %s5509_s30, %s5509_s30 }
   0xb   :  { %p5516_p6 = por %p5515_p5, %p5514_p4 }
   0xd   :  { %p5517_p7 = pnand %p5516_p6, %p5510_p3 }
   0xf   :  { %5520 = shalt.err (!%p5517_p7)
}
  0x10   :  { %s5570_s7 = smov 128   ;;  %s5571_s8 = smov 8  }
  0x11   :  { %41 = dma.hbm_to_vmem [thread:$0]  %s6965_s3, 4096, %s36_s22, [#allocation5], %s5570_s7, %s5570_s7, %s5571_s8  }
  0x12   :  { %s5572_s11 = smov [#allocation2]   ;;  %s5521_s15 = scalar_lea.hbm %s6964_s2, 16384 }
  0x13   :  { %s23_s12 = sshll.u32 %s5572_s11, 4  ;;  %p5522_p8 = scmp.ne.s32.totalorder %s6964_s2, %s5521_s15  ;;  %s24_s12 = int_to_ptr.vmem [resolvable:$true] %s23_s12 }
  0x14   :  { %p5525_p9 = scmp.lt.u32.totalorder %s5521_s15, %s6964_s2 }
  0x16   :  { %p5527_p10 = pnand %p5525_p9, %p5522_p8 }
  0x18   :  { %5530 = shalt.err (!%p5527_p10)
}
  0x19   :  { %s5531_s20 = scalar_lea.vmem %s24_s12, 16384  ;;  %p5536_p12 = scmp.lt.s32.totalorder %s24_s12, %s24_s12 }
  0x1a   :  { %p5532_p11 = scmp.ne.s32.totalorder %s24_s12, %s5531_s20  ;;  %p5537_p13 = scmp.lt.s32.totalorder %s5531_s20, %s5531_s20 }
  0x1c   :  { %p5538_p0 = por %p5537_p13, %p5536_p12 }
  0x1e   :  { %p5539_p1 = pnand %p5538_p0, %p5532_p11 }
  0x20   :  { %5542 = shalt.err (!%p5539_p1)
}
  0x21   :  { %s5573_s3 = smov 1024   ;;  %s5574_s21 = smov 64  }
  0x22   :  { %29 = dma.hbm_to_vmem [thread:$0]  %s6964_s2, 16384, %s24_s12, [#allocation3], %s5573_s3, %s5573_s3, %s5574_s21  }
  0x23   :  { %s5575_s24 = smov [#allocation6]   ;;  %s5543_s28 = scalar_lea.hbm %s6966_s4, 12288 }
  0x24   :  { %s47_s25 = sshll.u32 %s5575_s24, 4  ;;  %p5544_p2 = scmp.ne.s32.totalorder %s6966_s4, %s5543_s28  ;;  %s48_s25 = int_to_ptr.vmem [resolvable:$true] %s47_s25 }
  0x25   :  { %p5547_p3 = scmp.lt.u32.totalorder %s5543_s28, %s6966_s4 }
  0x27   :  { %p5549_p4 = pnand %p5547_p3, %p5544_p2 }
  0x29   :  { %5552 = shalt.err (!%p5549_p4)
}
  0x2a   :  { %s5553_s11 = scalar_lea.vmem %s48_s25, 12288  ;;  %p5558_p6 = scmp.lt.s32.totalorder %s48_s25, %s48_s25 }
  0x2b   :  { %p5554_p5 = scmp.ne.s32.totalorder %s48_s25, %s5553_s11  ;;  %p5559_p7 = scmp.lt.s32.totalorder %s5553_s11, %s5553_s11 }
  0x2d   :  { %p5560_p8 = por %p5559_p7, %p5558_p6 }
  0x2f   :  { %p5561_p9 = pnand %p5560_p8, %p5554_p5 }
  0x31   :  { %5564 = shalt.err (!%p5561_p9)
}
  0x32   :  { %53 = dma.hbm_to_vmem [thread:$0]  %s6966_s4, 12288, %s48_s25, [#allocation5], %s5570_s7, %s5570_s7, %s5571_s8  }
  0x33   :  { %5565 = dma.done.wait [#allocation3], 16384  }
  0x34   :  { %5566 = vsyncadd [#allocation3], 4294950912 }
  0x35   :  { %5567 = dma.done.wait [#allocation5], 16384  }
  0x36   :  { %5568 = vsyncadd [#allocation5], 4294950912  ;;  %v68_v0 = vld [vmem:[#allocation2] sm:$0xf]  ;;  %v65_v10 = vld [vmem:[%s6962_s0 + $0x8] sm:$0xff]  ;;  %vm286_vm0 = vcmask 523264  }
  0x37   :  { %v69_v1 = vld [vmem:[#allocation2 + $0x40] sm:$0xf]  ;;  %v185_v15 = vld [vmem:[#allocation6 + $0x8] sm:$0xff]  ;;  %v186_v16 = vld [vmem:[#allocation6 + $0x10] sm:$0xff] }
  0x38   :  { %v70_v2 = vld [vmem:[#allocation2 + $0x80] sm:$0xf]  ;;  %v4416_v3 = vcombine.low %v68_v0, %v69_v1  ;;  %v187_v17 = vld [vmem:[#allocation6 + $0x18] sm:$0xff]  ;;  %v189_v24 = vld [vmem:[#allocation6 + $0x28] sm:$0xff] }
  0x39   :  { %v71_v4 = vld [vmem:[#allocation2 + $0xc0] sm:$0xf]  ;;  %v5197_v20 = vpack.c.bf16 %v187_v17, %v186_v16  ;;  %v190_v32 = vld [vmem:[#allocation6 + $0x30] sm:$0xff]  ;;  %v191_v33 = vld [vmem:[#allocation6 + $0x38] sm:$0xff] }
  0x3a   :  { %v4417_v5 = vcombine.low %v70_v2, %v71_v4  ;;  %v72_v6 = vld [vmem:[#allocation2 + $0x100] sm:$0xf]  ;;  %4943 = vmatprep.subr.bf16.mxu0 %v4416_v3  ;;  %v5205_v37 = vpack.c.bf16 %v191_v33, %v190_v32  ;;  %v66_v39 = vld [vmem:[%s6962_s0 + $0x10] sm:$0xff]  ;;  %v67_v40 = vld [vmem:[%s6962_s0 + $0x18] sm:$0xff]  ;;  %v299_v4 = vlaneseq }
  0x3b   :  { %v73_v7 = vld [vmem:[#allocation2 + $0x140] sm:$0xf]  ;;  %4944 = vmatpush3.bf16.msra.mxu0 %v4416_v3  ;;  %v85_v41 = vpack.c.bf16 %v67_v40, %v66_v39  ;;  %v192_v53 = vld [vmem:[%s6963_s1 + $0x34] ss:$0 sm:$0xff] }
  0x3c   :  { %4945 = vmatprep.subr.bf16.mxu0 %v4417_v5  ;;  %v4418_v8 = vcombine.low %v72_v6, %v73_v7  ;;  %v64_v9 = vld [vmem:[%s6962_s0] sm:$0xff] }
  0x3d   :  { %v74_v11 = vld [vmem:[#allocation2 + $0x180] sm:$0xf]  ;;  %v84_v13 = vpack.c.bf16 %v65_v10, %v64_v9 }
  0x3e   :  { %v75_v12 = vld [vmem:[#allocation2 + $0x1c0] sm:$0xf] }
  0x3f   :  { %v184_v14 = vld [vmem:[#allocation6] sm:$0xff]  ;;  %4946 = vmatpush3.bf16.msra.mxu0 %v4417_v5  ;;  %4959 = vmatprep.mubr.bf16.mxu0 %v84_v13  ;;  %v4419_v21 = vcombine.low %v74_v11, %v75_v12  ;;  %v5693_v5 = vand.u32 127, %v299_v4 }
  0x40   :  { %v76_v18 = vld [vmem:[#allocation2 + $0x200] sm:$0xf]  ;;  %v5193_v19 = vpack.c.bf16 %v185_v15, %v184_v14  ;;  %4947 = vmatprep.subr.bf16.mxu0 %v4418_v8 }
  0x41   :  { %v77_v22 = vld [vmem:[#allocation2 + $0x240] sm:$0xf] }
  0x42   :  { %5194 = vmatprep.subr.bf16.mxu1 %v5193_v19  ;;  %v188_v23 = vld [vmem:[#allocation6 + $0x20] sm:$0xff]  ;;  %v4420_v27 = vcombine.low %v76_v18, %v77_v22 }
  0x43   :  { %5196 = vmatpush3.bf16.xpose.msra.mxu1 %v5193_v19  ;;  %4948 = vmatpush3.bf16.msra.mxu0 %v4418_v8  ;;  %v78_v25 = vld [vmem:[#allocation2 + $0x280] sm:$0xf]  ;;  %v5201_v30 = vpack.c.bf16 %v189_v24, %v188_v23 }
  0x44   :  { %v79_v26 = vld [vmem:[#allocation2 + $0x2c0] sm:$0xf]  ;;  %5198 = vmatprep.subr.bf16.mxu1 %v5197_v20  ;;  %4949 = vmatprep.subr.bf16.mxu0 %v4419_v21 }
  0x45   :  { %v80_v28 = vld [vmem:[#allocation2 + $0x300] sm:$0xf]  ;;  %v4421_v31 = vcombine.low %v78_v25, %v79_v26 }
  0x46   :  { %v81_v29 = vld [vmem:[#allocation2 + $0x340] sm:$0xf] }
  0x47   :  { %4950 = vmatpush3.bf16.msra.mxu0 %v4419_v21  ;;  %v82_v34 = vld [vmem:[#allocation2 + $0x380] sm:$0xf]  ;;  %v4422_v36 = vcombine.low %v80_v28, %v81_v29 }
  0x48   :  { %4951 = vmatprep.subr.bf16.mxu0 %v4420_v27  ;;  %v83_v35 = vld [vmem:[#allocation2 + $0x3c0] sm:$0xf] }
  0x49   :  { %v4423_v38 = vcombine.low %v82_v34, %v83_v35  ;;  %v86_v42 = vld [vmem:[%s6963_s1] ss:$0 sm:$0xff] }
  0x4b   :  { %5200 = vmatpush3.bf16.xpose.msra.mxu1 %v5197_v20  ;;  %4952 = vmatpush3.bf16.msra.mxu0 %v4420_v27 }
  0x4c   :  { %5202 = vmatprep.subr.bf16.mxu1 %v5201_v30  ;;  %4953 = vmatprep.subr.bf16.mxu0 %v4421_v31 }
  0x4f   :  { %4954 = vmatpush3.bf16.msra.mxu0 %v4421_v31 }
  0x50   :  { %4955 = vmatprep.subr.bf16.mxu0 %v4422_v36 }
  0x53   :  { %5204 = vmatpush3.bf16.xpose.msra.mxu1 %v5201_v30  ;;  %4956 = vmatpush3.bf16.msra.mxu0 %v4422_v36 }
  0x54   :  { %5206 = vmatprep.subr.bf16.mxu1 %v5205_v37  ;;  %4957 = vmatprep.subr.bf16.mxu0 %v4423_v38 }
  0x57   :  { %4958 = vmatpush3.bf16.msra.mxu0 %v4423_v38 }
  0x58   :  { %5210 = vmatprep.subr.bf16.mxu0 %v5193_v19 }
  0x5a   :  { %4960 = vmatmul.mubr.bf16.vlgmr.msra.gmra.mrb[0].mxu0 %v85_v41 }
  0x5b   :  { %5208 = vmatpush3.bf16.xpose.msra.mxu1 %v5205_v37  ;;  %5212 = vmatpush3.bf16.msra.mxu0 %v5193_v19 }
  0x5c   :  { %5214 = vmatprep.subr.bf16.mxu0 %v5197_v20 }
  0x5f   :  { %5216 = vmatpush3.bf16.msra.mxu0 %v5197_v20 }
  0x60   :  { %5218 = vmatprep.subr.bf16.mxu0 %v5201_v30 }
  0x63   :  { %5220 = vmatpush3.bf16.msra.mxu0 %v5201_v30 }
  0x64   :  { %5222 = vmatprep.subr.bf16.mxu0 %v5205_v37 }
  0x67   :  { %5224 = vmatpush3.bf16.msra.mxu0 %v5205_v37 }
 0x12d   :  { %v4961_v43 = vpop.f32.mrb[0].mxu0 }
 0x12e   :  { %v169_v44 = vpop.f32.mrb[1].mxu0  ;;  %v5678_v49 = vadd.f32 %v4961_v43, %v86_v42  ;;  %v483_v43 = vld [vmem:[#allocation6 + $0x48] sm:$0xff] }
 0x12f   :  { %v5673_v45 = vadd.f32 %v169_v44, %v86_v42  ;;  %v4962_v46 = vpop.f32.mrb[2].mxu0  ;;  %v484_v44 = vld [vmem:[#allocation6 + $0x50] sm:$0xff] }
 0x130   :  { %v172_v47 = vpop.f32.mrb[3].mxu0  ;;  %v5682_v50 = vadd.f32 %v4962_v46, %v86_v42 }
 0x131   :  { %v5675_v48 = vadd.f32 %v172_v47, %v86_v42  ;;  %4979 = vmatprep.mubr.f32.mxu1 %v5673_v45  ;;  %v482_v42 = vld [vmem:[#allocation6 + $0x40] sm:$0xff]  ;;  %v485_v47 = vld [vmem:[#allocation6 + $0x58] sm:$0xff] }
 0x132   :  { %v5225_v46 = vpack.c.bf16 %v483_v43, %v482_v42 }
 0x133   :  { %4980 = vmatmul.mubr.f32.vlgmr.msra.gmra.mrb[0].mxu1 %v5675_v48 }
 0x134   :  { %4982 = vmatprep.mubr.f32.mxu1 %v5678_v49  ;;  %5226 = vmatprep.subr.bf16.mxu1 %v5225_v46 }
 0x135   :  { %5242 = vmatprep.subr.bf16.mxu0 %v5225_v46  ;;  %5228 = vmatpush3.bf16.xpose.msra.mxu1 %v5225_v46 }
 0x137   :  { %4983 = vmatmul.mubr.f32.gmra.mrb[2].mxu1 %v5682_v50 }
 0x206   :  { %v4981_v51 = vpop.f32.mrb[0].mxu1 }
 0x207   :  { %v259_v52 = vpop.f32.mrb[1].mxu1  ;;  %v279_v54 = vmul.f32 2.0, %v4981_v51  ;;  %v5229_v51 = vpack.c.bf16 %v485_v47, %v484_v44 }
 0x208   :  { %v278_v55 = vmul.f32 2.0, %v259_v52  ;;  %v486_v52 = vld [vmem:[#allocation6 + $0x60] sm:$0xff] }
 0x209   :  { %v283_v62 = vsub.f32 %v192_v53, %v279_v54  ;;  %5230 = vmatprep.subr.bf16.mxu1 %v5229_v51 }
 0x20a   :  { %v4984_v56 = vpop.f32.mrb[2].mxu1  ;;  %v282_v57 = vsub.f32 %v192_v53, %v278_v55  ;;  %5232 = vmatpush3.bf16.xpose.msra.mxu1 %v5229_v51  ;;  %v488_v55 = vld [vmem:[#allocation6 + $0x70] sm:$0xff] }
 0x20b   :  { %v269_v58 = vpop.f32.mrb[3].mxu1  ;;  %v281_v59 = vmul.f32 2.0, %v4984_v56  ;;  %v290_v0 = vsel %vm286_vm0, %v283_v62, inf  ;;  %v489_v56 = vld [vmem:[#allocation6 + $0x78] sm:$0xff] }
 0x20c   :  { %v280_v60 = vmul.f32 2.0, %v269_v58  ;;  %v287_v61 = vsel %vm286_vm0, %v282_v57, inf }
 0x20d   :  { %288 = vmin.xlane.f32.xlu0 %v287_v61  ;;  %v285_v2 = vsub.f32 %v192_v53, %v281_v59 }
 0x20e   :  { %v284_v63 = vsub.f32 %v192_v53, %v280_v60  ;;  %v487_v53 = vld [vmem:[#allocation6 + $0x68] sm:$0xff] }
 0x20f   :  { %v296_v3 = vsel %vm286_vm0, %v285_v2, inf  ;;  %v5233_v54 = vpack.c.bf16 %v487_v53, %v486_v52 }
 0x210   :  { %v293_v1 = vsel %vm286_vm0, %v284_v63, inf }
 0x211   :  { %291 = vmin.xlane.f32.xlu0 %v290_v0  ;;  %294 = vmin.xlane.f32.xlu1 %v293_v1 }
 0x212   :  { %5234 = vmatprep.subr.bf16.mxu1 %v5233_v54 }
 0x213   :  { %5236 = vmatpush3.bf16.xpose.msra.mxu1 %v5233_v54 }
 0x215   :  { %297 = vmin.xlane.f32.xlu1 %v296_v3 }
 0x29a   :  { %v289_v6 = vpop.xlane.xlu0 %288 }
 0x29b   :  { %vm301_vm1 = vcmp.le.f32.partialorder %v282_v57, %v289_v6  ;;  %v5237_v57 = vpack.c.bf16 %v489_v56, %v488_v55 }
 0x29c   :  { %v305_v7 = vsel %vm301_vm1, %v5693_v5, 64 }
 0x29d   :  { %v309_v8 = vsel %vm286_vm0, %v305_v7, 2147483647  ;;  %5238 = vmatprep.subr.bf16.mxu1 %v5237_v57 }
 0x29e   :  { %v292_v9 = vpop.xlane.xlu0 %291  ;;  %v295_v10 = vpop.xlane.xlu1 %294  ;;  %v311_v11 = vshra.s32 %v309_v8, 16  ;;  %v310_v26 = vand.u32 65535, %v309_v8  ;;  %5240 = vmatpush3.bf16.xpose.msra.mxu1 %v5237_v57 }
 0x29f   :  { %vm302_vm2 = vcmp.le.f32.partialorder %v283_v62, %v292_v9  ;;  %vm303_vm3 = vcmp.le.f32.partialorder %v284_v63, %v295_v10  ;;  %v5576_v10 = vmov 0.0  }
 0x2a0   :  { %v306_v12 = vsel %vm302_vm2, %v5693_v5, 64  ;;  %v307_v13 = vsel %vm303_vm3, %v5693_v5, 64  ;;  %v313_v14 = vcvt.s32.f32 %v311_v11  ;;  %v312_v28 = vcvt.s32.f32 %v310_v26 }
 0x2a1   :  { %v324_v15 = vsel %vm286_vm0, %v306_v12, 2147483647  ;;  %v339_v16 = vsel %vm286_vm0, %v307_v13, 2147483647 }
 0x2a2   :  { %314 = vmin.xlane.f32.xlu0 %v313_v14  ;;  %v298_v17 = vpop.xlane.xlu1 %297  ;;  %v326_v18 = vshra.s32 %v324_v15, 16  ;;  %v341_v19 = vshra.s32 %v339_v16, 16  ;;  %v340_v29 = vand.u32 65535, %v339_v16  ;;  %v325_v30 = vand.u32 65535, %v324_v15 }
 0x2a3   :  { %vm304_vm4 = vcmp.le.f32.partialorder %v285_v2, %v298_v17 }
 0x2a4   :  { %v308_v20 = vsel %vm304_vm4, %v5693_v5, 64  ;;  %v328_v21 = vcvt.s32.f32 %v326_v18  ;;  %v343_v22 = vcvt.s32.f32 %v341_v19  ;;  %v342_v34 = vcvt.s32.f32 %v340_v29 }
 0x2a5   :  { %v354_v23 = vsel %vm286_vm0, %v308_v20, 2147483647  ;;  %v327_v35 = vcvt.s32.f32 %v325_v30 }
 0x2a6   :  { %329 = vmin.xlane.f32.xlu1 %v328_v21  ;;  %344 = vmin.xlane.f32.xlu0 %v343_v22  ;;  %v356_v24 = vshra.s32 %v354_v23, 16  ;;  %v355_v36 = vand.u32 65535, %v354_v23 }
 0x2a8   :  { %v358_v25 = vcvt.s32.f32 %v356_v24  ;;  %v357_v40 = vcvt.s32.f32 %v355_v36 }
 0x2aa   :  { %359 = vmin.xlane.f32.xlu1 %v358_v25 }
 0x32f   :  { %v315_v27 = vpop.xlane.xlu0 %314 }
 0x330   :  { %vm316_vm5 = vcmp.eq.f32.partialorder %v313_v14, %v315_v27  ;;  %v321_v58 = vcvt.f32.s32 %v315_v27 }
 0x331   :  { %v317_v31 = vsel %vm316_vm5, %v312_v28, inf }
 0x332   :  { %318 = vmin.xlane.f32.xlu0 %v317_v31  ;;  %v322_v62 = vshll.u32 %v321_v58, 16 }
 0x333   :  { %v345_v32 = vpop.xlane.xlu0 %344  ;;  %v330_v33 = vpop.xlane.xlu1 %329 }
 0x334   :  { %vm346_vm6 = vcmp.eq.f32.partialorder %v343_v22, %v345_v32  ;;  %vm331_vm7 = vcmp.eq.f32.partialorder %v328_v21, %v330_v33  ;;  %v351_v59 = vcvt.f32.s32 %v345_v32  ;;  %v336_v60 = vcvt.f32.s32 %v330_v33 }
 0x335   :  { %v347_v37 = vsel %vm346_vm6, %v342_v34, inf  ;;  %v332_v38 = vsel %vm331_vm7, %v327_v35, inf }
 0x336   :  { %348 = vmin.xlane.f32.xlu0 %v347_v37  ;;  %333 = vmin.xlane.f32.xlu1 %v332_v38  ;;  %v352_v1 = vshll.u32 %v351_v59, 16  ;;  %v337_v2 = vshll.u32 %v336_v60, 16 }
 0x337   :  { %v360_v39 = vpop.xlane.xlu1 %359 }
 0x338   :  { %vm361_vm8 = vcmp.eq.f32.partialorder %v358_v25, %v360_v39  ;;  %v366_v7 = vcvt.f32.s32 %v360_v39 }
 0x339   :  { %v362_v41 = vsel %vm361_vm8, %v357_v40, inf }
 0x33a   :  { %363 = vmin.xlane.f32.xlu1 %v362_v41  ;;  %v367_v15 = vshll.u32 %v366_v7, 16 }
 0x3bf   :  { %v319_v61 = vpop.xlane.xlu0 %318 }
 0x3c0   :  { %v320_v63 = vcvt.f32.s32 %v319_v61 }
 0x3c2   :  { %v5703_v0 = vadd.s32 %v322_v62, %v320_v63 }
 0x3c3   :  { %v349_v3 = vpop.xlane.xlu0 %348  ;;  %v334_v6 = vpop.xlane.xlu1 %333 }
 0x3c4   :  { %v350_v8 = vcvt.f32.s32 %v349_v3  ;;  %v335_v9 = vcvt.f32.s32 %v334_v6  ;;  %vm369_vm9 = vcmp.eq.s32.totalorder %v5693_v5, %v5703_v0 }
 0x3c5   :  { %v4424_v11 = vsel %vm369_vm9, 1.0, %v5576_v10 }
 0x3c6   :  { %v5708_v12 = vadd.s32 %v352_v1, %v350_v8  ;;  %v5710_v13 = vadd.s32 %v337_v2, %v335_v9  ;;  %5001 = vmatprep.mubr.msk.f32.mxu0 %vm286_vm0, %v4424_v11 }
 0x3c7   :  { %v364_v14 = vpop.xlane.xlu1 %363 }
 0x3c8   :  { %vm370_vm10 = vcmp.eq.s32.totalorder %v5693_v5, %v5710_v13  ;;  %v365_v16 = vcvt.f32.s32 %v364_v14  ;;  %vm371_vm11 = vcmp.eq.s32.totalorder %v5693_v5, %v5708_v12 }
 0x3c9   :  { %v4425_v17 = vsel %vm370_vm10, 1.0, %v5576_v10  ;;  %v4426_v19 = vsel %vm371_vm11, 1.0, %v5576_v10 }
 0x3ca   :  { %v5718_v18 = vadd.s32 %v367_v15, %v365_v16  ;;  %5002 = vmatmul.mubr.msk.f32.vlgmr.msra.gmra.mrb[4].mxu0 %vm286_vm0, %v4425_v17 }
 0x3cb   :  { %5004 = vmatprep.mubr.msk.f32.mxu0 %vm286_vm0, %v4426_v19  ;;  %5244 = vmatpush3.bf16.msra.mxu0 %v5225_v46 }
 0x3cc   :  { %vm372_vm12 = vcmp.eq.s32.totalorder %v5693_v5, %v5718_v18  ;;  %5246 = vmatprep.subr.bf16.mxu0 %v5229_v51 }
 0x3cd   :  { %v4427_v20 = vsel %vm372_vm12, 1.0, %v5576_v10 }
 0x3ce   :  { %5005 = vmatmul.mubr.msk.f32.gmra.mrb[6].mxu0 %vm286_vm0, %v4427_v20 }
 0x3cf   :  { %5248 = vmatpush3.bf16.msra.mxu0 %v5229_v51 }
 0x3d0   :  { %5250 = vmatprep.subr.bf16.mxu0 %v5233_v54 }
 0x3d3   :  { %5252 = vmatpush3.bf16.msra.mxu0 %v5233_v54 }
 0x3d4   :  { %5254 = vmatprep.subr.bf16.mxu0 %v5237_v57 }
 0x3d7   :  { %5256 = vmatpush3.bf16.msra.mxu0 %v5237_v57 }
 0x49d   :  { %v5003_v21 = vpop.f32.mrb[4].mxu0 }
 0x49e   :  { %v459_v22 = vpop.f32.mrb[5].mxu0  ;;  %v5731_v24 = vsub.f32 %v5675_v48, %v5003_v21  ;;  %v490_v48 = vld [vmem:[%s6963_s1 + $0x35] ss:$0 sm:$0xff] }
 0x49f   :  { %v5728_v23 = vsub.f32 %v5673_v45, %v459_v22 }
 0x4a1   :  { %v5006_v25 = vpop.f32.mrb[6].mxu0  ;;  %5023 = vmatprep.mubr.f32.mxu1 %v5728_v23 }
 0x4a2   :  { %v469_v26 = vpop.f32.mrb[7].mxu0  ;;  %5024 = vmatmul.mubr.f32.vlgmr.msra.gmra.mrb[4].mxu1 %v5731_v24  ;;  %v5739_v28 = vsub.f32 %v5682_v50, %v5006_v25 }
 0x4a3   :  { %v5736_v27 = vsub.f32 %v5678_v49, %v469_v26 }
 0x4a5   :  { %5026 = vmatprep.mubr.f32.mxu1 %v5736_v27 }
 0x4a6   :  { %5027 = vmatmul.mubr.f32.gmra.mrb[6].mxu1 %v5739_v28 }
 0x575   :  { %v5025_v45 = vpop.f32.mrb[4].mxu1 }
 0x576   :  { %v577_v29 = vmul.f32 2.0, %v5025_v45  ;;  %v557_v30 = vpop.f32.mrb[5].mxu1  ;;  %v777_v45 = vld [vmem:[#allocation6 + $0x80] sm:$0xff] }
 0x577   :  { %v576_v31 = vmul.f32 2.0, %v557_v30 }
 0x578   :  { %v581_v32 = vsub.f32 %v490_v48, %v577_v29  ;;  %v779_v29 = vld [vmem:[#allocation6 + $0x90] sm:$0xff] }
 0x579   :  { %v5028_v33 = vpop.f32.mrb[6].mxu1  ;;  %v580_v34 = vsub.f32 %v490_v48, %v576_v31  ;;  %v780_v31 = vld [vmem:[#allocation6 + $0x98] sm:$0xff] }
 0x57a   :  { %v579_v49 = vmul.f32 2.0, %v5028_v33  ;;  %v567_v35 = vpop.f32.mrb[7].mxu1  ;;  %v587_v50 = vsel %vm286_vm0, %v581_v32, inf  ;;  %v781_v33 = vld [vmem:[#allocation6 + $0xa0] sm:$0xff] }
 0x57b   :  { %v578_v36 = vmul.f32 2.0, %v567_v35  ;;  %588 = vmin.xlane.f32.xlu1 %v587_v50  ;;  %v584_v37 = vsel %vm286_vm0, %v580_v34, inf  ;;  %v783_v35 = vld [vmem:[#allocation6 + $0xb0] sm:$0xff]  ;;  %v784_v50 = vld [vmem:[#allocation6 + $0xb8] sm:$0xff] }
 0x57c   :  { %585 = vmin.xlane.f32.xlu0 %v584_v37  ;;  %v583_v38 = vsub.f32 %v490_v48, %v579_v49 }
 0x57d   :  { %v582_v39 = vsub.f32 %v490_v48, %v578_v36  ;;  %v778_v48 = vld [vmem:[#allocation6 + $0x88] sm:$0xff]  ;;  %v5269_v36 = vpack.c.bf16 %v784_v50, %v783_v35 }
 0x57e   :  { %v593_v40 = vsel %vm286_vm0, %v583_v38, inf  ;;  %v5257_v30 = vpack.c.bf16 %v778_v48, %v777_v45 }
 0x57f   :  { %594 = vmin.xlane.f32.xlu1 %v593_v40  ;;  %v590_v41 = vsel %vm286_vm0, %v582_v39, inf }
 0x580   :  { %591 = vmin.xlane.f32.xlu0 %v590_v41  ;;  %5258 = vmatprep.subr.bf16.mxu0 %v5257_v30 }
 0x581   :  { %5274 = vmatprep.subr.bf16.mxu1 %v5257_v30 }
 0x582   :  { %5276 = vmatpush3.bf16.msra.mxu1 %v5257_v30 }
 0x608   :  { %v589_v42 = vpop.xlane.xlu1 %588 }
 0x609   :  { %vm597_vm13 = vcmp.le.f32.partialorder %v581_v32, %v589_v42  ;;  %v586_v43 = vpop.xlane.xlu0 %585  ;;  %v5261_v32 = vpack.c.bf16 %v780_v31, %v779_v29 }
 0x60a   :  { %v601_v44 = vsel %vm597_vm13, %v5693_v5, 64  ;;  %vm596_vm14 = vcmp.le.f32.partialorder %v580_v34, %v586_v43  ;;  %v782_v34 = vld [vmem:[#allocation6 + $0xa8] sm:$0xff] }
 0x60b   :  { %v600_v46 = vsel %vm596_vm14, %v5693_v5, 64  ;;  %v619_v47 = vsel %vm286_vm0, %v601_v44, 2147483647  ;;  %5278 = vmatprep.subr.bf16.mxu1 %v5261_v32  ;;  %v5265_v49 = vpack.c.bf16 %v782_v34, %v781_v33 }
 0x60c   :  { %v595_v51 = vpop.xlane.xlu1 %594  ;;  %v621_v52 = vshra.s32 %v619_v47, 16  ;;  %v604_v53 = vsel %vm286_vm0, %v600_v46, 2147483647  ;;  %v620_v3 = vand.u32 65535, %v619_v47  ;;  %5280 = vmatpush3.bf16.msra.mxu1 %v5261_v32 }
 0x60d   :  { %vm599_vm15 = vcmp.le.f32.partialorder %v583_v38, %v595_v51  ;;  %v592_v54 = vpop.xlane.xlu0 %591  ;;  %v606_v55 = vshra.s32 %v604_v53, 16  ;;  %v605_v6 = vand.u32 65535, %v604_v53  ;;  %5282 = vmatprep.subr.bf16.mxu1 %v5265_v49 }
 0x60e   :  { %v603_v56 = vsel %vm599_vm15, %v5693_v5, 64  ;;  %vm598_vm1 = vcmp.le.f32.partialorder %v582_v39, %v592_v54  ;;  %v623_v57 = vcvt.s32.f32 %v621_v52  ;;  %v622_v8 = vcvt.s32.f32 %v620_v3 }
 0x60f   :  { %v602_v58 = vsel %vm598_vm1, %v5693_v5, 64  ;;  %v608_v59 = vcvt.s32.f32 %v606_v55  ;;  %v649_v60 = vsel %vm286_vm0, %v603_v56, 2147483647  ;;  %v607_v14 = vcvt.s32.f32 %v605_v6 }
 0x610   :  { %624 = vmin.xlane.f32.xlu1 %v623_v57  ;;  %v651_v61 = vshra.s32 %v649_v60, 16  ;;  %v634_v62 = vsel %vm286_vm0, %v602_v58, 2147483647  ;;  %v650_v9 = vand.u32 65535, %v649_v60  ;;  %5284 = vmatpush3.bf16.msra.mxu1 %v5265_v49 }
 0x611   :  { %609 = vmin.xlane.f32.xlu0 %v608_v59  ;;  %v636_v63 = vshra.s32 %v634_v62, 16  ;;  %v635_v15 = vand.u32 65535, %v634_v62  ;;  %5286 = vmatprep.subr.bf16.mxu1 %v5269_v36 }
 0x612   :  { %v653_v1 = vcvt.s32.f32 %v651_v61  ;;  %v652_v20 = vcvt.s32.f32 %v650_v9 }
 0x613   :  { %v638_v2 = vcvt.s32.f32 %v636_v63  ;;  %v637_v22 = vcvt.s32.f32 %v635_v15 }
 0x614   :  { %654 = vmin.xlane.f32.xlu1 %v653_v1  ;;  %5288 = vmatpush3.bf16.msra.mxu1 %v5269_v36 }
 0x615   :  { %639 = vmin.xlane.f32.xlu0 %v638_v2 }
 0x69d   :  { %v625_v7 = vpop.xlane.xlu1 %624 }
 0x69e   :  { %v610_v11 = vpop.xlane.xlu0 %609  ;;  %vm626_vm2 = vcmp.eq.f32.partialorder %v623_v57, %v625_v7  ;;  %v631_v37 = vcvt.f32.s32 %v625_v7 }
 0x69f   :  { %v627_v16 = vsel %vm626_vm2, %v622_v8, inf  ;;  %vm611_vm3 = vcmp.eq.f32.partialorder %v608_v59, %v610_v11  ;;  %v616_v38 = vcvt.f32.s32 %v610_v11 }
 0x6a0   :  { %628 = vmin.xlane.f32.xlu1 %v627_v16  ;;  %v612_v17 = vsel %vm611_vm3, %v607_v14, inf  ;;  %v632_v40 = vshll.u32 %v631_v37, 16 }
 0x6a1   :  { %613 = vmin.xlane.f32.xlu0 %v612_v17  ;;  %v655_v19 = vpop.xlane.xlu1 %654  ;;  %v617_v44 = vshll.u32 %v616_v38, 16 }
 0x6a2   :  { %v640_v21 = vpop.xlane.xlu0 %639  ;;  %vm656_vm4 = vcmp.eq.f32.partialorder %v653_v1, %v655_v19  ;;  %v661_v41 = vcvt.f32.s32 %v655_v19 }
 0x6a3   :  { %v657_v25 = vsel %vm656_vm4, %v652_v20, inf  ;;  %vm641_vm5 = vcmp.eq.f32.partialorder %v638_v2, %v640_v21  ;;  %v646_v46 = vcvt.f32.s32 %v640_v21 }
 0x6a4   :  { %658 = vmin.xlane.f32.xlu1 %v657_v25  ;;  %v642_v26 = vsel %vm641_vm5, %v637_v22, inf  ;;  %v662_v54 = vshll.u32 %v661_v41, 16 }
 0x6a5   :  { %643 = vmin.xlane.f32.xlu0 %v642_v26  ;;  %v647_v57 = vshll.u32 %v646_v46, 16 }
 0x72d   :  { %v629_v39 = vpop.xlane.xlu1 %628 }
 0x72e   :  { %v630_v42 = vcvt.f32.s32 %v629_v39  ;;  %v614_v43 = vpop.xlane.xlu0 %613 }
 0x72f   :  { %v615_v47 = vcvt.f32.s32 %v614_v43 }
 0x730   :  { %v5758_v51 = vadd.s32 %v632_v40, %v630_v42 }
 0x731   :  { %v5760_v52 = vadd.s32 %v617_v44, %v615_v47  ;;  %v659_v53 = vpop.xlane.xlu1 %658 }
 0x732   :  { %vm665_vm6 = vcmp.eq.s32.totalorder %v5693_v5, %v5758_v51  ;;  %v660_v55 = vcvt.f32.s32 %v659_v53  ;;  %v644_v56 = vpop.xlane.xlu0 %643 }
 0x733   :  { %v645_v58 = vcvt.f32.s32 %v644_v56  ;;  %vm664_vm7 = vcmp.eq.s32.totalorder %v5693_v5, %v5760_v52  ;;  %v4433_v61 = vsel %vm665_vm6, 1.0, %v5576_v10 }
 0x734   :  { %v5766_v59 = vadd.s32 %v662_v54, %v660_v55  ;;  %v4432_v60 = vsel %vm664_vm7, 1.0, %v5576_v10 }
 0x735   :  { %v5770_v62 = vadd.s32 %v647_v57, %v645_v58  ;;  %5045 = vmatprep.mubr.msk.f32.mxu0 %vm286_vm0, %v4432_v60 }
 0x736   :  { %5046 = vmatmul.mubr.msk.f32.vlgmr.msra.gmra.mrb[8].mxu0 %vm286_vm0, %v4433_v61  ;;  %vm667_vm8 = vcmp.eq.s32.totalorder %v5693_v5, %v5766_v59 }
 0x737   :  { %vm666_vm9 = vcmp.eq.s32.totalorder %v5693_v5, %v5770_v62  ;;  %5260 = vmatpush3.bf16.xpose.msra.mxu0 %v5257_v30  ;;  %v4435_v1 = vsel %vm667_vm8, 1.0, %v5576_v10 }
 0x738   :  { %v4434_v63 = vsel %vm666_vm9, 1.0, %v5576_v10  ;;  %5262 = vmatprep.subr.bf16.mxu0 %v5261_v32 }
 0x739   :  { %5048 = vmatprep.mubr.msk.f32.mxu0 %vm286_vm0, %v4434_v63 }
 0x73a   :  { %5049 = vmatmul.mubr.msk.f32.gmra.mrb[10].mxu0 %vm286_vm0, %v4435_v1 }
 0x73f   :  { %5264 = vmatpush3.bf16.xpose.msra.mxu0 %v5261_v32 }
 0x740   :  { %5266 = vmatprep.subr.bf16.mxu0 %v5265_v49 }
 0x747   :  { %5268 = vmatpush3.bf16.xpose.msra.mxu0 %v5265_v49 }
 0x748   :  { %5270 = vmatprep.subr.bf16.mxu0 %v5269_v36 }
 0x74f   :  { %5272 = vmatpush3.bf16.xpose.msra.mxu0 %v5269_v36 }
 0x809   :  { %v5047_v2 = vpop.f32.mrb[8].mxu0 }
 0x80a   :  { %v754_v3 = vpop.f32.mrb[9].mxu0  ;;  %v5786_v7 = vsub.f32 %v5731_v24, %v5047_v2  ;;  %v785_v24 = vld [vmem:[%s6963_s1 + $0x36] ss:$0 sm:$0xff] }
 0x80b   :  { %v5783_v6 = vsub.f32 %v5728_v23, %v754_v3 }
 0x80d   :  { %v5050_v8 = vpop.f32.mrb[10].mxu0  ;;  %5067 = vmatprep.mubr.f32.mxu0 %v5783_v6 }
 0x80e   :  { %v764_v9 = vpop.f32.mrb[11].mxu0  ;;  %5068 = vmatmul.mubr.f32.vlgmr.msra.gmra.mrb[12].mxu0 %v5786_v7  ;;  %v5794_v14 = vsub.f32 %v5739_v28, %v5050_v8 }
 0x80f   :  { %v5791_v11 = vsub.f32 %v5736_v27, %v764_v9 }
 0x811   :  { %5070 = vmatprep.mubr.f32.mxu0 %v5791_v11 }
 0x812   :  { %5071 = vmatmul.mubr.f32.gmra.mrb[14].mxu0 %v5794_v14 }
 0x8e1   :  { %v5069_v23 = vpop.f32.mrb[12].mxu0 }
 0x8e2   :  { %v872_v15 = vmul.f32 2.0, %v5069_v23  ;;  %v852_v16 = vpop.f32.mrb[13].mxu0 }
 0x8e3   :  { %v871_v17 = vmul.f32 2.0, %v852_v16 }
 0x8e4   :  { %v876_v19 = vsub.f32 %v785_v24, %v872_v15 }
 0x8e5   :  { %v5072_v20 = vpop.f32.mrb[14].mxu0  ;;  %v875_v21 = vsub.f32 %v785_v24, %v871_v17  ;;  %v1072_v17 = vld [vmem:[#allocation6 + $0xc0] sm:$0xff] }
 0x8e6   :  { %v874_v27 = vmul.f32 2.0, %v5072_v20  ;;  %v862_v22 = vpop.f32.mrb[15].mxu0  ;;  %v882_v28 = vsel %vm286_vm0, %v876_v19, inf }
 0x8e7   :  { %v873_v25 = vmul.f32 2.0, %v862_v22  ;;  %883 = vmin.xlane.f32.xlu1 %v882_v28  ;;  %v879_v26 = vsel %vm286_vm0, %v875_v21, inf }
 0x8e8   :  { %880 = vmin.xlane.f32.xlu0 %v879_v26  ;;  %v878_v45 = vsub.f32 %v785_v24, %v874_v27 }
 0x8e9   :  { %v877_v48 = vsub.f32 %v785_v24, %v873_v25 }
 0x8ea   :  { %v888_v29 = vsel %vm286_vm0, %v878_v45, inf }
 0x8eb   :  { %889 = vmin.xlane.f32.xlu1 %v888_v29  ;;  %v885_v30 = vsel %vm286_vm0, %v877_v48, inf }
 0x8ec   :  { %886 = vmin.xlane.f32.xlu0 %v885_v30 }
 0x974   :  { %v884_v31 = vpop.xlane.xlu1 %883 }
 0x975   :  { %vm892_vm10 = vcmp.le.f32.partialorder %v876_v19, %v884_v31  ;;  %v881_v32 = vpop.xlane.xlu0 %880  ;;  %v1073_v19 = vld [vmem:[#allocation6 + $0xc8] sm:$0xff] }
 0x976   :  { %v896_v33 = vsel %vm892_vm10, %v5693_v5, 64  ;;  %vm891_vm11 = vcmp.le.f32.partialorder %v875_v21, %v881_v32  ;;  %v5813_v20 = vpack.c.bf16 %v1073_v19, %v1072_v17 }
 0x977   :  { %v895_v34 = vsel %vm891_vm11, %v5693_v5, 64  ;;  %v914_v49 = vsel %vm286_vm0, %v896_v33, 2147483647 }
 0x978   :  { %v890_v35 = vpop.xlane.xlu1 %889  ;;  %v916_v50 = vshra.s32 %v914_v49, 16  ;;  %v899_v36 = vsel %vm286_vm0, %v895_v34, 2147483647  ;;  %v915_v55 = vand.u32 65535, %v914_v49  ;;  %5290 = vmatprep.subr.bf16.mxu1 %v5813_v20  ;;  %v1074_v34 = vld [vmem:[#allocation6 + $0xd0] sm:$0xff]  ;;  %v1075_v49 = vld [vmem:[#allocation6 + $0xd8] sm:$0xff] }
 0x979   :  { %vm894_vm12 = vcmp.le.f32.partialorder %v878_v45, %v890_v35  ;;  %v887_v37 = vpop.xlane.xlu0 %886  ;;  %v901_v38 = vshra.s32 %v899_v36, 16  ;;  %v900_v56 = vand.u32 65535, %v899_v36 }
 0x97a   :  { %v898_v39 = vsel %vm894_vm12, %v5693_v5, 64  ;;  %vm893_vm13 = vcmp.le.f32.partialorder %v877_v48, %v887_v37  ;;  %v918_v40 = vcvt.s32.f32 %v916_v50  ;;  %v917_v58 = vcvt.s32.f32 %v915_v55  ;;  %v1078_v55 = vld [vmem:[#allocation6 + $0xf0] sm:$0xff] }
 0x97b   :  { %v897_v41 = vsel %vm893_vm13, %v5693_v5, 64  ;;  %v903_v42 = vcvt.s32.f32 %v901_v38  ;;  %v944_v43 = vsel %vm286_vm0, %v898_v39, 2147483647  ;;  %v902_v63 = vcvt.s32.f32 %v900_v56  ;;  %v1079_v56 = vld [vmem:[#allocation6 + $0xf8] sm:$0xff] }
 0x97c   :  { %919 = vmin.xlane.f32.xlu1 %v918_v40  ;;  %v946_v44 = vshra.s32 %v944_v43, 16  ;;  %v929_v46 = vsel %vm286_vm0, %v897_v41, 2147483647  ;;  %v945_v60 = vand.u32 65535, %v944_v43  ;;  %v5827_v41 = vpack.c.bf16 %v1075_v49, %v1074_v34 }
 0x97d   :  { %904 = vmin.xlane.f32.xlu0 %v903_v42  ;;  %v931_v47 = vshra.s32 %v929_v46, 16  ;;  %v930_v1 = vand.u32 65535, %v929_v46 }
 0x97e   :  { %v948_v53 = vcvt.s32.f32 %v946_v44  ;;  %v947_v9 = vcvt.s32.f32 %v945_v60 }
 0x97f   :  { %v933_v54 = vcvt.s32.f32 %v931_v47  ;;  %v932_v24 = vcvt.s32.f32 %v930_v1  ;;  %v1076_v47 = vld [vmem:[#allocation6 + $0xe0] sm:$0xff] }
 0x980   :  { %949 = vmin.xlane.f32.xlu1 %v948_v53 }
 0x981   :  { %934 = vmin.xlane.f32.xlu0 %v933_v54 }
 0xa09   :  { %v920_v57 = vpop.xlane.xlu1 %919 }
 0xa0a   :  { %v905_v61 = vpop.xlane.xlu0 %904  ;;  %vm921_vm14 = vcmp.eq.f32.partialorder %v918_v40, %v920_v57  ;;  %v926_v21 = vcvt.f32.s32 %v920_v57  ;;  %v5848_v57 = vpack.c.bf16 %v1079_v56, %v1078_v55 }
 0xa0b   :  { %v922_v2 = vsel %vm921_vm14, %v917_v58, inf  ;;  %vm906_vm15 = vcmp.eq.f32.partialorder %v903_v42, %v905_v61  ;;  %v911_v27 = vcvt.f32.s32 %v905_v61 }
 0xa0c   :  { %923 = vmin.xlane.f32.xlu1 %v922_v2  ;;  %v907_v3 = vsel %vm906_vm15, %v902_v63, inf  ;;  %v927_v28 = vshll.u32 %v926_v21, 16 }
 0xa0d   :  { %v950_v8 = vpop.xlane.xlu1 %949  ;;  %908 = vmin.xlane.f32.xlu0 %v907_v3  ;;  %v912_v48 = vshll.u32 %v911_v27, 16 }
 0xa0e   :  { %v935_v23 = vpop.xlane.xlu0 %934  ;;  %vm951_vm1 = vcmp.eq.f32.partialorder %v948_v53, %v950_v8  ;;  %v956_v25 = vcvt.f32.s32 %v950_v8  ;;  %v1077_v53 = vld [vmem:[#allocation6 + $0xe8] sm:$0xff] }
 0xa0f   :  { %v952_v15 = vsel %vm951_vm1, %v947_v9, inf  ;;  %vm936_vm2 = vcmp.eq.f32.partialorder %v933_v54, %v935_v23  ;;  %v941_v29 = vcvt.f32.s32 %v935_v23  ;;  %v5844_v54 = vpack.c.bf16 %v1077_v53, %v1076_v47  ;;  %v1080_v23 = vld [vmem:[%s6963_s1 + $0x37] ss:$0 sm:$0xff] }
 0xa10   :  { %953 = vmin.xlane.f32.xlu1 %v952_v15  ;;  %v937_v16 = vsel %vm936_vm2, %v932_v24, inf  ;;  %v957_v35 = vshll.u32 %v956_v25, 16 }
 0xa11   :  { %938 = vmin.xlane.f32.xlu0 %v937_v16  ;;  %v942_v37 = vshll.u32 %v941_v29, 16 }
 0xa99   :  { %v924_v22 = vpop.xlane.xlu1 %923 }
 0xa9a   :  { %v925_v26 = vcvt.f32.s32 %v924_v22  ;;  %v909_v45 = vpop.xlane.xlu0 %908 }
 0xa9b   :  { %v910_v30 = vcvt.f32.s32 %v909_v45 }
 0xa9c   :  { %v5816_v31 = vadd.s32 %v927_v28, %v925_v26 }
 0xa9d   :  { %v5818_v32 = vadd.s32 %v912_v48, %v910_v30  ;;  %v954_v33 = vpop.xlane.xlu1 %953 }
 0xa9e   :  { %vm960_vm3 = vcmp.eq.s32.totalorder %v5693_v5, %v5816_v31  ;;  %v955_v50 = vcvt.f32.s32 %v954_v33  ;;  %v939_v36 = vpop.xlane.xlu0 %938 }
 0xa9f   :  { %v940_v38 = vcvt.f32.s32 %v939_v36  ;;  %vm959_vm4 = vcmp.eq.s32.totalorder %v5693_v5, %v5818_v32  ;;  %v4441_v42 = vsel %vm960_vm3, 1.0, %v5576_v10 }
 0xaa0   :  { %v5824_v39 = vadd.s32 %v957_v35, %v955_v50  ;;  %v4440_v40 = vsel %vm959_vm4, 1.0, %v5576_v10 }
 0xaa1   :  { %v5830_v43 = vadd.s32 %v942_v37, %v940_v38  ;;  %5089 = vmatprep.mubr.msk.f32.mxu1 %vm286_vm0, %v4440_v40 }
 0xaa2   :  { %5090 = vmatmul.mubr.msk.f32.vlgmr.msra.gmra.mrb[8].mxu1 %vm286_vm0, %v4441_v42  ;;  %vm962_vm5 = vcmp.eq.s32.totalorder %v5693_v5, %v5824_v39 }
 0xaa3   :  { %vm961_vm6 = vcmp.eq.s32.totalorder %v5693_v5, %v5830_v43  ;;  %5292 = vmatpush3.bf16.xpose.msra.mxu1 %v5813_v20  ;;  %v4443_v46 = vsel %vm962_vm5, 1.0, %v5576_v10 }
 0xaa4   :  { %v4442_v44 = vsel %vm961_vm6, 1.0, %v5576_v10  ;;  %5294 = vmatprep.subr.bf16.mxu1 %v5827_v41 }
 0xaa5   :  { %5092 = vmatprep.mubr.msk.f32.mxu1 %vm286_vm0, %v4442_v44 }
 0xaa6   :  { %5093 = vmatmul.mubr.msk.f32.gmra.mrb[10].mxu1 %vm286_vm0, %v4443_v46 }
 0xaab   :  { %5296 = vmatpush3.bf16.xpose.msra.mxu1 %v5827_v41 }
 0xaac   :  { %5298 = vmatprep.subr.bf16.mxu1 %v5844_v54 }
 0xab3   :  { %5300 = vmatpush3.bf16.xpose.msra.mxu1 %v5844_v54 }
 0xab4   :  { %5302 = vmatprep.subr.bf16.mxu1 %v5848_v57 }
 0xabb   :  { %5304 = vmatpush3.bf16.xpose.msra.mxu1 %v5848_v57 }
 0xb75   :  { %v5091_v58 = vpop.f32.mrb[8].mxu1 }
 0xb76   :  { %v1049_v60 = vpop.f32.mrb[9].mxu1  ;;  %v1069_v63 = vsub.f32 %v5786_v7, %v5091_v58  ;;  %v5577_v58 = vmov 16  }
 0xb77   :  { %v1068_v61 = vsub.f32 %v5783_v6, %v1049_v60  ;;  %5358 = vset.pattern.permute.xlu1 %v5577_v58  ;;  %5357 = vset.pattern.permute.xlu0 %v5577_v58  ;;  %v1489_v60 = vld [vmem:[#allocation6 + $0x180] sm:$0xff] }
 0xb79   :  { %v5094_v1 = vpop.f32.mrb[10].mxu1  ;;  %5111 = vmatprep.mubr.f32.mxu1 %v1068_v61  ;;  %v1490_v61 = vld [vmem:[#allocation6 + $0x188] sm:$0xff] }
 0xb7a   :  { %v1059_v2 = vpop.f32.mrb[11].mxu1  ;;  %5112 = vmatmul.mubr.f32.vlgmr.msra.gmra.mrb[12].mxu1 %v1069_v63  ;;  %v1071_v8 = vsub.f32 %v5794_v14, %v5094_v1  ;;  %v1521_v63 = vld [vmem:[#allocation6 + $0x280] sm:$0xff]  ;;  %v1545_v1 = vpack.c.bf16 %v1490_v61, %v1489_v60 }
 0xb7b   :  { %v1070_v3 = vsub.f32 %v5791_v11, %v1059_v2  ;;  %v1522_v2 = vld [vmem:[#allocation6 + $0x288] sm:$0xff] }
 0xb7c   :  { %4749 = vmatprep.subr.bf16.mxu0 %v1545_v1 }
 0xb7d   :  { %5114 = vmatprep.mubr.f32.mxu1 %v1070_v3  ;;  %v1473_v3 = vld [vmem:[#allocation6 + $0x100] sm:$0xff] }
 0xb7e   :  { %5115 = vmatmul.mubr.f32.gmra.mrb[14].mxu1 %v1071_v8  ;;  %v1474_v8 = vld [vmem:[#allocation6 + $0x108] sm:$0xff] }
 0xc4d   :  { %v5113_v9 = vpop.f32.mrb[12].mxu1 }
 0xc4e   :  { %v1167_v24 = vmul.f32 2.0, %v5113_v9  ;;  %v1147_v15 = vpop.f32.mrb[13].mxu1  ;;  %v1561_v9 = vpack.c.bf16 %v1522_v2, %v1521_v63 }
 0xc4f   :  { %v1166_v6 = vmul.f32 2.0, %v1147_v15  ;;  %v1506_v15 = vld [vmem:[#allocation6 + $0x208] sm:$0xff] }
 0xc50   :  { %v1171_v16 = vsub.f32 %v1080_v23, %v1167_v24  ;;  %v1505_v24 = vld [vmem:[#allocation6 + $0x200] sm:$0xff]  ;;  %4777 = vmatprep.subr.bf16.mxu1 %v1561_v9 }
 0xc51   :  { %v5116_v7 = vpop.f32.mrb[14].mxu1  ;;  %v1170_v17 = vsub.f32 %v1080_v23, %v1166_v6  ;;  %v1491_v6 = vld [vmem:[#allocation6 + $0x190] sm:$0xff] }
 0xc52   :  { %v1169_v19 = vmul.f32 2.0, %v5116_v7  ;;  %v1157_v21 = vpop.f32.mrb[15].mxu1  ;;  %v1177_v27 = vsel %vm286_vm0, %v1171_v16, inf  ;;  %v1492_v7 = vld [vmem:[#allocation6 + $0x198] sm:$0xff] }
 0xc53   :  { %v1168_v11 = vmul.f32 2.0, %v1157_v21  ;;  %1178 = vmin.xlane.f32.xlu1 %v1177_v27  ;;  %v1174_v14 = vsel %vm286_vm0, %v1170_v17, inf  ;;  %v1546_v21 = vpack.c.bf16 %v1492_v7, %v1491_v6  ;;  %v1495_v6 = vld [vmem:[#allocation6 + $0x1b0] sm:$0xff] }
 0xc54   :  { %1175 = vmin.xlane.f32.xlu0 %v1174_v14  ;;  %v1173_v22 = vsub.f32 %v1080_v23, %v1169_v19  ;;  %v1524_v19 = vld [vmem:[#allocation6 + $0x298] sm:$0xff]  ;;  %v1527_v7 = vld [vmem:[#allocation6 + $0x2b0] sm:$0xff] }
 0xc55   :  { %v1172_v28 = vsub.f32 %v1080_v23, %v1168_v11  ;;  %v1537_v23 = vpack.c.bf16 %v1474_v8, %v1473_v3  ;;  %v1475_v11 = vld [vmem:[#allocation6 + $0x110] sm:$0xff]  ;;  %v1476_v14 = vld [vmem:[#allocation6 + $0x118] sm:$0xff] }
 0xc56   :  { %v1183_v25 = vsel %vm286_vm0, %v1173_v22, inf }
 0xc57   :  { %1184 = vmin.xlane.f32.xlu1 %v1183_v25  ;;  %v1180_v26 = vsel %vm286_vm0, %v1172_v28, inf  ;;  %4750 = vmatpush3.bf16.msra.mxu0 %v1537_v23  ;;  %v1508_v25 = vld [vmem:[#allocation6 + $0x218] sm:$0xff] }
 0xc58   :  { %1181 = vmin.xlane.f32.xlu0 %v1180_v26  ;;  %v1493_v26 = vld [vmem:[#allocation6 + $0x1a0] sm:$0xff]  ;;  %4751 = vmatprep.subr.bf16.mxu0 %v1546_v21  ;;  %v1479_v21 = vld [vmem:[#allocation6 + $0x130] sm:$0xff] }
 0xce0   :  { %v1179_v45 = vpop.xlane.xlu1 %1178 }
 0xce1   :  { %vm1187_vm7 = vcmp.le.f32.partialorder %v1171_v16, %v1179_v45  ;;  %v1176_v48 = vpop.xlane.xlu0 %1175  ;;  %v1553_v16 = vpack.c.bf16 %v1506_v15, %v1505_v24  ;;  %v1494_v45 = vld [vmem:[#allocation6 + $0x1a8] sm:$0xff] }
 0xce2   :  { %v1191_v29 = vsel %vm1187_vm7, %v5693_v5, 64  ;;  %vm1186_vm8 = vcmp.le.f32.partialorder %v1170_v17, %v1176_v48  ;;  %v1523_v17 = vld [vmem:[#allocation6 + $0x290] sm:$0xff] }
 0xce3   :  { %v1190_v30 = vsel %vm1186_vm8, %v5693_v5, 64  ;;  %v5867_v33 = vsel %vm286_vm0, %v1191_v29, 2147483647  ;;  %v1562_v27 = vpack.c.bf16 %v1524_v19, %v1523_v17  ;;  %4778 = vmatpush3.bf16.msra.mxu1 %v1553_v16  ;;  %v1547_v29 = vpack.c.bf16 %v1494_v45, %v1493_v26  ;;  %v1496_v16 = vld [vmem:[#allocation6 + $0x1b8] sm:$0xff]  ;;  %v1497_v45 = vld [vmem:[#allocation6 + $0x1c0] sm:$0xff] }
 0xce4   :  { %v5870_v34 = vsel %vm286_vm0, %v1190_v30, 2147483647  ;;  %v1185_v49 = vpop.xlane.xlu1 %1184  ;;  %v1211_v35 = vshra.s32 %v5867_v33, 16  ;;  %v1525_v30 = vld [vmem:[#allocation6 + $0x2a0] sm:$0xff]  ;;  %v1210_v58 = vand.u32 65535, %v5867_v33  ;;  %v1548_v17 = vpack.c.bf16 %v1496_v16, %v1495_v6  ;;  %v1528_v19 = vld [vmem:[#allocation6 + $0x2b8] sm:$0xff] }
 0xce5   :  { %vm1189_vm9 = vcmp.le.f32.partialorder %v1173_v22, %v1185_v49  ;;  %v1182_v50 = vpop.xlane.xlu0 %1181  ;;  %v1196_v36 = vshra.s32 %v5870_v34, 16  ;;  %v1507_v22 = vld [vmem:[#allocation6 + $0x210] sm:$0xff]  ;;  %4779 = vmatprep.subr.bf16.mxu1 %v1562_v27  ;;  %v1526_v49 = vld [vmem:[#allocation6 + $0x2a8] sm:$0xff]  ;;  %v1195_v60 = vand.u32 65535, %v5870_v34  ;;  %v1564_v27 = vpack.c.bf16 %v1528_v19, %v1527_v7 }
 0xce6   :  { %v1193_v37 = vsel %vm1189_vm9, %v5693_v5, 64  ;;  %vm1188_vm10 = vcmp.le.f32.partialorder %v1172_v28, %v1182_v50  ;;  %v5875_v38 = vcvt.s32.f32 %v1211_v35  ;;  %v1538_v28 = vpack.c.bf16 %v1476_v14, %v1475_v11  ;;  %v1477_v35 = vld [vmem:[#allocation6 + $0x120] sm:$0xff]  ;;  %v1511_v14 = vld [vmem:[#allocation6 + $0x230] sm:$0xff] }
 0xce7   :  { %v1192_v40 = vsel %vm1188_vm10, %v5693_v5, 64  ;;  %v5878_v42 = vcvt.s32.f32 %v1196_v36  ;;  %v5881_v44 = vsel %vm286_vm0, %v1193_v37, 2147483647  ;;  %v1554_v48 = vpack.c.bf16 %v1508_v25, %v1507_v22  ;;  %v1478_v36 = vld [vmem:[#allocation6 + $0x128] sm:$0xff]  ;;  %v1509_v37 = vld [vmem:[#allocation6 + $0x220] sm:$0xff]  ;;  %v1512_v22 = vld [vmem:[#allocation6 + $0x238] sm:$0xff] }
 0xce8   :  { %v5884_v46 = vsel %vm286_vm0, %v1192_v40, 2147483647  ;;  %1214 = vmin.xlane.f32.xlu1 %v5875_v38  ;;  %v1241_v47 = vshra.s32 %v5881_v44, 16  ;;  %v1563_v50 = vpack.c.bf16 %v1526_v49, %v1525_v30  ;;  %v1510_v40 = vld [vmem:[#allocation6 + $0x228] sm:$0xff]  ;;  %4752 = vmatpush3.bf16.msra.mxu0 %v1538_v28  ;;  %v1212_v63 = vcvt.s32.f32 %v1210_v58  ;;  %v5496_v28 = vld [vmem:[%s6962_s0 + $0x10] sm:$0xff]  ;;  %v5497_v30 = vld [vmem:[%s6962_s0] sm:$0xff] }
 0xce9   :  { %1199 = vmin.xlane.f32.xlu0 %v5878_v42  ;;  %v1226_v53 = vshra.s32 %v5884_v46, 16  ;;  %4780 = vmatpush3.bf16.msra.mxu1 %v1554_v48  ;;  %v1240_v1 = vand.u32 65535, %v5881_v44  ;;  %v1197_v3 = vcvt.s32.f32 %v1195_v60  ;;  %v1225_v8 = vand.u32 65535, %v5884_v46  ;;  %v1498_v48 = vld [vmem:[#allocation6 + $0x1c8] sm:$0xff]  ;;  %v1515_v7 = vld [vmem:[#allocation6 + $0x250] sm:$0xff] }
 0xcea   :  { %v5890_v55 = vcvt.s32.f32 %v1241_v47  ;;  %v1539_v47 = vpack.c.bf16 %v1478_v36, %v1477_v35  ;;  %4753 = vmatprep.subr.bf16.mxu0 %v1547_v29  ;;  %4781 = vmatprep.subr.bf16.mxu1 %v1563_v50  ;;  %v5341_v25 = vtrunc.f32 %v5496_v28  ;;  %v1556_v26 = vpack.c.bf16 %v1512_v22, %v1511_v14  ;;  %v1529_v29 = vld [vmem:[#allocation6 + $0x2c0] sm:$0xff]  ;;  %v1530_v50 = vld [vmem:[#allocation6 + $0x2c8] sm:$0xff] }
 0xceb   :  { %v5892_v56 = vcvt.s32.f32 %v1226_v53  ;;  %v1555_v53 = vpack.c.bf16 %v1510_v40, %v1509_v37  ;;  %v1242_v23 = vcvt.s32.f32 %v1240_v1  ;;  %v1227_v44 = vcvt.s32.f32 %v1225_v8  ;;  %v1481_v36 = vld [vmem:[#allocation6 + $0x140] sm:$0xff]  ;;  %v1482_v37 = vld [vmem:[#allocation6 + $0x148] sm:$0xff] }
 0xcec   :  { %1244 = vmin.xlane.f32.xlu1 %v5890_v55  ;;  %4754 = vmatpush3.bf16.msra.mxu0 %v1539_v47  ;;  %v5337_v49 = vtrunc.f32 %v5497_v30  ;;  %v1549_v35 = vpack.c.bf16 %v1498_v48, %v1497_v45  ;;  %v1565_v40 = vpack.c.bf16 %v1530_v50, %v1529_v29  ;;  %v1541_v47 = vpack.c.bf16 %v1482_v37, %v1481_v36  ;;  %v1514_v58 = vld [vmem:[#allocation6 + $0x248] sm:$0xff]  ;;  %v1485_v22 = vld [vmem:[#allocation6 + $0x160] sm:$0xff]  ;;  %v1503_v29 = vld [vmem:[#allocation6 + $0x1f0] sm:$0xff] }
 0xced   :  { %1229 = vmin.xlane.f32.xlu0 %v5892_v56  ;;  %4782 = vmatpush3.bf16.msra.mxu1 %v1555_v53  ;;  %v1513_v53 = vld [vmem:[#allocation6 + $0x240] sm:$0xff]  ;;  %v5342_v60 = vcvt.f32.s32 %v5341_v25  ;;  %v1534_v14 = vld [vmem:[#allocation6 + $0x2e8] sm:$0xff]  ;;  %v1504_v30 = vld [vmem:[#allocation6 + $0x1f8] sm:$0xff] }
 0xcee   :  { %4755 = vmatprep.subr.bf16.mxu0 %v1548_v17  ;;  %4783 = vmatprep.subr.bf16.mxu1 %v1564_v27  ;;  %v5338_v8 = vcvt.f32.s32 %v5337_v49  ;;  %v1516_v17 = vld [vmem:[#allocation6 + $0x258] sm:$0xff]  ;;  %v1533_v27 = vld [vmem:[#allocation6 + $0x2e0] sm:$0xff]  ;;  %v1518_v45 = vld [vmem:[#allocation6 + $0x268] sm:$0xff] }
 0xcef   :  { %v1558_v19 = vpack.c.bf16 %v1516_v17, %v1515_v7  ;;  %v1567_v28 = vpack.c.bf16 %v1534_v14, %v1533_v27  ;;  %v1535_v49 = vld [vmem:[#allocation6 + $0x2f0] sm:$0xff]  ;;  %v1536_v50 = vld [vmem:[#allocation6 + $0x2f8] sm:$0xff]  ;;  %v6971_v7 = vmov 0 }
 0xcf0   :  { %v1487_v36 = vld [vmem:[#allocation6 + $0x170] sm:$0xff]  ;;  %v1488_v37 = vld [vmem:[#allocation6 + $0x178] sm:$0xff] }
 0xcf1   :  { %4784 = vmatpush3.bf16.msra.mxu1 %v1556_v26  ;;  %v1517_v26 = vld [vmem:[#allocation6 + $0x260] sm:$0xff] }
 0xcf2   :  { %4785 = vmatprep.subr.bf16.mxu1 %v1565_v40  ;;  %v1559_v48 = vpack.c.bf16 %v1518_v45, %v1517_v26  ;;  %v1568_v40 = vpack.c.bf16 %v1536_v50, %v1535_v49 }
 0xd75   :  { %v5898_v61 = vpop.xlane.xlu1 %1214 }
 0xd76   :  { %v5901_v2 = vpop.xlane.xlu0 %1199  ;;  %vm1216_vm0 = vcmp.eq.f32.partialorder %v5875_v38, %v5898_v61 }
 0xd77   :  { %v1217_v9 = vsel %vm1216_vm0, %v1212_v63, inf  ;;  %vm1201_vm11 = vcmp.eq.f32.partialorder %v5878_v42, %v5901_v2  ;;  %v5495_v42 = vld [vmem:[%s6962_s0 + $0x8] sm:$0xff]  ;;  %v5498_v63 = vld [vmem:[%s6962_s0 + $0x18] sm:$0xff]  ;;  %v1206_v27 = vcvt.f32.s32 %v5901_v2  ;;  %v1325_v2 = vadd.s32 320, %v5760_v52 }
 0xd78   :  { %1218 = vmin.xlane.f32.xlu1 %v1217_v9  ;;  %v1202_v33 = vsel %vm1201_vm11, %v1197_v3, inf  ;;  %v5339_v15 = vtrunc.f32 %v5495_v42  ;;  %v5343_v1 = vtrunc.f32 %v5498_v63  ;;  %v1557_v3 = vpack.c.bf16 %v1514_v58, %v1513_v53  ;;  %v1483_v42 = vld [vmem:[#allocation6 + $0x150] sm:$0xff]  ;;  %v1520_v58 = vld [vmem:[#allocation6 + $0x278] sm:$0xff] }
 0xd79   :  { %v5908_v34 = vpop.xlane.xlu1 %1244  ;;  %1203 = vmin.xlane.f32.xlu0 %v1202_v33  ;;  %v1499_v33 = vld [vmem:[#allocation6 + $0x1d0] sm:$0xff]  ;;  %v6027_v52 = vadd.s32 384, %v5818_v32 }
 0xd7a   :  { %v5910_v24 = vpop.xlane.xlu0 %1229  ;;  %vm1246_vm12 = vcmp.eq.f32.partialorder %v5890_v55, %v5908_v34  ;;  %v1480_v55 = vld [vmem:[#allocation6 + $0x138] sm:$0xff]  ;;  %4786 = vmatpush3.bf16.msra.mxu1 %v1557_v3  ;;  %v5344_v9 = vcvt.f32.s32 %v5343_v1  ;;  %v1519_v53 = vld [vmem:[#allocation6 + $0x270] sm:$0xff]  ;;  %v1290_v1 = vadd.s32 256, %v5710_v13 }
 0xd7b   :  { %v1247_v38 = vsel %vm1246_vm12, %v1242_v23, inf  ;;  %vm1231_vm13 = vcmp.eq.f32.partialorder %v5892_v56, %v5910_v24  ;;  %v1540_v11 = vpack.c.bf16 %v1480_v55, %v1479_v21  ;;  %v5340_v56 = vcvt.f32.s32 %v5339_v15  ;;  %v1500_v23 = vld [vmem:[#allocation6 + $0x1d8] sm:$0xff]  ;;  %v1501_v21 = vld [vmem:[#allocation6 + $0x1e0] sm:$0xff]  ;;  %v1502_v55 = vld [vmem:[#allocation6 + $0x1e8] sm:$0xff] }
 0xd7c   :  { %1248 = vmin.xlane.f32.xlu1 %v1247_v38  ;;  %v1232_v46 = vsel %vm1231_vm13, %v1227_v44, inf  ;;  %v1531_v44 = vld [vmem:[#allocation6 + $0x2d0] sm:$0xff]  ;;  %v1550_v38 = vpack.c.bf16 %v1500_v23, %v1499_v33  ;;  %v1484_v15 = vld [vmem:[#allocation6 + $0x158] sm:$0xff]  ;;  %v5933_v33 = vadd.s32 128, %v5693_v5  ;;  %v5936_v23 = vadd.s32 256, %v5693_v5 }
 0xd7d   :  { %1233 = vmin.xlane.f32.xlu0 %v1232_v46  ;;  %4756 = vmatpush3.bf16.msra.mxu0 %v1540_v11  ;;  %v1532_v46 = vld [vmem:[#allocation6 + $0x2d8] sm:$0xff]  ;;  %v1542_v16 = vpack.c.bf16 %v1484_v15, %v1483_v42  ;;  %v1551_v11 = vpack.c.bf16 %v1502_v55, %v1501_v21  ;;  %vm1297_vm14 = vcmp.eq.s32.totalorder %v5693_v5, %v1290_v1  ;;  %v6975_v21 = vmov 0 }
 0xd7e   :  { %4757 = vmatprep.subr.bf16.mxu0 %v1549_v35  ;;  %v1566_v6 = vpack.c.bf16 %v1532_v46, %v1531_v44  ;;  %v1552_v35 = vpack.c.bf16 %v1504_v30, %v1503_v29  ;;  %v1326_v44 = vadd.s32 320, %v5758_v51  ;;  %vm1298_vm3 = vcmp.eq.s32.totalorder %v5933_v33, %v1290_v1 }
 0xd7f   :  { %vm1299_vm6 = vcmp.eq.s32.totalorder %v5936_v23, %v1290_v1  ;;  %v5951_v51 = vadd.s32 384, %v5816_v31  ;;  %v1289_v55 = vadd.s32 256, %v5703_v0  ;;  %v6981_v0 = vmov 0 }
 0xd80   :  { %4787 = vmatprep.subr.bf16.mxu1 %v1566_v6  ;;  %vm1333_vm10 = vcmp.eq.s32.totalorder %v5693_v5, %v1326_v44  ;;  %vm1334_vm11 = vcmp.eq.s32.totalorder %v5933_v33, %v1326_v44  ;;  %vm1335_vm13 = vcmp.eq.s32.totalorder %v5936_v23, %v1326_v44  ;;  %v6969_v6 = vmov 0 }
 0xd81   :  { %4758 = vmatpush3.bf16.msra.mxu0 %v1541_v47  ;;  %4788 = vmatpush3.bf16.msra.mxu1 %v1558_v19  ;;  %v1544_v47 = vpack.c.bf16 %v1488_v37, %v1487_v36  ;;  %v1327_v19 = vadd.s32 320, %v5770_v62  ;;  %v6987_v29 = vmov 0  ;;  %v1236_v37 = vcvt.f32.s32 %v5910_v24 }
 0xd82   :  { %4759 = vmatprep.subr.bf16.mxu0 %v1550_v38  ;;  %4789 = vmatprep.subr.bf16.mxu1 %v1567_v28  ;;  %v5940_v38 = vadd.s32 384, %v5693_v5  ;;  %v6983_v28 = vmov 0 }
 0xd84   :  { %vm1300_vm8 = vcmp.eq.s32.totalorder %v5940_v38, %v1290_v1 }
 0xd85   :  { %4760 = vmatpush3.bf16.msra.mxu0 %v1542_v16  ;;  %4790 = vmatpush3.bf16.msra.mxu1 %v1559_v48  ;;  %v1291_v16 = vadd.s32 256, %v5708_v12  ;;  %v1292_v48 = vadd.s32 256, %v5718_v18  ;;  %v1328_v18 = vadd.s32 320, %v5766_v59 }
 0xd86   :  { %4761 = vmatprep.subr.bf16.mxu0 %v1551_v11  ;;  %4791 = vmatprep.subr.bf16.mxu1 %v1568_v40  ;;  %v6977_v11 = vmov 0  ;;  %v1251_v40 = vcvt.f32.s32 %v5908_v34 }
 0xd88   :  { %v1252_v1 = vshll.u32 %v1251_v40, 16 }
 0xd8d   :  { %1265 = vperm.xlu1 %5358, %v5340_v56   ;;  %v1486_v56 = vld [vmem:[#allocation6 + $0x168] sm:$0xff] }
 0xd8e   :  { %v1543_v25 = vpack.c.bf16 %v1486_v56, %v1485_v22  ;;  %v6979_v22 = vmov 0  ;;  %v1207_v56 = vshll.u32 %v1206_v27, 16 }
 0xd90   :  { %4762 = vmatpush3.bf16.msra.mxu0 %v1543_v25 }
 0xd91   :  { %1268 = vperm.xlu1 %5358, %v5342_v60   ;;  %4763 = vmatprep.subr.bf16.mxu0 %v1552_v35  ;;  %v1560_v60 = vpack.c.bf16 %v1520_v58, %v1519_v53 }
 0xd93   :  { %1262 = vperm.xlu0 %5357, %v5338_v8   ;;  %4792 = vmatpush3.bf16.msra.mxu1 %v1560_v60  ;;  %v1221_v8 = vcvt.f32.s32 %v5898_v61  ;;  %v1237_v60 = vshll.u32 %v1236_v37, 16 }
 0xd94   :  { %4764 = vmatpush3.bf16.msra.mxu0 %v1544_v47 }
 0xd95   :  { %1271 = vperm.xlu1 %5358, %v5344_v9   ;;  %v1222_v13 = vshll.u32 %v1221_v8, 16 }
 0xe05   :  { %v1219_v63 = vpop.xlane.xlu1 %1218 }
 0xe06   :  { %v1220_v9 = vcvt.f32.s32 %v1219_v63  ;;  %v1204_v42 = vpop.xlane.xlu0 %1203 }
 0xe07   :  { %v1205_v14 = vcvt.f32.s32 %v1204_v42 }
 0xe08   :  { %v1223_v61 = vadd.s32 %v1222_v13, %v1220_v9  ;;  %v1363_v9 = vadd.s32 384, %v5830_v43 }
 0xe09   :  { %v5929_v3 = vpop.xlane.xlu1 %1248  ;;  %v1208_v25 = vadd.s32 %v1207_v56, %v1205_v14  ;;  %v1703_v14 = vld [vmem:[#allocation2 + $0x44] sm:$0xff] }
 0xe0a   :  { %v5955_v15 = vadd.s32 448, %v1223_v61  ;;  %v5975_v17 = vpop.xlane.xlu0 %1233  ;;  %v1250_v24 = vcvt.f32.s32 %v5929_v3  ;;  %v1707_v56 = vld [vmem:[#allocation2 + $0xc4] sm:$0xff] }
 0xe0b   :  { %v6031_v26 = vadd.s32 448, %v1208_v25  ;;  %v1235_v53 = vcvt.f32.s32 %v5975_v17  ;;  %v1709_v25 = vld [vmem:[#allocation2 + $0x104] sm:$0xff] }
 0xe0c   :  { %v1253_v8 = vadd.s32 %v1252_v1, %v1250_v24 }
 0xe0d   :  { %v1266_v46 = vpop.permute.xlu1 %1265  ;;  %v1238_v3 = vadd.s32 %v1237_v60, %v1235_v53 }
 0xe0e   :  { %vm1277_vm15 = vcmp.eq.s32.totalorder %v5693_v5, %v1266_v46  ;;  %vm1278_vm1 = vcmp.eq.s32.totalorder %v5933_v33, %v1266_v46  ;;  %vm1279_vm2 = vcmp.eq.s32.totalorder %v5936_v23, %v1266_v46  ;;  %vm1280_vm4 = vcmp.eq.s32.totalorder %v5940_v38, %v1266_v46 }
 0xe0f   :  { %vm1313_vm5 = vmor %vm1277_vm15, %vm1297_vm14  ;;  %vm1336_vm15 = vcmp.eq.s32.totalorder %v5940_v38, %v1326_v44  ;;  %v1364_v46 = vadd.s32 384, %v5824_v39  ;;  %v1399_v61 = vadd.s32 448, %v1238_v3  ;;  %v1400_v43 = vadd.s32 448, %v1253_v8 }
 0xe10   :  { %vm1314_vm7 = vmor %vm1278_vm1, %vm1298_vm3 }
 0xe11   :  { %vm1315_vm9 = vmor %vm1279_vm2, %vm1299_vm6  ;;  %v1269_v31 = vpop.permute.xlu1 %1268  ;;  %vm1369_vm2 = vcmp.eq.s32.totalorder %v5693_v5, %v5951_v51  ;;  %vm1405_vm6 = vcmp.eq.s32.totalorder %v5693_v5, %v5955_v15 }
 0xe12   :  { %vm1316_vm0 = vmor %vm1280_vm4, %vm1300_vm8  ;;  %vm1371_vm4 = vcmp.eq.s32.totalorder %v5936_v23, %v5951_v51  ;;  %vm1281_vm8 = vcmp.eq.s32.totalorder %v5693_v5, %v1269_v31  ;;  %v1263_v62 = vpop.permute.xlu0 %1262 }
 0xe13   :  { %vm1349_vm12 = vmor %vm1313_vm5, %vm1333_vm10 }
 0xe14   :  { %vm5958_vm14 = vmor %vm1314_vm7, %vm1334_vm11 }
 0xe15   :  { %v6970_v6 = vsel %vm5958_vm14, 4294967295, %v6969_v6  ;;  %vm1351_vm1 = vmor %vm1315_vm9, %vm1335_vm13  ;;  %vm1407_vm9 = vcmp.eq.s32.totalorder %v5936_v23, %v5955_v15  ;;  %vm1283_vm13 = vcmp.eq.s32.totalorder %v5936_v23, %v1269_v31  ;;  %vm1338_vm14 = vcmp.eq.s32.totalorder %v5933_v33, %v1327_v19  ;;  %v1272_v32 = vpop.permute.xlu1 %1271 }
 0xe16   :  { %vm5966_vm3 = vmor %vm1316_vm0, %vm1336_vm15  ;;  %vm1282_vm0 = vcmp.eq.s32.totalorder %v5933_v33, %v1269_v31  ;;  %vm1302_vm15 = vcmp.eq.s32.totalorder %v5933_v33, %v1291_v16 }
 0xe17   :  { %v6972_v7 = vsel %vm5966_vm3, 4294967295, %v6971_v7  ;;  %vm1385_vm5 = vmor %vm1349_vm12, %vm1369_vm2  ;;  %vm1301_vm12 = vcmp.eq.s32.totalorder %v5693_v5, %v1291_v16 }
 0xe18   :  { %vm1387_vm7 = vmor %vm1351_vm1, %vm1371_vm4  ;;  %vm1284_vm1 = vcmp.eq.s32.totalorder %v5940_v38, %v1269_v31  ;;  %vm1303_vm4 = vcmp.eq.s32.totalorder %v5936_v23, %v1291_v16 }
 0xe19   :  { %vm5979_vm10 = vmor %vm1385_vm5, %vm1405_vm6  ;;  %vm1304_vm6 = vcmp.eq.s32.totalorder %v5940_v38, %v1291_v16 }
 0xe1a   :  { %vm5985_vm11 = vmor %vm1387_vm7, %vm1407_vm9  ;;  %vm1337_vm7 = vcmp.eq.s32.totalorder %v5693_v5, %v1327_v19  ;;  %v4452_v30 = vsel %vm5979_vm10, 1.0, %v5576_v10  ;;  %vm1307_vm10 = vcmp.eq.s32.totalorder %v5936_v23, %v1292_v48 }
 0xe1b   :  { %v6976_v21 = vsel %vm5985_vm11, 4294967295, %v6975_v21  ;;  %vm1317_vm2 = vmor %vm1281_vm8, %vm1301_vm12  ;;  %vm1339_vm8 = vcmp.eq.s32.totalorder %v5936_v23, %v1327_v19  ;;  %vm1273_vm12 = vcmp.eq.s32.totalorder %v5693_v5, %v1263_v62 }
 0xe1c   :  { %vm1318_vm5 = vmor %vm1282_vm0, %vm1302_vm15 }
 0xe1d   :  { %vm1319_vm3 = vmor %vm1283_vm13, %vm1303_vm4  ;;  %vm1340_vm13 = vcmp.eq.s32.totalorder %v5940_v38, %v1327_v19  ;;  %vm1275_vm4 = vcmp.eq.s32.totalorder %v5936_v23, %v1263_v62 }
 0xe1e   :  { %vm1320_vm9 = vmor %vm1284_vm1, %vm1304_vm6  ;;  %vm1274_vm1 = vcmp.eq.s32.totalorder %v5933_v33, %v1263_v62 }
 0xe1f   :  { %vm5999_vm11 = vmor %vm1317_vm2, %vm1337_vm7  ;;  %vm1295_vm7 = vcmp.eq.s32.totalorder %v5936_v23, %v1289_v55 }
 0xe20   :  { %v6978_v11 = vsel %vm5999_vm11, 4294967295, %v6977_v11  ;;  %vm6004_vm0 = vmor %vm1318_vm5, %vm1338_vm14  ;;  %vm1293_vm14 = vcmp.eq.s32.totalorder %v5693_v5, %v1289_v55  ;;  %vm1294_vm5 = vcmp.eq.s32.totalorder %v5933_v33, %v1289_v55 }
 0xe21   :  { %v6980_v22 = vsel %vm6004_vm0, 4294967295, %v6979_v22  ;;  %vm6010_vm15 = vmor %vm1319_vm3, %vm1339_vm8  ;;  %vm1276_vm3 = vcmp.eq.s32.totalorder %v5940_v38, %v1263_v62 }
 0xe22   :  { %v6982_v0 = vsel %vm6010_vm15, 4294967295, %v6981_v0  ;;  %vm6016_vm2 = vmor %vm1320_vm9, %vm1340_vm13  ;;  %vm1296_vm15 = vcmp.eq.s32.totalorder %v5940_v38, %v1289_v55  ;;  %vm1329_vm9 = vcmp.eq.s32.totalorder %v5693_v5, %v1325_v2 }
 0xe23   :  { %v6984_v28 = vsel %vm6016_vm2, 4294967295, %v6983_v28  ;;  %vm1309_vm6 = vmor %vm1273_vm12, %vm1293_vm14  ;;  %vm1330_vm2 = vcmp.eq.s32.totalorder %v5933_v33, %v1325_v2  ;;  %vm1331_vm12 = vcmp.eq.s32.totalorder %v5936_v23, %v1325_v2 }
 0xe24   :  { %vm1310_vm8 = vmor %vm1274_vm1, %vm1294_vm5  ;;  %vm1332_vm1 = vcmp.eq.s32.totalorder %v5940_v38, %v1325_v2 }
 0xe25   :  { %vm1311_vm11 = vmor %vm1275_vm4, %vm1295_vm7 }
 0xe26   :  { %vm1312_vm13 = vmor %vm1276_vm3, %vm1296_vm15  ;;  %vm1365_vm15 = vcmp.eq.s32.totalorder %v5693_v5, %v6027_v52  ;;  %vm1367_vm3 = vcmp.eq.s32.totalorder %v5936_v23, %v6027_v52 }
 0xe27   :  { %vm1345_vm0 = vmor %vm1309_vm6, %vm1329_vm9  ;;  %vm1401_vm6 = vcmp.eq.s32.totalorder %v5693_v5, %v6031_v26 }
 0xe28   :  { %vm6034_vm14 = vmor %vm1310_vm8, %vm1330_vm2  ;;  %vm1285_vm8 = vcmp.eq.s32.totalorder %v5693_v5, %v1272_v32 }
 0xe29   :  { %vm1347_vm4 = vmor %vm1311_vm11, %vm1331_vm12  ;;  %vm1403_vm11 = vcmp.eq.s32.totalorder %v5936_v23, %v6031_v26  ;;  %vm1305_vm12 = vcmp.eq.s32.totalorder %v5693_v5, %v1292_v48 }
 0xe2a   :  { %vm6042_vm5 = vmor %vm1312_vm13, %vm1332_vm1  ;;  %vm1306_vm13 = vcmp.eq.s32.totalorder %v5933_v33, %v1292_v48  ;;  %vm1286_vm1 = vcmp.eq.s32.totalorder %v5933_v33, %v1272_v32 }
 0xe2b   :  { %v6988_v29 = vsel %vm6042_vm5, 4294967295, %v6987_v29  ;;  %vm1381_vm2 = vmor %vm1345_vm0, %vm1365_vm15  ;;  %vm6989_vm15 = vnez %v6976_v21 }
 0xe2c   :  { %vm1383_vm7 = vmor %vm1347_vm4, %vm1367_vm3  ;;  %vm1287_vm4 = vcmp.eq.s32.totalorder %v5936_v23, %v1272_v32  ;;  %v6065_v35 = vsel %vm6989_vm15, 1.0, %v5576_v10  ;;  %vm1288_vm3 = vcmp.eq.s32.totalorder %v5940_v38, %v1272_v32  ;;  %vm1342_vm15 = vcmp.eq.s32.totalorder %v5933_v33, %v1328_v18 }
 0xe2d   :  { %vm1417_vm9 = vmor %vm1381_vm2, %vm1401_vm6 }
 0xe2e   :  { %vm1419_vm0 = vmor %vm1383_vm7, %vm1403_vm11  ;;  %v4448_v49 = vsel %vm1417_vm9, 1.0, %v5576_v10  ;;  %vm1308_vm7 = vcmp.eq.s32.totalorder %v5940_v38, %v1292_v48  ;;  %vm1341_vm9 = vcmp.eq.s32.totalorder %v5693_v5, %v1328_v18 }
 0xe2f   :  { %v6068_v50 = vsel %vm1419_vm0, 1.0, %v5576_v10  ;;  %v1465_v36 = vpack.c.bf16 %v4452_v30, %v4448_v49  ;;  %vm1321_vm2 = vmor %vm1285_vm8, %vm1305_vm12  ;;  %vm1343_vm8 = vcmp.eq.s32.totalorder %v5936_v23, %v1328_v18 }
 0xe30   :  { %v1467_v59 = vpack.c.bf16 %v6065_v35, %v6068_v50  ;;  %vm1322_vm6 = vmor %vm1286_vm1, %vm1306_vm13  ;;  %vm1344_vm13 = vcmp.eq.s32.totalorder %v5940_v38, %v1328_v18 }
 0xe31   :  { %vm1323_vm11 = vmor %vm1287_vm4, %vm1307_vm10 }
 0xe32   :  { %vm1324_vm0 = vmor %vm1288_vm3, %vm1308_vm7  ;;  %vm1366_vm3 = vcmp.eq.s32.totalorder %v5933_v33, %v6027_v52 }
 0xe33   :  { %vm6081_vm5 = vmor %vm1321_vm2, %vm1341_vm9  ;;  %vm1370_vm2 = vcmp.eq.s32.totalorder %v5933_v33, %v5951_v51  ;;  %vm1406_vm9 = vcmp.eq.s32.totalorder %v5933_v33, %v5955_v15 }
 0xe34   :  { %vm6087_vm12 = vmor %vm1322_vm6, %vm1342_vm15  ;;  %vm6998_vm6 = vnez %v6970_v6 }
 0xe35   :  { %vm6093_vm1 = vmor %vm1323_vm11, %vm1343_vm8  ;;  %vm1402_vm11 = vcmp.eq.s32.totalorder %v5933_v33, %v6031_v26  ;;  %vm1372_vm8 = vcmp.eq.s32.totalorder %v5940_v38, %v5951_v51 }
 0xe36   :  { %vm6097_vm4 = vmor %vm1324_vm0, %vm1344_vm13  ;;  %vm6999_vm13 = vnez %v6988_v29 }
 0xe37   :  { %vm1382_vm10 = vmor %vm6034_vm14, %vm1366_vm3  ;;  %vm1368_vm14 = vcmp.eq.s32.totalorder %v5940_v38, %v6027_v52  ;;  %v1711_v52 = vld [vmem:[#allocation2 + $0x144] sm:$0xff] }
 0xe38   :  { %vm1386_vm7 = vmor %vm6998_vm6, %vm1370_vm2  ;;  %vm7000_vm2 = vnez %v6972_v7  ;;  %vm1404_vm6 = vcmp.eq.s32.totalorder %v5940_v38, %v6031_v26  ;;  %v4472_v26 = vcombine.high %v1709_v25, %v1711_v52  ;;  %v4471_v45 = vcombine.low %v1709_v25, %v1711_v52  ;;  %v1714_v25 = vld [vmem:[#allocation2 + $0x18c] sm:$0xf] }
 0xe39   :  { %vm1418_vm0 = vmor %vm1382_vm10, %vm1402_vm11  ;;  %v1716_v52 = vld [vmem:[#allocation2 + $0x1cc] sm:$0xf] }
 0xe3a   :  { %vm1422_vm15 = vmor %vm1386_vm7, %vm1406_vm9  ;;  %v4449_v44 = vsel %vm1418_vm0, 1.0, %v5576_v10  ;;  %vm1408_vm7 = vcmp.eq.s32.totalorder %v5940_v38, %v5955_v15  ;;  %vm1374_vm0 = vcmp.eq.s32.totalorder %v5933_v33, %v1363_v9 }
 0xe3b   :  { %v4453_v13 = vsel %vm1422_vm15, 1.0, %v5576_v10  ;;  %vm1384_vm3 = vmor %vm6999_vm13, %vm1368_vm14  ;;  %vm1378_vm15 = vcmp.eq.s32.totalorder %v5933_v33, %v1364_v46  ;;  %vm7001_vm14 = vnez %v6980_v22  ;;  %v1705_v22 = vld [vmem:[#allocation2 + $0x84] sm:$0xff] }
 0xe3c   :  { %v1466_v42 = vpack.c.bf16 %v4453_v13, %v4449_v44  ;;  %vm1388_vm10 = vmor %vm7000_vm2, %vm1372_vm8  ;;  %vm1414_vm2 = vcmp.eq.s32.totalorder %v5933_v33, %v1400_v43 }
 0xe3d   :  { %vm1420_vm11 = vmor %vm1384_vm3, %vm1404_vm6  ;;  %vm1410_vm3 = vcmp.eq.s32.totalorder %v5933_v33, %v1399_v61 }
 0xe3e   :  { %1601 = vmatprep.mubr.bf16.mxu0 %v1466_v42  ;;  %vm1424_vm9 = vmor %vm1388_vm10, %vm1408_vm7  ;;  %v4451_v39 = vsel %vm1420_vm11, 1.0, %v5576_v10  ;;  %vm1376_vm7 = vcmp.eq.s32.totalorder %v5940_v38, %v1363_v9  ;;  %vm1380_vm11 = vcmp.eq.s32.totalorder %v5940_v38, %v1364_v46 }
 0xe3f   :  { %v4455_v51 = vsel %vm1424_vm9, 1.0, %v5576_v10  ;;  %1602 = vmatmul.mubr.bf16.vlgmr.msra.gmra.mrb[16].mxu0 %v1465_v36  ;;  %vm1390_vm8 = vmor %vm7001_vm14, %vm1374_vm0  ;;  %vm7002_vm9 = vnez %v6984_v28  ;;  %vm1416_vm14 = vcmp.eq.s32.totalorder %v5940_v38, %v1400_v43  ;;  %v4469_v28 = vcombine.high %v1705_v22, %v1707_v56 }
 0xe40   :  { %v1468_v6 = vpack.c.bf16 %v4455_v51, %v4451_v39  ;;  %vm1394_vm13 = vmor %vm6087_vm12, %vm1378_vm15  ;;  %vm1412_vm15 = vcmp.eq.s32.totalorder %v5940_v38, %v1399_v61 }
 0xe41   :  { %vm1426_vm10 = vmor %vm1390_vm8, %vm1410_vm3  ;;  %vm1373_vm3 = vcmp.eq.s32.totalorder %v5693_v5, %v1363_v9 }
 0xe42   :  { %1650 = vmatprep.mubr.bf16.mxu1 %v1468_v6  ;;  %vm1430_vm6 = vmor %vm1394_vm13, %vm1414_vm2  ;;  %v4457_v15 = vsel %vm1426_vm10, 1.0, %v5576_v10  ;;  %vm1377_vm2 = vcmp.eq.s32.totalorder %v5693_v5, %v1364_v46  ;;  %vm7003_vm10 = vnez %v6978_v11  ;;  %v1701_v11 = vld [vmem:[#allocation2 + $0x4] sm:$0xff]  ;;  %v1702_v6 = vld [vmem:[#allocation2 + $0xc] sm:$0xf] }
 0xe43   :  { %1651 = vmatmul.mubr.bf16.vlgmr.msra.gmra.mrb[16].mxu1 %v1467_v59  ;;  %v4461_v31 = vsel %vm1430_vm6, 1.0, %v5576_v10  ;;  %vm1392_vm0 = vmor %vm7002_vm9, %vm1376_vm7  ;;  %vm1409_vm7 = vcmp.eq.s32.totalorder %v5693_v5, %v1399_v61  ;;  %v4466_v2 = vcombine.high %v1701_v11, %v1703_v14 }
 0xe44   :  { %v1470_v16 = vpack.c.bf16 %v4461_v31, %v4457_v15  ;;  %vm1396_vm12 = vmor %vm6097_vm4, %vm1380_vm11  ;;  %vm1413_vm11 = vcmp.eq.s32.totalorder %v5693_v5, %v1400_v43  ;;  %v1704_v15 = vld [vmem:[#allocation2 + $0x4c] sm:$0xf] }
 0xe45   :  { %vm1428_vm8 = vmor %vm1392_vm0, %vm1412_vm15  ;;  %vm1379_vm15 = vcmp.eq.s32.totalorder %v5936_v23, %v1364_v46  ;;  %1881 = vmatprep.subr.bf16.mxu0 %v4466_v2  ;;  %v4467_v31 = vcombine.low %v1702_v6, %v1704_v15 }
 0xe46   :  { %1609 = vmatprep.mubr.bf16.mxu0 %v1470_v16  ;;  %vm1432_vm13 = vmor %vm1396_vm12, %vm1416_vm14  ;;  %v4459_v7 = vsel %vm1428_vm8, 1.0, %v5576_v10  ;;  %vm1375_vm12 = vcmp.eq.s32.totalorder %v5936_v23, %v1363_v9  ;;  %vm7004_vm14 = vnez %v6982_v0  ;;  %v4465_v0 = vcombine.low %v1701_v11, %v1703_v14  ;;  %v1713_v16 = vld [vmem:[#allocation2 + $0x184] sm:$0xff]  ;;  %v1710_v11 = vld [vmem:[#allocation2 + $0x10c] sm:$0xf] }
 0xe47   :  { %v4463_v17 = vsel %vm1432_vm13, 1.0, %v5576_v10  ;;  %vm1389_vm6 = vmor %vm7003_vm10, %vm1373_vm3  ;;  %vm1411_vm13 = vcmp.eq.s32.totalorder %v5936_v23, %v1399_v61  ;;  %vm1415_vm3 = vcmp.eq.s32.totalorder %v5936_v23, %v1400_v43  ;;  %v4468_v23 = vcombine.low %v1705_v22, %v1707_v56  ;;  %5117 = vmatprep.subr.bf16.mxu1 %v4467_v31  ;;  %v1712_v14 = vld [vmem:[#allocation2 + $0x14c] sm:$0xf]  ;;  %v1721_v22 = vld [vmem:[#allocation2 + $0x284] sm:$0xff] }
 0xe48   :  { %v1472_v12 = vpack.c.bf16 %v4463_v17, %v4459_v7  ;;  %vm1393_vm4 = vmor %vm6081_vm5, %vm1377_vm2  ;;  %1882 = vmatpush1.bf16.msra.mxu0 %v4465_v0  ;;  %v1715_v7 = vld [vmem:[#allocation2 + $0x1c4] sm:$0xff]  ;;  %5118 = vmatpush3.bf16.msra.mxu1 %v4467_v31  ;;  %v4473_v2 = vcombine.low %v1710_v11, %v1712_v14 }
 0xe49   :  { %vm1425_vm9 = vmor %vm1389_vm6, %vm1409_vm7  ;;  %1883 = vmatprep.subr.bf16.mxu0 %v4469_v28  ;;  %v4474_v17 = vcombine.low %v1713_v16, %v1715_v7  ;;  %v1723_v56 = vld [vmem:[#allocation2 + $0x2c4] sm:$0xff] }
 0xe4a   :  { %1658 = vmatprep.mubr.bf16.mxu1 %v1472_v12  ;;  %vm1429_vm0 = vmor %vm1393_vm4, %vm1413_vm11  ;;  %v4456_v38 = vsel %vm1425_vm9, 1.0, %v5576_v10  ;;  %v4475_v12 = vcombine.high %v1713_v16, %v1715_v7  ;;  %v4481_v28 = vcombine.high %v1721_v22, %v1723_v56  ;;  %v1667_v16 = vld [vmem:[%s6963_s1 + $0x2] ss:$0 sm:$0xff] }
 0xe4b   :  { %v4460_v19 = vsel %vm1429_vm0, 1.0, %v5576_v10  ;;  %vm1391_vm8 = vmor %vm7004_vm14, %vm1375_vm12 }
 0xe4c   :  { %v1469_v21 = vpack.c.bf16 %v4460_v19, %v4456_v38  ;;  %vm1395_vm5 = vmor %vm6093_vm1, %vm1379_vm15  ;;  %1884 = vmatpush1.bf16.msra.mxu0 %v4468_v23  ;;  %v1706_v38 = vld [vmem:[#allocation2 + $0x8c] sm:$0xf]  ;;  %v1725_v23 = vld [vmem:[#allocation2 + $0x304] sm:$0xff] }
 0xe4d   :  { %vm1427_vm2 = vmor %vm1391_vm8, %vm1411_vm13  ;;  %1885 = vmatprep.subr.bf16.mxu0 %v4472_v26  ;;  %v1708_v19 = vld [vmem:[#allocation2 + $0xcc] sm:$0xf]  ;;  %v4480_v26 = vcombine.low %v1721_v22, %v1723_v56 }
 0xe4e   :  { %1610 = vmatmul.mubr.bf16.gmra.mrb[20].mxu0 %v1469_v21  ;;  %vm1431_vm10 = vmor %vm1395_vm5, %vm1415_vm3  ;;  %v4458_v62 = vsel %vm1427_vm2, 1.0, %v5576_v10  ;;  %v1717_v21 = vld [vmem:[#allocation2 + $0x204] sm:$0xff]  ;;  %vm2070_vm5 = vcmask 261120  }
 0xe4f   :  { %v4462_v55 = vsel %vm1431_vm10, 1.0, %v5576_v10 }
 0xe50   :  { %v1471_v27 = vpack.c.bf16 %v4462_v55, %v4458_v62  ;;  %1886 = vmatpush1.bf16.msra.mxu0 %v4471_v45  ;;  %v4470_v62 = vcombine.low %v1706_v38, %v1708_v19  ;;  %v1719_v55 = vld [vmem:[#allocation2 + $0x244] sm:$0xff]  ;;  %v4476_v45 = vcombine.low %v1714_v25, %v1716_v52 }
 0xe51   :  { %1887 = vmatprep.subr.bf16.mxu0 %v4475_v12  ;;  %v4477_v0 = vcombine.low %v1717_v21, %v1719_v55  ;;  %v4464_v52 = vld [vmem:[%s6963_s1 + $0x3] ss:$8 sm:$0x7] }
 0xe52   :  { %1659 = vmatmul.mubr.bf16.gmra.mrb[20].mxu1 %v1471_v27  ;;  %v4478_v27 = vcombine.high %v1717_v21, %v1719_v55  ;;  %5119 = vmatprep.subr.bf16.mxu1 %v4470_v62 }
 0xe53   :  { %5120 = vmatpush3.bf16.msra.mxu1 %v4470_v62 }
 0xe54   :  { %1888 = vmatpush1.bf16.msra.mxu0 %v4474_v17  ;;  %5121 = vmatprep.subr.bf16.mxu1 %v4473_v2 }
 0xe55   :  { %1889 = vmatprep.subr.bf16.mxu0 %v4478_v27 }
 0xe57   :  { %5122 = vmatpush3.bf16.msra.mxu1 %v4473_v2 }
 0xe58   :  { %1890 = vmatpush1.bf16.msra.mxu0 %v4477_v0  ;;  %5123 = vmatprep.subr.bf16.mxu1 %v4476_v45 }
 0xe59   :  { %1891 = vmatprep.subr.bf16.mxu0 %v4481_v28  ;;  %v6197_v28 = vshrl.u32 %v299_v4, 7 }
 0xe5b   :  { %5124 = vmatpush3.bf16.msra.mxu1 %v4476_v45  ;;  %v6200_v25 = vsub.s32 0, %v6197_v28  ;;  %vm1997_vm7 = vcmp.le.s32.totalorder %v5693_v5, %v6197_v28 }
 0xe5c   :  { %1892 = vmatpush1.bf16.msra.mxu0 %v4480_v26 }
 0xe5d   :  { %v1741_v26 = vrot.slane %v4464_v52, %v6200_v25 }
 0xf12   :  { %v4765_v10 = vpop.f32.mrb[16].mxu0 }
 0xf13   :  { %v4766_v48 = vpop.f32.mrb[17].mxu0 }
 0xf14   :  { %v4767_v32 = vadd.f32 %v4766_v48, %v4765_v10  ;;  %v4768_v29 = vpop.f32.mrb[18].mxu0  ;;  %v1727_v10 = vld [vmem:[#allocation2 + $0x344] sm:$0xff]  ;;  %v1718_v48 = vld [vmem:[#allocation2 + $0x20c] sm:$0xf] }
 0xf15   :  { %v4769_v18 = vpop.f32.mrb[19].mxu0 }
 0xf16   :  { %v4793_v30 = vpop.f32.mrb[16].mxu1  ;;  %v4770_v49 = vadd.f32 %v4769_v18, %v4768_v29  ;;  %v5578_v29 = vmov 0   ;;  %v4484_v18 = vcombine.high %v1725_v23, %v1727_v10 }
 0xf17   :  { %v4794_v35 = vpop.f32.mrb[17].mxu1  ;;  %1913 = vmatprep.mubr.bf16.mxu0 %v5578_v29 }
 0xf18   :  { %v4795_v50 = vadd.f32 %v4794_v35, %v4793_v30  ;;  %v4796_v36 = vpop.f32.mrb[18].mxu1  ;;  %v1729_v30 = vld [vmem:[#allocation2 + $0x384] sm:$0xff]  ;;  %1893 = vmatprep.subr.bf16.mxu0 %v4484_v18 }
 0xf19   :  { %v4797_v59 = vpop.f32.mrb[19].mxu1 }
 0xf1a   :  { %v6171_v37 = vadd.f32 %v4795_v50, %v4767_v32  ;;  %v4798_v40 = vadd.f32 %v4797_v59, %v4796_v36  ;;  %v1720_v32 = vld [vmem:[#allocation2 + $0x24c] sm:$0xf]  ;;  %v4483_v50 = vcombine.low %v1725_v23, %v1727_v10  ;;  %v6206_v23 = vsub.s32 1, %v6197_v28 }
 0xf1b   :  { %v4479_v35 = vcombine.low %v1718_v48, %v1720_v32  ;;  %v1722_v36 = vld [vmem:[#allocation2 + $0x28c] sm:$0xf] }
 0xf1c   :  { %v6173_v47 = vadd.f32 %v4798_v40, %v4770_v49  ;;  %v1668_v53 = vmul.f32 %v6171_v37, %v6171_v37  ;;  %v1731_v49 = vld [vmem:[#allocation2 + $0x3c4] sm:$0xff]  ;;  %v1724_v59 = vld [vmem:[#allocation2 + $0x2cc] sm:$0xf]  ;;  %1894 = vmatpush1.bf16.msra.mxu0 %v4483_v50  ;;  %v1745_v10 = vrot.slane %v4464_v52, %v6206_v23 }
 0xf1d   :  { %v4487_v40 = vcombine.high %v1729_v30, %v1731_v49  ;;  %5125 = vmatprep.subr.bf16.mxu1 %v4479_v35 }
 0xf1e   :  { %1672 = vadd.xlane.f32.xlu1 %v1668_v53  ;;  %v1669_v58 = vmul.f32 %v6173_v47, %v6173_v47  ;;  %v4482_v53 = vcombine.low %v1722_v36, %v1724_v59  ;;  %5126 = vmatpush3.bf16.msra.mxu1 %v4479_v35  ;;  %v1748_v59 = vsub.s32 2, %v6197_v28 }
 0xf1f   :  { %1895 = vmatprep.subr.bf16.mxu0 %v4487_v40 }
 0xf20   :  { %1674 = vadd.xlane.f32.xlu0 %v1669_v58  ;;  %v4486_v58 = vcombine.low %v1729_v30, %v1731_v49  ;;  %5127 = vmatprep.subr.bf16.mxu1 %v4482_v53  ;;  %v1749_v40 = vrot.slane %v4464_v52, %v1748_v59 }
 0xf21   :  { %v4771_v24 = vpop.f32.mrb[20].mxu0 }
 0xf22   :  { %v4772_v34 = vpop.f32.mrb[21].mxu0  ;;  %1896 = vmatpush1.bf16.msra.mxu0 %v4486_v58  ;;  %5128 = vmatpush3.bf16.msra.mxu1 %v4482_v53 }
 0xf23   :  { %v4773_v60 = vadd.f32 %v4772_v34, %v4771_v24  ;;  %v4774_v63 = vpop.f32.mrb[22].mxu0  ;;  %v1726_v24 = vld [vmem:[#allocation2 + $0x30c] sm:$0xf] }
 0xf24   :  { %v4775_v1 = vpop.f32.mrb[23].mxu0  ;;  %v1728_v34 = vld [vmem:[#allocation2 + $0x34c] sm:$0xf] }
 0xf25   :  { %v4799_v3 = vpop.f32.mrb[20].mxu1  ;;  %v4776_v8 = vadd.f32 %v4775_v1, %v4774_v63  ;;  %v1730_v63 = vld [vmem:[#allocation2 + $0x38c] sm:$0xf] }
 0xf26   :  { %v4800_v9 = vpop.f32.mrb[21].mxu1  ;;  %v1732_v1 = vld [vmem:[#allocation2 + $0x3cc] sm:$0xf] }
 0xf27   :  { %v4801_v44 = vadd.f32 %v4800_v9, %v4799_v3  ;;  %v4802_v46 = vpop.f32.mrb[22].mxu1  ;;  %v4488_v3 = vcombine.low %v1730_v63, %v1732_v1 }
 0xf28   :  { %v4803_v13 = vpop.f32.mrb[23].mxu1 }
 0xf29   :  { %v6179_v61 = vadd.f32 %v4801_v44, %v4773_v60  ;;  %v4804_v42 = vadd.f32 %v4803_v13, %v4802_v46  ;;  %v4485_v60 = vcombine.low %v1726_v24, %v1728_v34 }
 0xf2b   :  { %v6181_v43 = vadd.f32 %v4804_v42, %v4776_v8  ;;  %v1670_v39 = vmul.f32 %v6179_v61, %v6179_v61  ;;  %5129 = vmatprep.subr.bf16.mxu1 %v4485_v60 }
 0xf2c   :  { %5130 = vmatpush3.bf16.msra.mxu1 %v4485_v60 }
 0xf2d   :  { %1676 = vadd.xlane.f32.xlu1 %v1670_v39  ;;  %v1671_v51 = vmul.f32 %v6181_v43, %v6181_v43  ;;  %5131 = vmatprep.subr.bf16.mxu1 %v4488_v3 }
 0xf30   :  { %5132 = vmatpush3.bf16.msra.mxu1 %v4488_v3 }
 0xf31   :  { %1678 = vadd.xlane.f32.xlu1 %v1671_v51 }
 0xfab   :  { %v1673_v8 = vpop.xlane.xlu1 %1672 }
 0xfac   :  { %v1681_v9 = vmul.f32 0.0078125, %v1673_v8 }
 0xfad   :  { %v1675_v44 = vpop.xlane.xlu0 %1674 }
 0xfae   :  { %v1685_v46 = vadd.f32 1e-06, %v1681_v9  ;;  %v1682_v13 = vmul.f32 0.0078125, %v1675_v44 }
 0xfb0   :  { %5391 = vrsqrt.f32 %v1685_v46  ;;  %v1686_v42 = vadd.f32 1e-06, %v1682_v13 }
 0xfb2   :  { %5393 = vrsqrt.f32 %v1686_v42 }
 0xfba   :  { %v5392_v39 = vpop.eup %5391  ;;  %v1677_v51 = vpop.xlane.xlu1 %1676 }
 0xfbb   :  { %v1693_v6 = vmul.f32 %v5392_v39, %v6171_v37  ;;  %v1683_v15 = vmul.f32 0.0078125, %v1677_v51 }
 0xfbc   :  { %v5394_v31 = vpop.eup %5393 }
 0xfbd   :  { %v1694_v7 = vmul.f32 %v5394_v31, %v6173_v47  ;;  %v1687_v17 = vadd.f32 1e-06, %v1683_v15  ;;  %v1697_v19 = vmul.f32 %v1693_v6, %v1667_v16 }
 0xfbe   :  { %v1679_v12 = vpop.xlane.xlu1 %1678 }
 0xfbf   :  { %5395 = vrsqrt.f32 %v1687_v17  ;;  %v1684_v38 = vmul.f32 0.0078125, %v1679_v12  ;;  %v1698_v21 = vmul.f32 %v1694_v7, %v1667_v16  ;;  %v1986_v7 = vadd.s32 16, %v6197_v28 }
 0xfc0   :  { %v1985_v17 = vadd.s32 8, %v6197_v28 }
 0xfc1   :  { %v1688_v62 = vadd.f32 1e-06, %v1684_v38  ;;  %v1733_v55 = vpack.c.bf16 %v1698_v21, %v1697_v19  ;;  %v1990_v12 = vand.u32 4294967280, %v1986_v7  ;;  %v1992_v38 = vand.u32 4294967280, %v5693_v5 }
 0xfc2   :  { %v1988_v19 = vand.u32 4294967280, %v6197_v28  ;;  %v1989_v21 = vand.u32 4294967280, %v1985_v17  ;;  %vm1999_vm6 = vcmp.le.s32.totalorder %v5693_v5, %v1986_v7  ;;  %vm1998_vm0 = vcmp.le.s32.totalorder %v5693_v5, %v1985_v17  ;;  %v2174_v7 = vld [vmem:[#allocation2 + $0x10] sm:$0xf] }
 0xfc3   :  { %5397 = vrsqrt.f32 %v1688_v62  ;;  %1914 = vmatmul.mubr.bf16.vlgmr.msra.gmra.mrb[24].mxu0 %v1733_v55  ;;  %5133 = vmatprep.mubr.bf16.mxu1 %v1733_v55  ;;  %v1987_v62 = vadd.s32 24, %v6197_v28  ;;  %vm1995_vm1 = vcmp.eq.s32.totalorder %v1990_v12, %v1992_v38  ;;  %v2175_v17 = vld [vmem:[#allocation2 + $0x50] sm:$0xf] }
 0xfc4   :  { %1923 = vmatprep.mubr.bf16.mxu0 %v5578_v29  ;;  %vm1993_vm4 = vcmp.eq.s32.totalorder %v1988_v19, %v1992_v38  ;;  %vm2003_vm11 = vmand %vm1995_vm1, %vm1999_vm6  ;;  %vm1994_vm9 = vcmp.eq.s32.totalorder %v1989_v21, %v1992_v38  ;;  %v2176_v12 = vld [vmem:[#allocation2 + $0x90] sm:$0xf] }
 0xfc5   :  { %v1991_v55 = vand.u32 4294967280, %v1987_v62  ;;  %vm2001_vm12 = vmand %vm1993_vm4, %vm1997_vm7  ;;  %vm2000_vm8 = vcmp.le.s32.totalorder %v5693_v5, %v1987_v62  ;;  %v2177_v19 = vld [vmem:[#allocation2 + $0xd0] sm:$0xf] }
 0xfc6   :  { %vm2002_vm15 = vmand %vm1994_vm9, %vm1998_vm0  ;;  %v4492_v21 = vcombine.low %v2176_v12, %v2177_v19  ;;  %v2178_v62 = vld [vmem:[#allocation2 + $0x110] sm:$0xf]  ;;  %v2335_v12 = vld [vmem:[#allocation2 + $0x114] sm:$0xff] }
 0xfc7   :  { %vm1996_vm14 = vcmp.eq.s32.totalorder %v1991_v55, %v1992_v38  ;;  %v4491_v38 = vcombine.low %v2174_v7, %v2175_v17  ;;  %v2179_v55 = vld [vmem:[#allocation2 + $0x150] sm:$0xf]  ;;  %v2334_v7 = vld [vmem:[#allocation2 + $0xd4] sm:$0xff] }
 0xfc8   :  { %vm2004_vm13 = vmand %vm1996_vm14, %vm2000_vm8 }
 0xfc9   :  { %v5396_v27 = vpop.eup %5395  ;;  %5153 = vmatprep.subr.bf16.mxu1 %v4491_v38 }
 0xfca   :  { %v1695_v11 = vmul.f32 %v5396_v27, %v6179_v61 }
 0xfcc   :  { %v1699_v0 = vmul.f32 %v1695_v11, %v1667_v16  ;;  %v5579_v11 = vmov -1e+30  }
 0xfcd   :  { %v5398_v14 = vpop.eup %5397 }
 0xfce   :  { %v1696_v22 = vmul.f32 %v5398_v14, %v6181_v43  ;;  %v2007_v14 = vsel %vm2003_vm11, 0.0, %v5579_v11 }
 0xfd0   :  { %v1700_v2 = vmul.f32 %v1696_v22, %v1667_v16 }
 0xfd2   :  { %v1734_v56 = vpack.c.bf16 %v1700_v2, %v1699_v0  ;;  %v2005_v2 = vsel %vm2001_vm12, 0.0, %v5579_v11 }
 0xfd4   :  { %1924 = vmatmul.mubr.bf16.gmra.mrb[28].mxu0 %v1734_v56  ;;  %5134 = vmatmul.mubr.bf16.vlgmr.msra.gmra.mrb[24].mxu1 %v1734_v56 }
 0xfd5   :  { %5154 = vmatpush3.bf16.msra.mxu1 %v4491_v38  ;;  %v2336_v38 = vld [vmem:[#allocation2 + $0x154] sm:$0xff] }
 0xfd6   :  { %5155 = vmatprep.subr.bf16.mxu1 %v4492_v21 }
 0xfd9   :  { %5156 = vmatpush3.bf16.msra.mxu1 %v4492_v21  ;;  %v4505_v21 = vcombine.high %v2335_v12, %v2336_v38 }
0x1096   :  { %v1915_v45 = vpop.f32.mrb[24].mxu0 }
0x1097   :  { %v1917_v48 = vpop.f32.mrb[25].mxu0  ;;  %v1916_v18 = vadd.f32 %v1915_v45, %v1741_v26 }
0x1098   :  { %v1919_v32 = vpop.f32.mrb[26].mxu0  ;;  %v1918_v49 = vadd.f32 %v1917_v48, %v1745_v10 }
0x1099   :  { %v1920_v4 = vadd.f32 %v1919_v32, %v1741_v26  ;;  %v1921_v30 = vpop.f32.mrb[27].mxu0 }
0x109a   :  { %v1922_v35 = vadd.f32 %v1921_v30, %v1745_v10 }
0x109b   :  { %v2009_v50 = vpack.c.bf16 %v1920_v4, %v1916_v18 }
0x109c   :  { %v2011_v36 = vpack.c.bf16 %v1922_v35, %v1918_v49  ;;  %v2008_v35 = vsel %vm2004_vm13, 0.0, %v5579_v11 }
0x109d   :  { %5141 = vmatprep.mubr.bf16.mxu0 %v2009_v50 }
0x109e   :  { %5137 = vmatprep.subr.bf16.mxu0 %v2011_v36 }
0x109f   :  { %5138 = vmatpush3.bf16.xpose.msra.mxu0 %v2011_v36 }
0x10a7   :  { %v1925_v53 = vpop.f32.mrb[28].mxu0  ;;  %v5135_v58 = vpop.f32.mrb[24].mxu1 }
0x10a8   :  { %v1927_v24 = vpop.f32.mrb[29].mxu0  ;;  %v1968_v34 = vpop.f32.mrb[25].mxu1  ;;  %v1926_v1 = vadd.f32 %v1925_v53, %v1741_v26  ;;  %v1977_v3 = vadd.f32 %v5135_v58, %v1749_v40 }
0x10a9   :  { %v1929_v60 = vpop.f32.mrb[30].mxu0  ;;  %v5136_v63 = vpop.f32.mrb[26].mxu1  ;;  %v1928_v13 = vadd.f32 %v1927_v24, %v1745_v10  ;;  %v1969_v42 = vadd.f32 %v1968_v34, %v1749_v40 }
0x10aa   :  { %v1930_v8 = vadd.f32 %v1929_v60, %v1741_v26  ;;  %v1980_v9 = vadd.f32 %v5136_v63, %v1749_v40  ;;  %v1931_v44 = vpop.f32.mrb[31].mxu0  ;;  %v1971_v46 = vpop.f32.mrb[27].mxu1 }
0x10ab   :  { %v1932_v39 = vadd.f32 %v1931_v44, %v1745_v10  ;;  %v1972_v51 = vadd.f32 %v1971_v46, %v1749_v40  ;;  %v2006_v10 = vsel %vm2002_vm15, 0.0, %v5579_v11  ;;  %v2180_v11 = vld [vmem:[#allocation2 + $0x190] sm:$0xf] }
0x10ac   :  { %v2010_v6 = vpack.c.bf16 %v1930_v8, %v1926_v1  ;;  %v2118_v15 = vpack.c.bf16 %v1980_v9, %v1977_v3 }
0x10ad   :  { %v2012_v31 = vpack.c.bf16 %v1932_v39, %v1928_v13  ;;  %v2117_v16 = vpack.c.bf16 %v1972_v51, %v1969_v42 }
0x10af   :  { %5139 = vmatprep.subr.bf16.mxu0 %v2012_v31 }
0x10b0   :  { %5140 = vmatpush3.bf16.xpose.msra.mxu0 %v2012_v31 }
0x10b1   :  { %5145 = vmatprep.subr.bf16.mxu0 %v2117_v16 }
0x10b7   :  { %5142 = vmatmul.mubr.bf16.vlgmr.msra.gmra.mrb[32].mxu0 %v2010_v6 }
0x10b8   :  { %5146 = vmatpush3.bf16.msra.mxu0 %v2117_v16 }
0x10b9   :  { %5147 = vmatprep.subr.bf16.mxu0 %v2118_v15 }
0x10bc   :  { %5148 = vmatpush3.bf16.msra.mxu0 %v2118_v15 }
0x118a   :  { %v5143_v27 = vpop.f32.mrb[32].mxu0 }
0x118b   :  { %v2064_v22 = vmul.f32 0.088388346, %v5143_v27  ;;  %v2047_v0 = vpop.f32.mrb[33].mxu0  ;;  %v4493_v27 = vcombine.low %v2178_v62, %v2179_v55  ;;  %v4504_v62 = vcombine.low %v2335_v12, %v2336_v38 }
0x118c   :  { %v2062_v56 = vmul.f32 0.088388346, %v2047_v0  ;;  %v5144_v52 = vpop.f32.mrb[34].mxu0  ;;  %v2182_v0 = vld [vmem:[#allocation2 + $0x210] sm:$0xf] }
0x118d   :  { %v2050_v26 = vpop.f32.mrb[35].mxu0  ;;  %v2068_v45 = vadd.f32 %v2064_v22, %v2007_v14  ;;  %v2065_v4 = vmul.f32 0.088388346, %v5144_v52  ;;  %v2181_v14 = vld [vmem:[#allocation2 + $0x1d0] sm:$0xf]  ;;  %5157 = vmatprep.subr.bf16.mxu1 %v4493_v27 }
0x118e   :  { %v2063_v48 = vmul.f32 0.088388346, %v2050_v26  ;;  %v2066_v32 = vadd.f32 %v2062_v56, %v2005_v2  ;;  %v4494_v22 = vcombine.low %v2180_v11, %v2181_v14  ;;  %v2183_v2 = vld [vmem:[#allocation2 + $0x250] sm:$0xf]  ;;  %5158 = vmatpush3.bf16.msra.mxu1 %v4493_v27  ;;  %v2293_v27 = vld [vmem:[%s6963_s1 + $0x4] ss:$0 sm:$0xff] }
0x118f   :  { %v2077_v18 = vsel %vm2070_vm5, %v2068_v45, -inf  ;;  %v2069_v36 = vadd.f32 %v2065_v4, %v2008_v35  ;;  %v4495_v56 = vcombine.low %v2182_v0, %v2183_v2  ;;  %v2184_v52 = vld [vmem:[#allocation2 + $0x290] sm:$0xf] }
0x1190   :  { %2078 = vmax.xlane.f32.xlu0 %v2077_v18  ;;  %v2071_v30 = vsel %vm2070_vm5, %v2066_v32, -inf  ;;  %v2067_v49 = vadd.f32 %v2063_v48, %v2006_v10  ;;  %5159 = vmatprep.subr.bf16.mxu1 %v4494_v22  ;;  %v2185_v26 = vld [vmem:[#allocation2 + $0x2d0] sm:$0xf] }
0x1191   :  { %2072 = vmax.xlane.f32.xlu1 %v2071_v30  ;;  %v2080_v40 = vsel %vm2070_vm5, %v2069_v36, -inf  ;;  %v2186_v10 = vld [vmem:[#allocation2 + $0x310] sm:$0xf] }
0x1192   :  { %v2074_v50 = vsel %vm2070_vm5, %v2067_v49, -inf  ;;  %5160 = vmatpush3.bf16.msra.mxu1 %v4494_v22  ;;  %v2187_v48 = vld [vmem:[#allocation2 + $0x350] sm:$0xf] }
0x1193   :  { %5161 = vmatprep.subr.bf16.mxu1 %v4495_v56 }
0x1195   :  { %2075 = vmax.xlane.f32.xlu1 %v2074_v50 }
0x1196   :  { %5162 = vmatpush3.bf16.msra.mxu1 %v4495_v56 }
0x1199   :  { %2081 = vmax.xlane.f32.xlu1 %v2080_v40 }
0x121d   :  { %v2079_v53 = vpop.xlane.xlu0 %2078 }
0x121e   :  { %v2085_v58 = vsub.f32 %v2068_v45, %v2079_v53  ;;  %v2073_v24 = vpop.xlane.xlu1 %2072  ;;  %v4496_v45 = vcombine.low %v2184_v52, %v2185_v26 }
0x121f   :  { %v2083_v34 = vsub.f32 %v2066_v32, %v2073_v24  ;;  %v4497_v32 = vcombine.low %v2186_v10, %v2187_v48 }
0x1220   :  { %v2091_v60 = vmul.f32 1.442695, %v2085_v58  ;;  %5163 = vmatprep.subr.bf16.mxu1 %v4496_v45 }
0x1221   :  { %v2087_v63 = vmul.f32 1.442695, %v2083_v34  ;;  %5164 = vmatpush3.bf16.msra.mxu1 %v4496_v45 }
0x1222   :  { %v2076_v1 = vpop.xlane.xlu1 %2075  ;;  %5165 = vmatprep.subr.bf16.mxu1 %v4497_v32 }
0x1223   :  { %5399 = vpow2.f32 %v2087_v63  ;;  %v2084_v3 = vsub.f32 %v2067_v49, %v2076_v1  ;;  %v2188_v1 = vld [vmem:[#allocation2 + $0x390] sm:$0xf] }
0x1224   :  { %5401 = vpow2.f32 %v2091_v60 }
0x1225   :  { %v2089_v8 = vmul.f32 1.442695, %v2084_v3  ;;  %5166 = vmatpush3.bf16.msra.mxu1 %v4497_v32  ;;  %v2189_v3 = vld [vmem:[#allocation2 + $0x3d0] sm:$0xf] }
0x1226   :  { %v2082_v9 = vpop.xlane.xlu1 %2081 }
0x1227   :  { %5403 = vpow2.f32 %v2089_v8  ;;  %v2086_v44 = vsub.f32 %v2069_v36, %v2082_v9  ;;  %v4498_v8 = vcombine.low %v2188_v1, %v2189_v3  ;;  %v2345_v1 = vld [vmem:[#allocation2 + $0x394] sm:$0xff] }
0x1228   :  { %v2346_v3 = vld [vmem:[#allocation2 + $0x3d4] sm:$0xff] }
0x1229   :  { %v2093_v46 = vmul.f32 1.442695, %v2086_v44  ;;  %5167 = vmatprep.subr.bf16.mxu1 %v4498_v8 }
0x122a   :  { %5168 = vmatpush3.bf16.msra.mxu1 %v4498_v8 }
0x122b   :  { %5405 = vpow2.f32 %v2093_v46 }
0x122d   :  { %v5400_v13 = vpop.eup %5399 }
0x122e   :  { %v2095_v42 = vsel %vm2070_vm5, %v5400_v13, 0.0  ;;  %v5402_v39 = vpop.eup %5401 }
0x122f   :  { %2096 = vadd.xlane.f32.xlu0 %v2095_v42  ;;  %v2101_v6 = vsel %vm2070_vm5, %v5402_v39, 0.0 }
0x1231   :  { %v5404_v51 = vpop.eup %5403 }
0x1232   :  { %v2098_v15 = vsel %vm2070_vm5, %v5404_v51, 0.0 }
0x1233   :  { %2102 = vadd.xlane.f32.xlu0 %v2101_v6  ;;  %2099 = vadd.xlane.f32.xlu1 %v2098_v15  ;;  %v2332_v6 = vld [vmem:[#allocation2 + $0x54] sm:$0xff] }
0x1234   :  { %v2333_v15 = vld [vmem:[#allocation2 + $0x94] sm:$0xff] }
0x1235   :  { %v5406_v31 = vpop.eup %5405  ;;  %v4503_v17 = vcombine.high %v2333_v15, %v2334_v7  ;;  %v4502_v19 = vcombine.low %v2333_v15, %v2334_v7 }
0x1236   :  { %v2104_v16 = vsel %vm2070_vm5, %v5406_v31, 0.0 }
0x1237   :  { %2105 = vadd.xlane.f32.xlu1 %v2104_v16 }
0x12bc   :  { %v2097_v18 = vpop.xlane.xlu0 %2096 }
0x12bd   :  { %5407 = vrcp.f32 %v2097_v18  ;;  %v2338_v18 = vld [vmem:[#allocation2 + $0x1d4] sm:$0xff] }
0x12c0   :  { %v2103_v4 = vpop.xlane.xlu0 %2102  ;;  %v2100_v30 = vpop.xlane.xlu1 %2099 }
0x12c1   :  { %5409 = vrcp.f32 %v2100_v30 }
0x12c2   :  { %5411 = vrcp.f32 %v2103_v4 }
0x12c4   :  { %v2106_v49 = vpop.xlane.xlu1 %2105 }
0x12c5   :  { %5413 = vrcp.f32 %v2106_v49  ;;  %v2339_v49 = vld [vmem:[#allocation2 + $0x214] sm:$0xff] }
0x12c7   :  { %v5408_v35 = vpop.eup %5407 }
0x12c8   :  { %v2111_v40 = vmul.f32 %v5408_v35, %v5400_v13  ;;  %v2340_v35 = vld [vmem:[#allocation2 + $0x254] sm:$0xff] }
0x12cb   :  { %v5410_v50 = vpop.eup %5409 }
0x12cc   :  { %v5412_v36 = vpop.eup %5411  ;;  %v2112_v53 = vmul.f32 %v5410_v50, %v5404_v51  ;;  %v2341_v50 = vld [vmem:[#allocation2 + $0x294] sm:$0xff] }
0x12cd   :  { %v2113_v34 = vmul.f32 %v5412_v36, %v5402_v39  ;;  %v2331_v39 = vld [vmem:[#allocation2 + $0x14] sm:$0xff]  ;;  %v4508_v36 = vcombine.low %v2339_v49, %v2340_v35 }
0x12ce   :  { %v2115_v24 = vpack.c.bf16 %v2112_v53, %v2111_v40  ;;  %v4501_v16 = vcombine.high %v2331_v39, %v2332_v6  ;;  %v4509_v40 = vcombine.high %v2339_v49, %v2340_v35  ;;  %v2342_v53 = vld [vmem:[#allocation2 + $0x2d4] sm:$0xff] }
0x12cf   :  { %v5414_v58 = vpop.eup %5413  ;;  %v5365_v49 = vld [vmem:[#allocation4 + $0xb0] ss:$8 sps:$4 sm:$0xff]  }
0x12d0   :  { %v2114_v60 = vmul.f32 %v5414_v58, %v5406_v31  ;;  %5149 = vmatprep.mubr.msk.bf16.mxu0 %vm2070_vm5, %v2115_v24  ;;  %v4500_v31 = vcombine.low %v2331_v39, %v2332_v6  ;;  %2442 = vmatprep.subr.bf16.mxu0 %v4501_v16  ;;  %v4511_v58 = vcombine.high %v2341_v50, %v2342_v53  ;;  %v2343_v24 = vld [vmem:[#allocation2 + $0x314] sm:$0xff] }
0x12d1   :  { %v5366_v35 = vld [vmem:[#allocation4 + $0x30] ss:$8 sps:$4 sm:$0xff]  }
0x12d2   :  { %v2116_v63 = vpack.c.bf16 %v2114_v60, %v2113_v34  ;;  %v2344_v34 = vld [vmem:[#allocation2 + $0x354] sm:$0xff]  ;;  %v4510_v60 = vcombine.low %v2341_v50, %v2342_v53  ;;  %v5367_v50 = vld [vmem:[#allocation4 + $0xc0] ss:$8 sps:$4 sm:$0xff]  }
0x12d3   :  { %v4512_v8 = vcombine.low %v2343_v24, %v2344_v34  ;;  %v5370_v53 = vld [vmem:[#allocation4 + $0x50] ss:$8 sps:$4 sm:$0xff]  }
0x12d4   :  { %5150 = vmatmul.mubr.msk.bf16.vlgmr.msra.gmra.mrb[36].mxu0 %vm2070_vm5, %v2116_v63  ;;  %v4513_v63 = vcombine.high %v2343_v24, %v2344_v34  ;;  %v5372_v24 = vld [vmem:[#allocation4 + $0x60] ss:$8 sps:$4 sm:$0xff]   ;;  %v5373_v34 = vld [vmem:[#allocation4 + $0xf0] ss:$8 sps:$4 sm:$0xff]  }
0x12d5   :  { %2474 = vmatprep.mubr.bf16.mxu0 %v5578_v29  ;;  %2443 = vmatpush1.bf16.msra.mxu0 %v4500_v31 }
0x12d6   :  { %2444 = vmatprep.subr.bf16.mxu0 %v4503_v17 }
0x12d9   :  { %2445 = vmatpush1.bf16.msra.mxu0 %v4502_v19 }
0x12da   :  { %2446 = vmatprep.subr.bf16.mxu0 %v4505_v21 }
0x12dd   :  { %2447 = vmatpush1.bf16.msra.mxu0 %v4504_v62  ;;  %v2298_v62 = vld [vmem:[%s6963_s1 + $0x5] ss:$0 sm:$0xff] }
0x13a7   :  { %v5151_v9 = vpop.f32.mrb[36].mxu0 }
0x13a8   :  { %v2159_v44 = vpop.f32.mrb[37].mxu0 }
0x13a9   :  { %v5152_v46 = vpop.f32.mrb[38].mxu0 }
0x13aa   :  { %v2191_v13 = vpack.c.bf16 %v5152_v46, %v5151_v9  ;;  %v2162_v42 = vpop.f32.mrb[39].mxu0  ;;  %v4515_v9 = vcombine.high %v2345_v1, %v2346_v3 }
0x13ab   :  { %v2190_v51 = vpack.c.bf16 %v2162_v42, %v2159_v44  ;;  %v4514_v44 = vcombine.low %v2345_v1, %v2346_v3 }
0x13ad   :  { %5169 = vmatprep.mubr.bf16.mxu1 %v2190_v51 }
0x13ae   :  { %5170 = vmatmul.mubr.bf16.vlgmr.msra.gmra.mrb[28].mxu1 %v2191_v13 }
0x1481   :  { %v5171_v55 = vpop.f32.mrb[28].mxu1 }
0x1482   :  { %v2274_v11 = vpop.f32.mrb[29].mxu1  ;;  %v2291_v14 = vadd.f32 %v5171_v55, %v6179_v61 }
0x1483   :  { %v2289_v22 = vadd.f32 %v2274_v11, %v6171_v37  ;;  %v5172_v0 = vpop.f32.mrb[30].mxu1 }
0x1484   :  { %v2277_v2 = vpop.f32.mrb[31].mxu1  ;;  %v2292_v52 = vadd.f32 %v5172_v0, %v6181_v43  ;;  %v6243_v45 = vadd.f32 %v2293_v27, %v2291_v14  ;;  %v2337_v43 = vld [vmem:[#allocation2 + $0x194] sm:$0xff] }
0x1485   :  { %v6239_v56 = vadd.f32 %v2293_v27, %v2289_v22  ;;  %v2290_v26 = vadd.f32 %v2277_v2, %v6173_v47  ;;  %v4506_v4 = vcombine.low %v2337_v43, %v2338_v18  ;;  %v4507_v30 = vcombine.high %v2337_v43, %v2338_v18  ;;  %v5361_v43 = vld [vmem:[#allocation4 + $0x90] ss:$8 sps:$4 sm:$0xff]  }
0x1486   :  { %v6249_v32 = vadd.f32 %v2293_v27, %v2292_v52  ;;  %v2301_v61 = vmul.f32 %v6243_v45, %v6243_v45  ;;  %v5362_v18 = vld [vmem:[#allocation4 + $0x10] ss:$8 sps:$4 sm:$0xff]  }
0x1487   :  { %v6245_v10 = vadd.f32 %v2293_v27, %v2290_v26  ;;  %v2299_v48 = vmul.f32 %v6239_v56, %v6239_v56  ;;  %2448 = vmatprep.subr.bf16.mxu0 %v4507_v30  ;;  %v5364_v30 = vld [vmem:[#allocation4 + $0x20] ss:$8 sps:$4 sm:$0xff]  }
0x1488   :  { %v2302_v47 = vmul.f32 %v6249_v32, %v6249_v32  ;;  %2449 = vmatpush1.bf16.msra.mxu0 %v4506_v4  ;;  %v5363_v4 = vld [vmem:[#allocation4 + $0xa0] ss:$8 sps:$4 sm:$0xff]  }
0x1489   :  { %2303 = vadd.xlane.f32.xlu0 %v2299_v48  ;;  %v2300_v37 = vmul.f32 %v6245_v10, %v6245_v10  ;;  %2450 = vmatprep.subr.bf16.mxu0 %v4509_v40  ;;  %v5369_v40 = vld [vmem:[#allocation4 + $0xd0] ss:$8 sps:$4 sm:$0xff]  }
0x148b   :  { %2305 = vadd.xlane.f32.xlu1 %v2300_v37 }
0x148c   :  { %2451 = vmatpush1.bf16.msra.mxu0 %v4508_v36  ;;  %v5368_v36 = vld [vmem:[#allocation4 + $0x40] ss:$8 sps:$4 sm:$0xff]  }
0x148d   :  { %2307 = vadd.xlane.f32.xlu0 %v2301_v61  ;;  %2452 = vmatprep.subr.bf16.mxu0 %v4511_v58  ;;  %v5359_v61 = vld [vmem:[#allocation4 + $0x80] ss:$8 sps:$4 sm:$0xff]  }
0x148e   :  { %4833 = vmatprep.subr.bf16.mxu1 %v5359_v61  ;;  %v5371_v58 = vld [vmem:[#allocation4 + $0xe0] ss:$8 sps:$4 sm:$0xff]  }
0x148f   :  { %2309 = vadd.xlane.f32.xlu1 %v2302_v47  ;;  %v5360_v47 = vld [vmem:[#allocation4] ss:$8 sps:$4 sm:$0xff]  }
0x1490   :  { %2453 = vmatpush1.bf16.msra.mxu0 %v4510_v60  ;;  %4834 = vmatpush3.bf16.msra.mxu1 %v5360_v47  ;;  %v5374_v60 = vld [vmem:[#allocation4 + $0x70] ss:$8 sps:$4 sm:$0xff]  }
0x1491   :  { %2454 = vmatprep.subr.bf16.mxu0 %v4513_v63  ;;  %4835 = vmatprep.subr.bf16.mxu1 %v5361_v43  ;;  %v4499_v63 = vld [vmem:[%s6963_s1 + $0x6] ss:$8 sm:$0x3] }
0x1492   :  { %v2355_v1 = vrot.slane %v4499_v63, %v6200_v25  ;;  %v2359_v3 = vrot.slane %v4499_v63, %v6206_v23 }
0x1494   :  { %2455 = vmatpush1.bf16.msra.mxu0 %v4512_v8  ;;  %4836 = vmatpush3.bf16.msra.mxu1 %v5362_v18 }
0x1495   :  { %2456 = vmatprep.subr.bf16.mxu0 %v4515_v9  ;;  %4837 = vmatprep.subr.bf16.mxu1 %v5363_v4 }
0x1498   :  { %2457 = vmatpush1.bf16.msra.mxu0 %v4514_v44  ;;  %4838 = vmatpush3.bf16.msra.mxu1 %v5364_v30 }
0x1499   :  { %4839 = vmatprep.subr.bf16.mxu1 %v5365_v49 }
0x149c   :  { %4840 = vmatpush3.bf16.msra.mxu1 %v5366_v35 }
0x149d   :  { %4841 = vmatprep.subr.bf16.mxu1 %v5367_v50 }
0x14a0   :  { %4842 = vmatpush3.bf16.msra.mxu1 %v5368_v36 }
0x14a1   :  { %4843 = vmatprep.subr.bf16.mxu1 %v5369_v40 }
0x14a4   :  { %4844 = vmatpush3.bf16.msra.mxu1 %v5370_v53 }
0x14a5   :  { %4845 = vmatprep.subr.bf16.mxu1 %v5371_v58 }
0x14a8   :  { %4846 = vmatpush3.bf16.msra.mxu1 %v5372_v24 }
0x14a9   :  { %4847 = vmatprep.subr.bf16.mxu1 %v5373_v34 }
0x14ac   :  { %4848 = vmatpush3.bf16.msra.mxu1 %v5374_v60 }
0x1516   :  { %v2304_v46 = vpop.xlane.xlu0 %2303 }
0x1517   :  { %v2311_v13 = vmul.f32 0.0078125, %v2304_v46 }
0x1518   :  { %v2306_v42 = vpop.xlane.xlu1 %2305 }
0x1519   :  { %v2315_v51 = vadd.f32 1e-06, %v2311_v13  ;;  %v2312_v39 = vmul.f32 0.0078125, %v2306_v42 }
0x151a   :  { %v2308_v6 = vpop.xlane.xlu0 %2307 }
0x151b   :  { %5415 = vrsqrt.f32 %v2315_v51  ;;  %v2316_v15 = vadd.f32 1e-06, %v2312_v39  ;;  %v2313_v31 = vmul.f32 0.0078125, %v2308_v6 }
0x151c   :  { %v2310_v16 = vpop.xlane.xlu1 %2309 }
0x151d   :  { %5417 = vrsqrt.f32 %v2316_v15  ;;  %v2317_v7 = vadd.f32 1e-06, %v2313_v31  ;;  %v2314_v17 = vmul.f32 0.0078125, %v2310_v16 }
0x151f   :  { %v2318_v12 = vadd.f32 1e-06, %v2314_v17  ;;  %5419 = vrsqrt.f32 %v2317_v7 }
0x1521   :  { %5421 = vrsqrt.f32 %v2318_v12 }
0x1525   :  { %v5416_v38 = vpop.eup %5415 }
0x1526   :  { %v2323_v19 = vmul.f32 %v5416_v38, %v6239_v56 }
0x1527   :  { %v5418_v21 = vpop.eup %5417 }
0x1528   :  { %v2324_v55 = vmul.f32 %v5418_v21, %v6245_v10  ;;  %v2327_v11 = vmul.f32 %v2323_v19, %v2298_v62 }
0x1529   :  { %v5420_v27 = vpop.eup %5419 }
0x152a   :  { %v2328_v14 = vmul.f32 %v2324_v55, %v2298_v62  ;;  %v2325_v52 = vmul.f32 %v5420_v27, %v6243_v45 }
0x152b   :  { %v5422_v22 = vpop.eup %5421 }
0x152c   :  { %v2347_v0 = vpack.c.bf16 %v2328_v14, %v2327_v11  ;;  %v2326_v2 = vmul.f32 %v5422_v22, %v6249_v32  ;;  %v2329_v48 = vmul.f32 %v2325_v52, %v2298_v62 }
0x152e   :  { %2475 = vmatmul.mubr.bf16.vlgmr.msra.gmra.mrb[40].mxu0 %v2347_v0  ;;  %v2330_v26 = vmul.f32 %v2326_v2, %v2298_v62 }
0x152f   :  { %2484 = vmatprep.mubr.bf16.mxu0 %v5578_v29 }
0x1530   :  { %v2348_v37 = vpack.c.bf16 %v2330_v26, %v2329_v48 }
0x1536   :  { %2485 = vmatmul.mubr.bf16.gmra.mrb[44].mxu0 %v2348_v37 }
0x1537   :  { %2917 = vmatprep.mubr.bf16.mxu0 %v5578_v29 }
0x1601   :  { %v2476_v8 = vpop.f32.mrb[40].mxu0 }
0x1602   :  { %v2477_v9 = vadd.f32 %v2476_v8, %v2355_v1  ;;  %v2478_v44 = vpop.f32.mrb[41].mxu0 }
0x1603   :  { %v2479_v46 = vadd.f32 %v2478_v44, %v2359_v3  ;;  %v2480_v13 = vpop.f32.mrb[42].mxu0 }
0x1604   :  { %v4516_v42 = vmul.f32 -1.442695, %v2477_v9  ;;  %v2481_v51 = vadd.f32 %v2480_v13, %v2355_v1  ;;  %v2482_v39 = vpop.f32.mrb[43].mxu0 }
0x1605   :  { %v4517_v6 = vmul.f32 -1.442695, %v2479_v46  ;;  %v2483_v15 = vadd.f32 %v2482_v39, %v2359_v3 }
0x1606   :  { %5423 = vpow2.f32 %v4516_v42  ;;  %v4518_v31 = vmul.f32 -1.442695, %v2481_v51 }
0x1607   :  { %5425 = vpow2.f32 %v4517_v6  ;;  %v4519_v16 = vmul.f32 -1.442695, %v2483_v15 }
0x1608   :  { %5427 = vpow2.f32 %v4518_v31 }
0x1609   :  { %5429 = vpow2.f32 %v4519_v16  ;;  %v2486_v7 = vpop.f32.mrb[44].mxu0 }
0x160a   :  { %v2487_v17 = vadd.f32 %v2486_v7, %v2355_v1  ;;  %v2488_v12 = vpop.f32.mrb[45].mxu0 }
0x160b   :  { %v2489_v38 = vadd.f32 %v2488_v12, %v2359_v3  ;;  %v2490_v19 = vpop.f32.mrb[46].mxu0 }
0x160c   :  { %v4520_v21 = vmul.f32 -1.442695, %v2487_v17  ;;  %v2491_v62 = vadd.f32 %v2490_v19, %v2355_v1  ;;  %v2492_v55 = vpop.f32.mrb[47].mxu0 }
0x160d   :  { %v4521_v27 = vmul.f32 -1.442695, %v2489_v38  ;;  %v2493_v11 = vadd.f32 %v2492_v55, %v2359_v3  ;;  %v2777_v55 = vld [vmem:[#allocation2 + $0xdc] sm:$0xff] }
0x160e   :  { %5431 = vpow2.f32 %v4520_v21  ;;  %v4522_v14 = vmul.f32 -1.442695, %v2491_v62 }
0x160f   :  { %5433 = vpow2.f32 %v4521_v27  ;;  %v4523_v22 = vmul.f32 -1.442695, %v2493_v11 }
0x1610   :  { %v5424_v0 = vpop.eup %5423  ;;  %5435 = vpow2.f32 %v4522_v14  ;;  %v2778_v14 = vld [vmem:[#allocation2 + $0x11c] sm:$0xff] }
0x1611   :  { %v5426_v2 = vpop.eup %5425  ;;  %v2519_v52 = vadd.f32 1.0, %v5424_v0  ;;  %5437 = vpow2.f32 %v4523_v22  ;;  %v2779_v22 = vld [vmem:[#allocation2 + $0x15c] sm:$0xff] }
0x1612   :  { %v5428_v26 = vpop.eup %5427  ;;  %v2520_v48 = vadd.f32 1.0, %v5426_v2 }
0x1613   :  { %v5430_v37 = vpop.eup %5429  ;;  %5439 = vrcp.f32 %v2519_v52  ;;  %v2521_v61 = vadd.f32 1.0, %v5428_v26  ;;  %v2736_v26 = vld [vmem:[%s6963_s1 + $0x7] ss:$0 sm:$0xff] }
0x1614   :  { %5441 = vrcp.f32 %v2520_v48  ;;  %v2522_v47 = vadd.f32 1.0, %v5430_v37 }
0x1615   :  { %5443 = vrcp.f32 %v2521_v61 }
0x1616   :  { %5445 = vrcp.f32 %v2522_v47 }
0x1618   :  { %v5432_v43 = vpop.eup %5431 }
0x1619   :  { %v5434_v18 = vpop.eup %5433  ;;  %v2523_v4 = vadd.f32 1.0, %v5432_v43 }
0x161a   :  { %v5436_v30 = vpop.eup %5435  ;;  %v2524_v49 = vadd.f32 1.0, %v5434_v18 }
0x161b   :  { %v5438_v35 = vpop.eup %5437  ;;  %5447 = vrcp.f32 %v2523_v4  ;;  %v2525_v50 = vadd.f32 1.0, %v5436_v30 }
0x161c   :  { %5449 = vrcp.f32 %v2524_v49  ;;  %v2526_v36 = vadd.f32 1.0, %v5438_v35 }
0x161d   :  { %v5440_v40 = vpop.eup %5439  ;;  %5451 = vrcp.f32 %v2525_v50 }
0x161e   :  { %v5442_v53 = vpop.eup %5441  ;;  %5453 = vrcp.f32 %v2526_v36  ;;  %v2543_v34 = vmul.f32 %v5440_v40, %v2477_v9  ;;  %v2774_v9 = vld [vmem:[#allocation2 + $0x1c] sm:$0xff] }
0x161f   :  { %v5444_v58 = vpop.eup %5443  ;;  %v2544_v63 = vmul.f32 %v5442_v53, %v2479_v46  ;;  %v2776_v46 = vld [vmem:[#allocation2 + $0x9c] sm:$0xff] }
0x1620   :  { %v5446_v24 = vpop.eup %5445  ;;  %v2545_v60 = vmul.f32 %v5444_v58, %v2481_v51  ;;  %v2775_v51 = vld [vmem:[#allocation2 + $0x5c] sm:$0xff]  ;;  %v4544_v27 = vcombine.high %v2776_v46, %v2777_v55  ;;  %v4543_v0 = vcombine.low %v2776_v46, %v2777_v55 }
0x1621   :  { %v2546_v1 = vmul.f32 %v5446_v24, %v2483_v15  ;;  %v4541_v15 = vcombine.low %v2774_v9, %v2775_v51  ;;  %v4542_v21 = vcombine.high %v2774_v9, %v2775_v51  ;;  %v2789_v9 = vld [vmem:[#allocation2 + $0x3dc] sm:$0xff] }
0x1622   :  { %v2583_v3 = vpack.c.bf16 %v2545_v60, %v2543_v34 }
0x1623   :  { %v2584_v8 = vpack.c.bf16 %v2546_v1, %v2544_v63  ;;  %2885 = vmatprep.subr.bf16.mxu0 %v4542_v21  ;;  %v2780_v63 = vld [vmem:[#allocation2 + $0x19c] sm:$0xff] }
0x1624   :  { %2886 = vmatpush1.bf16.msra.mxu0 %v4541_v15  ;;  %v2781_v1 = vld [vmem:[#allocation2 + $0x1dc] sm:$0xff] }
0x1625   :  { %v5448_v44 = vpop.eup %5447  ;;  %2715 = vmatprep.mubr.bf16.mxu1 %v2584_v8  ;;  %2887 = vmatprep.subr.bf16.mxu0 %v4544_v27  ;;  %v2782_v8 = vld [vmem:[#allocation2 + $0x21c] sm:$0xff] }
0x1626   :  { %v5450_v13 = vpop.eup %5449  ;;  %2716 = vmatmul.mubr.bf16.vlgmr.msra.gmra.mrb[32].mxu1 %v2583_v3  ;;  %v2547_v6 = vmul.f32 %v5448_v44, %v2487_v17  ;;  %v4546_v17 = vcombine.high %v2778_v14, %v2779_v22  ;;  %v4548_v3 = vcombine.high %v2780_v63, %v2781_v1  ;;  %v2783_v44 = vld [vmem:[#allocation2 + $0x25c] sm:$0xff] }
0x1627   :  { %v5452_v42 = vpop.eup %5451  ;;  %v2548_v16 = vmul.f32 %v5450_v13, %v2489_v38  ;;  %v4545_v38 = vcombine.low %v2778_v14, %v2779_v22  ;;  %v4550_v13 = vcombine.high %v2782_v8, %v2783_v44 }
0x1628   :  { %v5454_v39 = vpop.eup %5453  ;;  %v2549_v31 = vmul.f32 %v5452_v42, %v2491_v62  ;;  %2888 = vmatpush1.bf16.msra.mxu0 %v4543_v0  ;;  %v2784_v42 = vld [vmem:[#allocation2 + $0x29c] sm:$0xff] }
0x1629   :  { %v2550_v7 = vmul.f32 %v5454_v39, %v2493_v11  ;;  %2889 = vmatprep.subr.bf16.mxu0 %v4546_v17  ;;  %v2785_v39 = vld [vmem:[#allocation2 + $0x2dc] sm:$0xff] }
0x162a   :  { %v2585_v12 = vpack.c.bf16 %v2549_v31, %v2547_v6  ;;  %v2786_v6 = vld [vmem:[#allocation2 + $0x31c] sm:$0xff]  ;;  %v4551_v31 = vcombine.low %v2784_v42, %v2785_v39 }
0x162b   :  { %v2586_v19 = vpack.c.bf16 %v2550_v7, %v2548_v16  ;;  %v4552_v16 = vcombine.high %v2784_v42, %v2785_v39  ;;  %v2787_v7 = vld [vmem:[#allocation2 + $0x35c] sm:$0xff] }
0x162c   :  { %2890 = vmatpush1.bf16.msra.mxu0 %v4545_v38  ;;  %v4553_v51 = vcombine.low %v2786_v6, %v2787_v7  ;;  %v5385_v42 = vld [vmem:[#allocation4 + $0xd4] ss:$8 sps:$4 sm:$0xff]  }
0x162d   :  { %2723 = vmatprep.mubr.bf16.mxu1 %v2586_v19  ;;  %2891 = vmatprep.subr.bf16.mxu0 %v4548_v3  ;;  %v2788_v19 = vld [vmem:[#allocation2 + $0x39c] sm:$0xff]  ;;  %v5379_v3 = vld [vmem:[#allocation4 + $0xa4] ss:$8 sps:$4 sm:$0xff]  }
0x162e   :  { %2724 = vmatmul.mubr.bf16.gmra.mrb[36].mxu1 %v2585_v12  ;;  %v4554_v12 = vcombine.high %v2786_v6, %v2787_v7  ;;  %v4556_v46 = vcombine.high %v2788_v19, %v2789_v9  ;;  %v4555_v15 = vcombine.low %v2788_v19, %v2789_v9  ;;  %v5386_v39 = vld [vmem:[#allocation4 + $0x54] ss:$8 sps:$4 sm:$0xff]   ;;  %v5387_v6 = vld [vmem:[#allocation4 + $0xe4] ss:$8 sps:$4 sm:$0xff]  }
0x162f   :  { %v5390_v7 = vld [vmem:[#allocation4 + $0x74] ss:$8 sps:$4 sm:$0xff]   ;;  %v3187_v19 = vld [vmem:[#allocation2 + $0x64] sm:$0xff]  ;;  %v6303_v9 = vld [vmem:[#allocation2 + $0x2c] sm:$0xff] }
0x16f9   :  { %v4849_v62 = vpop.f32.mrb[32].mxu1 }
0x16fa   :  { %v4850_v11 = vpop.f32.mrb[33].mxu1 }
0x16fb   :  { %v4851_v2 = vadd.f32 %v4850_v11, %v4849_v62  ;;  %v4852_v52 = vpop.f32.mrb[34].mxu1 }
0x16fc   :  { %v4853_v48 = vpop.f32.mrb[35].mxu1 }
0x16fd   :  { %v2732_v37 = vadd.f32 %v4851_v2, %v6239_v56  ;;  %v4854_v61 = vadd.f32 %v4853_v48, %v4852_v52 }
0x16ff   :  { %v6275_v47 = vadd.f32 %v2736_v26, %v2732_v37  ;;  %v2733_v43 = vadd.f32 %v4854_v61, %v6245_v10  ;;  %v2741_v61 = vld [vmem:[%s6963_s1 + $0x30] ss:$0 sm:$0xff] }
0x1701   :  { %v6278_v18 = vadd.f32 %v2736_v26, %v2733_v43  ;;  %v4855_v4 = vpop.f32.mrb[36].mxu1  ;;  %v2742_v30 = vmul.f32 %v6275_v47, %v6275_v47 }
0x1702   :  { %v4856_v49 = vpop.f32.mrb[37].mxu1 }
0x1703   :  { %v4857_v35 = vadd.f32 %v4856_v49, %v4855_v4  ;;  %2746 = vadd.xlane.f32.xlu0 %v2742_v30  ;;  %v4858_v50 = vpop.f32.mrb[38].mxu1  ;;  %v2743_v36 = vmul.f32 %v6278_v18, %v6278_v18 }
0x1704   :  { %v4859_v40 = vpop.f32.mrb[39].mxu1 }
0x1705   :  { %v2734_v56 = vadd.f32 %v4857_v35, %v6243_v45  ;;  %v4860_v53 = vadd.f32 %v4859_v40, %v4858_v50  ;;  %2748 = vadd.xlane.f32.xlu1 %v2743_v36  ;;  %v4547_v45 = vcombine.low %v2780_v63, %v2781_v1  ;;  %v5377_v63 = vld [vmem:[#allocation4 + $0x94] ss:$8 sps:$4 sm:$0xff]  }
0x1706   :  { %v5378_v1 = vld [vmem:[#allocation4 + $0x14] ss:$8 sps:$4 sm:$0xff]  }
0x1707   :  { %v6285_v58 = vadd.f32 %v2736_v26, %v2734_v56  ;;  %v2735_v10 = vadd.f32 %v4860_v53, %v6249_v32  ;;  %2892 = vmatpush1.bf16.msra.mxu0 %v4547_v45  ;;  %v4549_v32 = vcombine.low %v2782_v8, %v2783_v44  ;;  %v5380_v45 = vld [vmem:[#allocation4 + $0x24] ss:$8 sps:$4 sm:$0xff]   ;;  %v5381_v8 = vld [vmem:[#allocation4 + $0xb4] ss:$8 sps:$4 sm:$0xff]  }
0x1708   :  { %2893 = vmatprep.subr.bf16.mxu0 %v4550_v13  ;;  %v5382_v44 = vld [vmem:[#allocation4 + $0x34] ss:$8 sps:$4 sm:$0xff]   ;;  %v5383_v13 = vld [vmem:[#allocation4 + $0xc4] ss:$8 sps:$4 sm:$0xff]  }
0x1709   :  { %v6288_v24 = vadd.f32 %v2736_v26, %v2735_v10  ;;  %v2744_v34 = vmul.f32 %v6285_v58, %v6285_v58 }
0x170b   :  { %2750 = vadd.xlane.f32.xlu0 %v2744_v34  ;;  %v2745_v60 = vmul.f32 %v6288_v24, %v6288_v24  ;;  %2894 = vmatpush1.bf16.msra.mxu0 %v4549_v32  ;;  %v5375_v34 = vld [vmem:[#allocation4 + $0x84] ss:$8 sps:$4 sm:$0xff]  }
0x170c   :  { %2895 = vmatprep.subr.bf16.mxu0 %v4552_v16  ;;  %4861 = vmatprep.subr.bf16.mxu1 %v5375_v34  ;;  %v5384_v32 = vld [vmem:[#allocation4 + $0x44] ss:$8 sps:$4 sm:$0xff]   ;;  %v5389_v16 = vld [vmem:[#allocation4 + $0xf4] ss:$8 sps:$4 sm:$0xff]  }
0x170d   :  { %2752 = vadd.xlane.f32.xlu1 %v2745_v60  ;;  %v5376_v60 = vld [vmem:[#allocation4 + $0x4] ss:$8 sps:$4 sm:$0xff]  }
0x170e   :  { %4862 = vmatpush3.bf16.msra.mxu1 %v5376_v60 }
0x170f   :  { %2896 = vmatpush1.bf16.msra.mxu0 %v4551_v31  ;;  %4863 = vmatprep.subr.bf16.mxu1 %v5377_v63  ;;  %v5388_v31 = vld [vmem:[#allocation4 + $0x64] ss:$8 sps:$4 sm:$0xff]  }
0x1710   :  { %2897 = vmatprep.subr.bf16.mxu0 %v4554_v12  ;;  %v3184_v12 = vld [vmem:[#allocation2 + $0x24] sm:$0xff] }
0x1712   :  { %4864 = vmatpush3.bf16.msra.mxu1 %v5378_v1 }
0x1713   :  { %2898 = vmatpush1.bf16.msra.mxu0 %v4553_v51  ;;  %4865 = vmatprep.subr.bf16.mxu1 %v5379_v3  ;;  %v4583_v51 = vcombine.low %v3184_v12, %v3187_v19 }
0x1714   :  { %2899 = vmatprep.subr.bf16.mxu0 %v4556_v46  ;;  %v4584_v46 = vcombine.high %v3184_v12, %v3187_v19 }
0x1716   :  { %4866 = vmatpush3.bf16.msra.mxu1 %v5380_v45 }
0x1717   :  { %2900 = vmatpush1.bf16.msra.mxu0 %v4555_v15  ;;  %4867 = vmatprep.subr.bf16.mxu1 %v5381_v8  ;;  %v6305_v15 = vld [vmem:[#allocation2 + $0x6c] sm:$0xff] }
0x1718   :  { %3509 = vmatprep.subr.bf16.mxu0 %v4584_v46 }
0x171a   :  { %4868 = vmatpush3.bf16.msra.mxu1 %v5382_v44 }
0x171b   :  { %4869 = vmatprep.subr.bf16.mxu1 %v5383_v13 }
0x171e   :  { %4870 = vmatpush3.bf16.msra.mxu1 %v5384_v32 }
0x171f   :  { %4871 = vmatprep.subr.bf16.mxu1 %v5385_v42 }
0x1722   :  { %4872 = vmatpush3.bf16.msra.mxu1 %v5386_v39 }
0x1723   :  { %4873 = vmatprep.subr.bf16.mxu1 %v5387_v6 }
0x1726   :  { %4874 = vmatpush3.bf16.msra.mxu1 %v5388_v31 }
0x1727   :  { %4875 = vmatprep.subr.bf16.mxu1 %v5389_v16 }
0x172a   :  { %4876 = vmatpush3.bf16.msra.mxu1 %v5390_v7 }
0x1790   :  { %v2747_v21 = vpop.xlane.xlu0 %2746 }
0x1791   :  { %v2754_v55 = vmul.f32 0.0078125, %v2747_v21  ;;  %v3190_v21 = vld [vmem:[#allocation2 + $0xa4] sm:$0xff] }
0x1792   :  { %v2749_v27 = vpop.xlane.xlu1 %2748 }
0x1793   :  { %v2758_v14 = vadd.f32 1e-06, %v2754_v55  ;;  %v2755_v22 = vmul.f32 0.0078125, %v2749_v27  ;;  %v3193_v55 = vld [vmem:[#allocation2 + $0xe4] sm:$0xff]  ;;  %v4585_v27 = vcombine.low %v6303_v9, %v6305_v15 }
0x1795   :  { %5455 = vrsqrt.f32 %v2758_v14  ;;  %v2759_v0 = vadd.f32 1e-06, %v2755_v22  ;;  %v4586_v14 = vcombine.high %v6303_v9, %v6305_v15  ;;  %v4590_v22 = vcombine.high %v3190_v21, %v3193_v55  ;;  %v3209_v9 = vld [vmem:[#allocation2 + $0x22c] sm:$0xff] }
0x1796   :  { %v3212_v15 = vld [vmem:[#allocation2 + $0x26c] sm:$0xff] }
0x1797   :  { %5457 = vrsqrt.f32 %v2759_v0  ;;  %v3196_v0 = vld [vmem:[#allocation2 + $0x124] sm:$0xff]  ;;  %3562 = vmatprep.subr.bf16.mxu1 %v4586_v14 }
0x1798   :  { %v2751_v17 = vpop.xlane.xlu0 %2750 }
0x1799   :  { %v2756_v38 = vmul.f32 0.0078125, %v2751_v17  ;;  %v3199_v17 = vld [vmem:[#allocation2 + $0x164] sm:$0xff] }
0x179a   :  { %v2753_v62 = vpop.xlane.xlu1 %2752 }
0x179b   :  { %v2760_v11 = vadd.f32 1e-06, %v2756_v38  ;;  %v2757_v2 = vmul.f32 0.0078125, %v2753_v62  ;;  %v4589_v38 = vcombine.low %v3190_v21, %v3193_v55  ;;  %v4596_v62 = vcombine.high %v3196_v0, %v3199_v17 }
0x179d   :  { %5459 = vrsqrt.f32 %v2760_v11  ;;  %v2761_v52 = vadd.f32 1e-06, %v2757_v2  ;;  %v3202_v11 = vld [vmem:[#allocation2 + $0x1a4] sm:$0xff] }
0x179e   :  { %v3205_v2 = vld [vmem:[#allocation2 + $0x1e4] sm:$0xff] }
0x179f   :  { %v5456_v26 = vpop.eup %5455  ;;  %5461 = vrsqrt.f32 %v2761_v52  ;;  %v4595_v52 = vcombine.low %v3196_v0, %v3199_v17 }
0x17a0   :  { %v2766_v48 = vmul.f32 %v5456_v26, %v6275_v47  ;;  %v4602_v26 = vcombine.high %v3202_v11, %v3205_v2 }
0x17a1   :  { %v5458_v37 = vpop.eup %5457 }
0x17a2   :  { %v2767_v43 = vmul.f32 %v5458_v37, %v6278_v18  ;;  %v2770_v4 = vmul.f32 %v2766_v48, %v2741_v61  ;;  %v3208_v48 = vld [vmem:[#allocation2 + $0x224] sm:$0xff] }
0x17a3   :  { %v3211_v37 = vld [vmem:[#allocation2 + $0x264] sm:$0xff] }
0x17a4   :  { %v2771_v30 = vmul.f32 %v2767_v43, %v2741_v61  ;;  %v4608_v43 = vcombine.high %v3208_v48, %v3211_v37 }
0x17a6   :  { %v2790_v49 = vpack.c.bf16 %v2771_v30, %v2770_v4  ;;  %v3214_v4 = vld [vmem:[#allocation2 + $0x2a4] sm:$0xff] }
0x17a7   :  { %v5460_v35 = vpop.eup %5459  ;;  %v3217_v30 = vld [vmem:[#allocation2 + $0x2e4] sm:$0xff] }
0x17a8   :  { %2918 = vmatmul.mubr.bf16.vlgmr.msra.gmra.mrb[48].mxu0 %v2790_v49  ;;  %v2768_v50 = vmul.f32 %v5460_v35, %v6285_v58  ;;  %v4607_v49 = vcombine.low %v3208_v48, %v3211_v37  ;;  %v4614_v35 = vcombine.high %v3214_v4, %v3217_v30 }
0x17a9   :  { %v5462_v36 = vpop.eup %5461  ;;  %2927 = vmatprep.mubr.bf16.mxu0 %v5578_v29  ;;  %3510 = vmatpush1.bf16.msra.mxu0 %v4583_v51 }
0x17aa   :  { %v2769_v40 = vmul.f32 %v5462_v36, %v6288_v24  ;;  %v2772_v56 = vmul.f32 %v2768_v50, %v2741_v61  ;;  %3511 = vmatprep.subr.bf16.mxu0 %v4590_v22  ;;  %v4613_v50 = vcombine.low %v3214_v4, %v3217_v30  ;;  %v4540_v36 = vld [vmem:[%s6963_s1 + $0x31] ss:$8 sm:$0x3] }
0x17ac   :  { %v2773_v53 = vmul.f32 %v2769_v40, %v2741_v61  ;;  %v4601_v61 = vcombine.low %v3202_v11, %v3205_v2  ;;  %v2798_v40 = vrot.slane %v4540_v36, %v6200_v25 }
0x17ad   :  { %3512 = vmatpush1.bf16.msra.mxu0 %v4589_v38 }
0x17ae   :  { %v2791_v10 = vpack.c.bf16 %v2773_v53, %v2772_v56  ;;  %3513 = vmatprep.subr.bf16.mxu0 %v4596_v62  ;;  %v2802_v56 = vrot.slane %v4540_v36, %v6206_v23 }
0x17b0   :  { %2928 = vmatmul.mubr.bf16.gmra.mrb[52].mxu0 %v2791_v10 }
0x17b1   :  { %3541 = vmatprep.mubr.bf16.mxu0 %v5578_v29  ;;  %3514 = vmatpush1.bf16.msra.mxu0 %v4595_v52 }
0x17b2   :  { %3515 = vmatprep.subr.bf16.mxu0 %v4602_v26 }
0x17b5   :  { %3516 = vmatpush1.bf16.msra.mxu0 %v4601_v61 }
0x17b6   :  { %3517 = vmatprep.subr.bf16.mxu0 %v4608_v43 }
0x17b9   :  { %3518 = vmatpush1.bf16.msra.mxu0 %v4607_v49 }
0x17ba   :  { %3519 = vmatprep.subr.bf16.mxu0 %v4614_v35 }
0x17bd   :  { %3520 = vmatpush1.bf16.msra.mxu0 %v4613_v50 }
0x187b   :  { %v2919_v53 = vpop.f32.mrb[48].mxu0 }
0x187c   :  { %v2920_v10 = vadd.f32 %v2919_v53, %v2798_v40  ;;  %v2921_v34 = vpop.f32.mrb[49].mxu0 }
0x187d   :  { %v2922_v60 = vadd.f32 %v2921_v34, %v2802_v56  ;;  %v2923_v63 = vpop.f32.mrb[50].mxu0 }
0x187e   :  { %v4557_v1 = vmul.f32 -1.442695, %v2920_v10  ;;  %v2924_v3 = vadd.f32 %v2923_v63, %v2798_v40  ;;  %v2925_v45 = vpop.f32.mrb[51].mxu0  ;;  %v3191_v63 = vld [vmem:[#allocation2 + $0xac] sm:$0xff] }
0x187f   :  { %v4558_v8 = vmul.f32 -1.442695, %v2922_v60  ;;  %v2926_v44 = vadd.f32 %v2925_v45, %v2802_v56 }
0x1880   :  { %5463 = vpow2.f32 %v4557_v1  ;;  %v4559_v13 = vmul.f32 -1.442695, %v2924_v3  ;;  %v3194_v1 = vld [vmem:[#allocation2 + $0xec] sm:$0xff] }
0x1881   :  { %5465 = vpow2.f32 %v4558_v8  ;;  %v4560_v32 = vmul.f32 -1.442695, %v2926_v44 }
0x1882   :  { %5467 = vpow2.f32 %v4559_v13  ;;  %v4592_v13 = vcombine.high %v3191_v63, %v3194_v1 }
0x1883   :  { %5469 = vpow2.f32 %v4560_v32  ;;  %v2929_v42 = vpop.f32.mrb[52].mxu0 }
0x1884   :  { %v2930_v39 = vadd.f32 %v2929_v42, %v2798_v40  ;;  %v2931_v6 = vpop.f32.mrb[53].mxu0  ;;  %v3197_v42 = vld [vmem:[#allocation2 + $0x12c] sm:$0xff] }
0x1885   :  { %v6316_v31 = vadd.f32 %v2931_v6, %v2802_v56  ;;  %v2933_v16 = vpop.f32.mrb[54].mxu0  ;;  %v3200_v6 = vld [vmem:[#allocation2 + $0x16c] sm:$0xff] }
0x1886   :  { %v4561_v7 = vmul.f32 -1.442695, %v2930_v39  ;;  %v2934_v12 = vadd.f32 %v2933_v16, %v2798_v40  ;;  %v2935_v19 = vpop.f32.mrb[55].mxu0 }
0x1887   :  { %v4562_v51 = vmul.f32 -1.442695, %v6316_v31  ;;  %v2936_v46 = vadd.f32 %v2935_v19, %v2802_v56  ;;  %v4598_v19 = vcombine.high %v3197_v42, %v3200_v6 }
0x1888   :  { %5471 = vpow2.f32 %v4561_v7  ;;  %v4563_v21 = vmul.f32 -1.442695, %v2934_v12 }
0x1889   :  { %5473 = vpow2.f32 %v4562_v51  ;;  %v4564_v55 = vmul.f32 -1.442695, %v2936_v46 }
0x188a   :  { %v5464_v14 = vpop.eup %5463  ;;  %5475 = vpow2.f32 %v4563_v21 }
0x188b   :  { %v5466_v22 = vpop.eup %5465  ;;  %v2962_v0 = vadd.f32 1.0, %v5464_v14  ;;  %5477 = vpow2.f32 %v4564_v55  ;;  %v3203_v55 = vld [vmem:[#allocation2 + $0x1ac] sm:$0xff] }
0x188c   :  { %v5468_v17 = vpop.eup %5467  ;;  %v2963_v38 = vadd.f32 1.0, %v5466_v22  ;;  %v3206_v14 = vld [vmem:[#allocation2 + $0x1ec] sm:$0xff] }
0x188d   :  { %v5470_v62 = vpop.eup %5469  ;;  %5479 = vrcp.f32 %v2962_v0  ;;  %v2964_v11 = vadd.f32 1.0, %v5468_v17  ;;  %v4597_v17 = vcombine.low %v3197_v42, %v3200_v6 }
0x188e   :  { %5481 = vrcp.f32 %v2963_v38  ;;  %v2965_v2 = vadd.f32 1.0, %v5470_v62  ;;  %v4604_v38 = vcombine.high %v3203_v55, %v3206_v14 }
0x188f   :  { %5483 = vrcp.f32 %v2964_v11 }
0x1890   :  { %5485 = vrcp.f32 %v2965_v2  ;;  %v3220_v2 = vld [vmem:[#allocation2 + $0x324] sm:$0xff] }
0x1892   :  { %v5472_v52 = vpop.eup %5471 }
0x1893   :  { %v5474_v26 = vpop.eup %5473  ;;  %v2966_v48 = vadd.f32 1.0, %v5472_v52  ;;  %v3223_v52 = vld [vmem:[#allocation2 + $0x364] sm:$0xff] }
0x1894   :  { %v5476_v37 = vpop.eup %5475  ;;  %v2967_v61 = vadd.f32 1.0, %v5474_v26  ;;  %v4619_v26 = vcombine.low %v3220_v2, %v3223_v52 }
0x1895   :  { %v5478_v43 = vpop.eup %5477  ;;  %5487 = vrcp.f32 %v2966_v48  ;;  %v2968_v4 = vadd.f32 1.0, %v5476_v37  ;;  %v4620_v48 = vcombine.high %v3220_v2, %v3223_v52  ;;  %v3221_v37 = vld [vmem:[#allocation2 + $0x32c] sm:$0xff] }
0x1896   :  { %5489 = vrcp.f32 %v2967_v61  ;;  %v2969_v30 = vadd.f32 1.0, %v5478_v43  ;;  %v3224_v61 = vld [vmem:[#allocation2 + $0x36c] sm:$0xff]  ;;  %v3226_v43 = vld [vmem:[#allocation2 + $0x3a4] sm:$0xff] }
0x1897   :  { %v5480_v49 = vpop.eup %5479  ;;  %5491 = vrcp.f32 %v2968_v4  ;;  %v4621_v4 = vcombine.low %v3221_v37, %v3224_v61  ;;  %3521 = vmatprep.subr.bf16.mxu0 %v4620_v48  ;;  %v3213_v48 = vld [vmem:[#allocation2 + $0x274] sm:$0xff] }
0x1898   :  { %v5482_v35 = vpop.eup %5481  ;;  %5493 = vrcp.f32 %v2969_v30  ;;  %v2986_v40 = vmul.f32 %v5480_v49, %v2920_v10  ;;  %v4591_v10 = vcombine.low %v3191_v63, %v3194_v1  ;;  %v4622_v30 = vcombine.high %v3221_v37, %v3224_v61  ;;  %v3229_v49 = vld [vmem:[#allocation2 + $0x3e4] sm:$0xff]  ;;  %3522 = vmatpush1.bf16.msra.mxu0 %v4619_v26  ;;  %v3189_v63 = vld [vmem:[#allocation2 + $0x74] sm:$0xff] }
0x1899   :  { %v5484_v50 = vpop.eup %5483  ;;  %v2987_v53 = vmul.f32 %v5482_v35, %v2922_v60  ;;  %v3227_v35 = vld [vmem:[#allocation2 + $0x3ac] sm:$0xff]  ;;  %v3210_v26 = vld [vmem:[#allocation2 + $0x234] sm:$0xff] }
0x189a   :  { %v5486_v36 = vpop.eup %5485  ;;  %v2988_v56 = vmul.f32 %v5484_v50, %v2924_v3  ;;  %v3230_v50 = vld [vmem:[#allocation2 + $0x3ec] sm:$0xff]  ;;  %v3216_v61 = vld [vmem:[#allocation2 + $0x2b4] sm:$0xff] }
0x189b   :  { %v2989_v34 = vmul.f32 %v5486_v36, %v2926_v44  ;;  %v4626_v36 = vcombine.high %v3226_v43, %v3229_v49 }
0x189c   :  { %v3026_v45 = vpack.c.bf16 %v2988_v56, %v2986_v40  ;;  %v4628_v40 = vcombine.high %v3227_v35, %v3230_v50  ;;  %v4625_v56 = vcombine.low %v3226_v43, %v3229_v49  ;;  %v3219_v43 = vld [vmem:[#allocation2 + $0x2f4] sm:$0xff] }
0x189d   :  { %v3027_v8 = vpack.c.bf16 %v2989_v34, %v2987_v53  ;;  %3523 = vmatprep.subr.bf16.mxu0 %v4626_v36  ;;  %v4627_v53 = vcombine.low %v3227_v35, %v3230_v50  ;;  %v3186_v34 = vld [vmem:[#allocation2 + $0x34] sm:$0xff]  ;;  %v4617_v50 = vcombine.low %v3216_v61, %v3219_v43 }
0x189e   :  { %3524 = vmatpush1.bf16.msra.mxu0 %v4625_v56  ;;  %v4587_v1 = vcombine.low %v3186_v34, %v3189_v63  ;;  %v3222_v49 = vld [vmem:[#allocation2 + $0x334] sm:$0xff] }
0x189f   :  { %v5488_v32 = vpop.eup %5487  ;;  %3158 = vmatprep.mubr.bf16.mxu1 %v3027_v8  ;;  %v3225_v35 = vld [vmem:[#allocation2 + $0x374] sm:$0xff] }
0x18a0   :  { %v5490_v16 = vpop.eup %5489  ;;  %3159 = vmatmul.mubr.bf16.vlgmr.msra.gmra.mrb[40].mxu1 %v3026_v45  ;;  %v2990_v60 = vmul.f32 %v5488_v32, %v2930_v39  ;;  %v4610_v39 = vcombine.high %v3209_v9, %v3212_v15  ;;  %v4588_v45 = vcombine.high %v3186_v34, %v3189_v63  ;;  %v4624_v36 = vcombine.high %v3222_v49, %v3225_v35  ;;  %v3231_v56 = vld [vmem:[#allocation2 + $0x3f4] sm:$0xff] }
0x18a1   :  { %v5492_v7 = vpop.eup %5491  ;;  %3563 = vmatpush1.bf16.msra.mxu1 %v4585_v27  ;;  %v2991_v51 = vmul.f32 %v5490_v16, %v6316_v31  ;;  %v4603_v27 = vcombine.low %v3203_v55, %v3206_v14  ;;  %v4609_v31 = vcombine.low %v3209_v9, %v3212_v15  ;;  %v3198_v9 = vld [vmem:[#allocation2 + $0x134] sm:$0xff] }
0x18a2   :  { %v5494_v3 = vpop.eup %5493  ;;  %v2992_v44 = vmul.f32 %v5492_v7, %v2934_v12  ;;  %3564 = vmatprep.subr.bf16.mxu1 %v4592_v13  ;;  %v3215_v12 = vld [vmem:[#allocation2 + $0x2ac] sm:$0xff]  ;;  %3615 = vmatprep.subr.bf16.mxu0 %v4588_v45 }
0x18a3   :  { %v2993_v21 = vmul.f32 %v5494_v3, %v2936_v46  ;;  %v3218_v46 = vld [vmem:[#allocation2 + $0x2ec] sm:$0xff] }
0x18a4   :  { %v3028_v22 = vpack.c.bf16 %v2992_v44, %v2990_v60  ;;  %v4615_v62 = vcombine.low %v3215_v12, %v3218_v46  ;;  %v4616_v11 = vcombine.high %v3215_v12, %v3218_v46  ;;  %v3192_v60 = vld [vmem:[#allocation2 + $0xb4] sm:$0xff] }
0x18a5   :  { %v3029_v0 = vpack.c.bf16 %v2993_v21, %v2991_v51  ;;  %3565 = vmatpush1.bf16.msra.mxu1 %v4591_v10  ;;  %v3179_v10 = vld [vmem:[%s6963_s1 + $0x32] ss:$0 sm:$0xff]  ;;  %v3195_v44 = vld [vmem:[#allocation2 + $0xf4] sm:$0xff] }
0x18a6   :  { %3566 = vmatprep.subr.bf16.mxu1 %v4598_v19  ;;  %v3204_v12 = vld [vmem:[#allocation2 + $0x1b4] sm:$0xff] }
0x18a7   :  { %3166 = vmatprep.mubr.bf16.mxu1 %v3029_v0  ;;  %v3207_v46 = vld [vmem:[#allocation2 + $0x1f4] sm:$0xff] }
0x18a8   :  { %3167 = vmatmul.mubr.bf16.gmra.mrb[44].mxu1 %v3028_v22  ;;  %v4606_v52 = vcombine.high %v3204_v12, %v3207_v46  ;;  %v4605_v37 = vcombine.low %v3204_v12, %v3207_v46  ;;  %v4582_v45 = vld [vmem:[%s6963_s1 + $0x33] ss:$8 sm:$0x30]  ;;  %v3261_v46 = vsub.s32 5, %v6197_v28 }
0x18a9   :  { %3567 = vmatpush1.bf16.msra.mxu1 %v4597_v17  ;;  %3594 = vmatprep.mubr.bf16.mxu1 %v5578_v29  ;;  %v4594_v17 = vcombine.high %v3192_v60, %v3195_v44 }
0x18aa   :  { %3568 = vmatprep.subr.bf16.mxu1 %v4604_v38 }
0x18ad   :  { %3569 = vmatpush1.bf16.msra.mxu1 %v4603_v27 }
0x18ae   :  { %3570 = vmatprep.subr.bf16.mxu1 %v4610_v39 }
0x18b1   :  { %3571 = vmatpush1.bf16.msra.mxu1 %v4609_v31 }
0x18b2   :  { %3572 = vmatprep.subr.bf16.mxu1 %v4616_v11 }
0x18b5   :  { %3573 = vmatpush1.bf16.msra.mxu1 %v4615_v62 }
0x18b6   :  { %3574 = vmatprep.subr.bf16.mxu1 %v4622_v30  ;;  %v4618_v30 = vcombine.high %v3216_v61, %v3219_v43 }
0x18b9   :  { %3575 = vmatpush1.bf16.msra.mxu1 %v4621_v4  ;;  %v4611_v4 = vcombine.low %v3210_v26, %v3213_v48 }
0x18ba   :  { %3576 = vmatprep.subr.bf16.mxu1 %v4628_v40  ;;  %v3228_v40 = vld [vmem:[#allocation2 + $0x3b4] sm:$0xff] }
0x18bb   :  { %v4630_v34 = vcombine.high %v3228_v40, %v3231_v56  ;;  %v4629_v63 = vcombine.low %v3228_v40, %v3231_v56 }
0x18bd   :  { %3577 = vmatpush1.bf16.msra.mxu1 %v4627_v53  ;;  %v4623_v53 = vcombine.low %v3222_v49, %v3225_v35 }
0x1973   :  { %v4877_v8 = vpop.f32.mrb[40].mxu1 }
0x1974   :  { %v4878_v13 = vpop.f32.mrb[41].mxu1 }
0x1975   :  { %v4879_v32 = vadd.f32 %v4878_v13, %v4877_v8  ;;  %v4880_v42 = vpop.f32.mrb[42].mxu1 }
0x1976   :  { %v4881_v6 = vpop.f32.mrb[43].mxu1 }
0x1977   :  { %v3175_v16 = vadd.f32 %v4879_v32, %v6275_v47  ;;  %v4882_v7 = vadd.f32 %v4881_v6, %v4880_v42  ;;  %v3201_v47 = vld [vmem:[#allocation2 + $0x174] sm:$0xff]  ;;  %v3253_v32 = vsub.s32 3, %v6197_v28 }
0x1978   :  { %v4600_v31 = vcombine.high %v3198_v9, %v3201_v47  ;;  %v4599_v2 = vcombine.low %v3198_v9, %v3201_v47 }
0x1979   :  { %v3176_v3 = vadd.f32 %v4882_v7, %v6278_v18  ;;  %v3180_v19 = vadd.f32 %v3179_v10, %v3175_v16  ;;  %v4593_v18 = vcombine.low %v3192_v60, %v3195_v44 }
0x197b   :  { %v3181_v51 = vadd.f32 %v3179_v10, %v3176_v3  ;;  %v4883_v21 = vpop.f32.mrb[44].mxu1 }
0x197c   :  { %v4884_v55 = vpop.f32.mrb[45].mxu1 }
0x197d   :  { %v3232_v14 = vpack.c.bf16 %v3181_v51, %v3180_v19  ;;  %v4885_v22 = vadd.f32 %v4884_v55, %v4883_v21  ;;  %v4886_v0 = vpop.f32.mrb[46].mxu1 }
0x197e   :  { %v4887_v38 = vpop.f32.mrb[47].mxu1 }
0x197f   :  { %v3177_v15 = vadd.f32 %v4885_v22, %v6285_v58  ;;  %v4888_v27 = vadd.f32 %v4887_v38, %v4886_v0  ;;  %3542 = vmatmul.mubr.bf16.vlgmr.msra.gmra.mrb[56].mxu0 %v3232_v14  ;;  %3595 = vmatmul.mubr.bf16.vlgmr.msra.gmra.mrb[48].mxu1 %v3232_v14 }
0x1980   :  { %3616 = vmatpush1.bf16.msra.mxu0 %v4587_v1  ;;  %3551 = vmatprep.mubr.bf16.mxu0 %v5578_v29  ;;  %v4581_v1 = vld [vmem:[%s6963_s1 + $0x33] ss:$8 sm:$0xf] }
0x1981   :  { %v3178_v39 = vadd.f32 %v4888_v27, %v6288_v24  ;;  %3617 = vmatprep.subr.bf16.mxu0 %v4594_v17  ;;  %3604 = vmatprep.mubr.bf16.mxu1 %v5578_v29  ;;  %v3182_v62 = vadd.f32 %v3179_v10, %v3177_v15  ;;  %v4612_v24 = vcombine.high %v3210_v26, %v3213_v48 }
0x1982   :  { %v6341_v8 = vor.u32 %v4582_v45, %v4581_v1 }
0x1983   :  { %v3183_v11 = vadd.f32 %v3179_v10, %v3178_v39  ;;  %v3257_v39 = vsub.s32 4, %v6197_v28 }
0x1984   :  { %3618 = vmatpush1.bf16.msra.mxu0 %v4593_v18  ;;  %v3250_v13 = vrot.slane %v6341_v8, %v1748_v59  ;;  %v3254_v7 = vrot.slane %v6341_v8, %v3253_v32 }
0x1985   :  { %3619 = vmatprep.subr.bf16.mxu0 %v4600_v31  ;;  %v3233_v58 = vpack.c.bf16 %v3183_v11, %v3182_v62  ;;  %v3258_v12 = vrot.slane %v6341_v8, %v3257_v39 }
0x1987   :  { %3552 = vmatmul.mubr.bf16.gmra.mrb[60].mxu0 %v3233_v58  ;;  %3605 = vmatmul.mubr.bf16.gmra.mrb[52].mxu1 %v3233_v58 }
0x1988   :  { %3620 = vmatpush1.bf16.msra.mxu0 %v4599_v2  ;;  %3647 = vmatprep.mubr.bf16.mxu0 %v5578_v29  ;;  %v3262_v2 = vrot.slane %v6341_v8, %v3261_v46 }
0x1989   :  { %3621 = vmatprep.subr.bf16.mxu0 %v4606_v52 }
0x198c   :  { %3622 = vmatpush1.bf16.msra.mxu0 %v4605_v37 }
0x198d   :  { %3623 = vmatprep.subr.bf16.mxu0 %v4612_v24 }
0x1990   :  { %3624 = vmatpush1.bf16.msra.mxu0 %v4611_v4 }
0x1991   :  { %3625 = vmatprep.subr.bf16.mxu0 %v4618_v30 }
0x1994   :  { %3626 = vmatpush1.bf16.msra.mxu0 %v4617_v50 }
0x1995   :  { %3627 = vmatprep.subr.bf16.mxu0 %v4624_v36 }
0x1998   :  { %3628 = vmatpush1.bf16.msra.mxu0 %v4623_v53 }
0x1999   :  { %3629 = vmatprep.subr.bf16.mxu0 %v4630_v34 }
0x199c   :  { %3630 = vmatpush1.bf16.msra.mxu0 %v4629_v63 }
0x199f   :  { %3648 = vmatmul.mubr.bf16.vlgmr.msra.gmra.mrb[64].mxu0 %v3232_v14 }
0x19a0   :  { %3657 = vmatprep.mubr.bf16.mxu0 %v5578_v29 }
0x19a7   :  { %3658 = vmatmul.mubr.bf16.gmra.mrb[68].mxu0 %v3233_v58 }
0x1a52   :  { %v6347_v42 = vpop.f32.mrb[56].mxu0  ;;  %v3596_v29 = vpop.f32.mrb[48].mxu1 }
0x1a53   :  { %v3597_v6 = vadd.f32 %v3596_v29, %v3250_v13  ;;  %v6349_v16 = vpop.f32.mrb[57].mxu0  ;;  %v3598_v10 = vpop.f32.mrb[49].mxu1 }
0x1a54   :  { %v6352_v3 = vpop.f32.mrb[58].mxu0  ;;  %v3600_v60 = vpop.f32.mrb[50].mxu1  ;;  %v3599_v51 = vadd.f32 %v3598_v10, %v3254_v7 }
0x1a55   :  { %v6354_v44 = vpop.f32.mrb[59].mxu0  ;;  %v3602_v19 = vpop.f32.mrb[51].mxu1  ;;  %3760 = vmax.xlane.f32.xlu0 %v3597_v6  ;;  %v3601_v55 = vadd.f32 %v3600_v60, %v3250_v13 }
0x1a56   :  { %v3603_v47 = vadd.f32 %v3602_v19, %v3254_v7 }
0x1a59   :  { %3832 = vmax.xlane.f32.xlu0 %v3599_v51 }
0x1a5a   :  { %v6356_v59 = vpop.f32.mrb[60].mxu0  ;;  %v3606_v21 = vpop.f32.mrb[52].mxu1 }
0x1a5b   :  { %v6358_v14 = vpop.f32.mrb[61].mxu0  ;;  %v3608_v22 = vpop.f32.mrb[53].mxu1  ;;  %v3607_v15 = vadd.f32 %v3606_v21, %v3250_v13 }
0x1a5c   :  { %v6360_v0 = vpop.f32.mrb[62].mxu0  ;;  %v3610_v17 = vpop.f32.mrb[54].mxu1  ;;  %v6364_v27 = vadd.f32 %v3608_v22, %v3254_v7 }
0x1a5d   :  { %3762 = vmax.xlane.f32.xlu0 %v3601_v55  ;;  %v6362_v38 = vpop.f32.mrb[63].mxu0  ;;  %v3612_v9 = vpop.f32.mrb[55].mxu1  ;;  %v6371_v31 = vadd.f32 %v3610_v17, %v3250_v13 }
0x1a5e   :  { %v6367_v18 = vadd.f32 %v3612_v9, %v3254_v7 }
0x1a61   :  { %3834 = vmax.xlane.f32.xlu0 %v3603_v47 }
0x1a65   :  { %3764 = vmax.xlane.f32.xlu0 %v3607_v15 }
0x1a69   :  { %3836 = vmax.xlane.f32.xlu0 %v6364_v27 }
0x1a6d   :  { %3838 = vmax.xlane.f32.xlu0 %v6367_v18 }
0x1a71   :  { %3766 = vmax.xlane.f32.xlu0 %v6371_v31 }
0x1a72   :  { %v3649_v62 = vpop.f32.mrb[64].mxu0 }
0x1a73   :  { %v6376_v11 = vadd.f32 %v3649_v62, %v3258_v12  ;;  %v3651_v58 = vpop.f32.mrb[65].mxu0 }
0x1a74   :  { %v3653_v52 = vpop.f32.mrb[66].mxu0  ;;  %v6380_v48 = vadd.f32 %v3651_v58, %v3262_v2 }
0x1a75   :  { %v3655_v26 = vpop.f32.mrb[67].mxu0  ;;  %3904 = vmax.xlane.f32.xlu1 %v6376_v11  ;;  %v6383_v24 = vadd.f32 %v3653_v52, %v3258_v12 }
0x1a76   :  { %v6386_v4 = vadd.f32 %v3655_v26, %v3262_v2 }
0x1a79   :  { %3976 = vmax.xlane.f32.xlu1 %v6380_v48 }
0x1a7a   :  { %v3659_v37 = vpop.f32.mrb[68].mxu0 }
0x1a7b   :  { %v3661_v28 = vpop.f32.mrb[69].mxu0  ;;  %v6389_v30 = vadd.f32 %v3659_v37, %v3258_v12 }
0x1a7c   :  { %v3663_v61 = vpop.f32.mrb[70].mxu0  ;;  %v6392_v49 = vadd.f32 %v3661_v28, %v3262_v2 }
0x1a7d   :  { %v3665_v43 = vpop.f32.mrb[71].mxu0  ;;  %3906 = vmax.xlane.f32.xlu1 %v6383_v24  ;;  %v6395_v35 = vadd.f32 %v3663_v61, %v3258_v12 }
0x1a7e   :  { %v6398_v50 = vadd.f32 %v3665_v43, %v3262_v2 }
0x1a81   :  { %3978 = vmax.xlane.f32.xlu1 %v6386_v4 }
0x1a85   :  { %3908 = vmax.xlane.f32.xlu1 %v6389_v30 }
0x1a89   :  { %3980 = vmax.xlane.f32.xlu1 %v6392_v49 }
0x1a8d   :  { %3910 = vmax.xlane.f32.xlu1 %v6395_v35 }
0x1a91   :  { %3982 = vmax.xlane.f32.xlu1 %v6398_v50 }
0x1ae2   :  { %v3761_v36 = vpop.xlane.xlu0 %3760 }
0x1ae3   :  { %vm3768_vm3 = vcmp.ge.f32.partialorder %v3597_v6, %v3761_v36 }
0x1ae4   :  { %v6402_v40 = vsel %vm3768_vm3, %v5693_v5, 128 }
0x1ae5   :  { %v3777_v56 = vshra.s32 %v6402_v40, 16 }
0x1ae6   :  { %v3833_v53 = vpop.xlane.xlu0 %3832 }
0x1ae7   :  { %vm3840_vm2 = vcmp.ge.f32.partialorder %v3599_v51, %v3833_v53  ;;  %v6405_v34 = vcvt.s32.f32 %v3777_v56 }
0x1ae8   :  { %v6408_v63 = vsel %vm3840_vm2, %v5693_v5, 128 }
0x1ae9   :  { %3780 = vmin.xlane.f32.xlu0 %v6405_v34  ;;  %v3849_v1 = vshra.s32 %v6408_v63, 16 }
0x1aea   :  { %v3763_v45 = vpop.xlane.xlu0 %3762 }
0x1aeb   :  { %vm3769_vm10 = vcmp.ge.f32.partialorder %v3601_v55, %v3763_v45  ;;  %v6412_v13 = vcvt.s32.f32 %v3849_v1 }
0x1aec   :  { %v6415_v32 = vsel %vm3769_vm10, %v5693_v5, 128 }
0x1aed   :  { %3852 = vmin.xlane.f32.xlu0 %v6412_v13  ;;  %v3791_v29 = vshra.s32 %v6415_v32, 16 }
0x1aee   :  { %v3835_v6 = vpop.xlane.xlu0 %3834 }
0x1aef   :  { %vm3841_vm1 = vcmp.ge.f32.partialorder %v3603_v47, %v3835_v6  ;;  %v6419_v7 = vcvt.s32.f32 %v3791_v29 }
0x1af0   :  { %v6422_v10 = vsel %vm3841_vm1, %v5693_v5, 128 }
0x1af1   :  { %3794 = vmin.xlane.f32.xlu0 %v6419_v7  ;;  %v3863_v60 = vshra.s32 %v6422_v10, 16 }
0x1af2   :  { %v3765_v19 = vpop.xlane.xlu0 %3764 }
0x1af3   :  { %vm3770_vm6 = vcmp.ge.f32.partialorder %v3607_v15, %v3765_v19  ;;  %v6426_v51 = vcvt.s32.f32 %v3863_v60 }
0x1af4   :  { %v6429_v21 = vsel %vm3770_vm6, %v5693_v5, 128 }
0x1af5   :  { %3866 = vmin.xlane.f32.xlu0 %v6426_v51  ;;  %v3805_v55 = vshra.s32 %v6429_v21, 16 }
0x1af6   :  { %v3837_v22 = vpop.xlane.xlu0 %3836 }
0x1af7   :  { %vm3842_vm4 = vcmp.ge.f32.partialorder %v6364_v27, %v3837_v22  ;;  %v6434_v17 = vcvt.s32.f32 %v3805_v55 }
0x1af8   :  { %v6437_v9 = vsel %vm3842_vm4, %v5693_v5, 128 }
0x1af9   :  { %3808 = vmin.xlane.f32.xlu0 %v6434_v17  ;;  %v3877_v47 = vshra.s32 %v6437_v9, 16 }
0x1afa   :  { %v3839_v15 = vpop.xlane.xlu0 %3838 }
0x1afb   :  { %vm3843_vm7 = vcmp.ge.f32.partialorder %v6367_v18, %v3839_v15  ;;  %v6442_v39 = vcvt.s32.f32 %v3877_v47 }
0x1afc   :  { %v6445_v12 = vsel %vm3843_vm7, %v5693_v5, 128 }
0x1afd   :  { %3880 = vmin.xlane.f32.xlu0 %v6442_v39  ;;  %v3891_v27 = vshra.s32 %v6445_v12, 16 }
0x1afe   :  { %v3767_v46 = vpop.xlane.xlu0 %3766 }
0x1aff   :  { %vm3771_vm11 = vcmp.ge.f32.partialorder %v6371_v31, %v3767_v46  ;;  %v6450_v62 = vcvt.s32.f32 %v3891_v27 }
0x1b00   :  { %v6453_v2 = vsel %vm3771_vm11, %v5693_v5, 128 }
0x1b01   :  { %3894 = vmin.xlane.f32.xlu0 %v6450_v62  ;;  %v3819_v18 = vshra.s32 %v6453_v2, 16 }
0x1b02   :  { %v3905_v58 = vpop.xlane.xlu1 %3904 }
0x1b03   :  { %vm3912_vm9 = vcmp.ge.f32.partialorder %v6376_v11, %v3905_v58  ;;  %v6458_v52 = vcvt.s32.f32 %v3819_v18 }
0x1b04   :  { %v6461_v26 = vsel %vm3912_vm9, %v5693_v5, 128 }
0x1b05   :  { %3822 = vmin.xlane.f32.xlu0 %v6458_v52  ;;  %v3921_v31 = vshra.s32 %v6461_v26, 16 }
0x1b06   :  { %v3977_v37 = vpop.xlane.xlu1 %3976 }
0x1b07   :  { %vm3984_vm0 = vcmp.ge.f32.partialorder %v6380_v48, %v3977_v37  ;;  %v6466_v28 = vcvt.s32.f32 %v3921_v31  ;;  %v3776_v37 = vand.u32 65535, %v6402_v40 }
0x1b08   :  { %v6469_v61 = vsel %vm3984_vm0, %v5693_v5, 128 }
0x1b09   :  { %3924 = vmin.xlane.f32.xlu1 %v6466_v28  ;;  %v3993_v11 = vshra.s32 %v6469_v61, 16 }
0x1b0a   :  { %v3907_v43 = vpop.xlane.xlu1 %3906 }
0x1b0b   :  { %vm3913_vm12 = vcmp.ge.f32.partialorder %v6383_v24, %v3907_v43  ;;  %v6474_v36 = vcvt.s32.f32 %v3993_v11  ;;  %v3778_v11 = vcvt.s32.f32 %v3776_v37  ;;  %v3848_v43 = vand.u32 65535, %v6408_v63 }
0x1b0c   :  { %v6477_v56 = vsel %vm3913_vm12, %v5693_v5, 128  ;;  %v3862_v63 = vand.u32 65535, %v6422_v10  ;;  %v3876_v10 = vand.u32 65535, %v6437_v9  ;;  %v3818_v9 = vand.u32 65535, %v6453_v2 }
0x1b0d   :  { %v3935_v53 = vshra.s32 %v6477_v56, 16  ;;  %3996 = vmin.xlane.f32.xlu1 %v6474_v36 }
0x1b0e   :  { %v3979_v48 = vpop.xlane.xlu1 %3978 }
0x1b0f   :  { %v6481_v1 = vcvt.s32.f32 %v3935_v53  ;;  %vm3985_vm15 = vcmp.ge.f32.partialorder %v6386_v4, %v3979_v48  ;;  %v3850_v48 = vcvt.s32.f32 %v3848_v43 }
0x1b10   :  { %v6485_v45 = vsel %vm3985_vm15, %v5693_v5, 128 }
0x1b11   :  { %v4007_v29 = vshra.s32 %v6485_v45, 16  ;;  %3938 = vmin.xlane.f32.xlu1 %v6481_v1 }
0x1b12   :  { %v3909_v24 = vpop.xlane.xlu1 %3908 }
0x1b13   :  { %v6489_v6 = vcvt.s32.f32 %v4007_v29  ;;  %vm3914_vm14 = vcmp.ge.f32.partialorder %v6389_v30, %v3909_v24  ;;  %v3790_v29 = vand.u32 65535, %v6415_v32  ;;  %v3804_v32 = vand.u32 65535, %v6429_v21 }
0x1b14   :  { %v6493_v60 = vsel %vm3914_vm14, %v5693_v5, 128  ;;  %v3890_v21 = vand.u32 65535, %v6445_v12 }
0x1b15   :  { %v3949_v19 = vshra.s32 %v6493_v60, 16  ;;  %4010 = vmin.xlane.f32.xlu1 %v6489_v6  ;;  %v3792_v40 = vcvt.s32.f32 %v3790_v29 }
0x1b16   :  { %v3981_v4 = vpop.xlane.xlu1 %3980 }
0x1b17   :  { %v6497_v55 = vcvt.s32.f32 %v3949_v19  ;;  %vm3986_vm8 = vcmp.ge.f32.partialorder %v6392_v49, %v3981_v4 }
0x1b18   :  { %v6501_v22 = vsel %vm3986_vm8, %v5693_v5, 128 }
0x1b19   :  { %v4021_v47 = vshra.s32 %v6501_v22, 16  ;;  %3952 = vmin.xlane.f32.xlu1 %v6497_v55 }
0x1b1a   :  { %v3911_v30 = vpop.xlane.xlu1 %3910 }
0x1b1b   :  { %v6505_v15 = vcvt.s32.f32 %v4021_v47  ;;  %vm3915_vm5 = vcmp.ge.f32.partialorder %v6395_v35, %v3911_v30  ;;  %v3864_v47 = vcvt.s32.f32 %v3862_v63  ;;  %v4132_v63 = vld [vmem:[#allocation6] sm:$0xff] }
0x1b1c   :  { %v6509_v27 = vsel %vm3915_vm5, %v5693_v5, 128 }
0x1b1d   :  { %v3963_v46 = vshra.s32 %v6509_v27, 16  ;;  %4024 = vmin.xlane.f32.xlu1 %v6505_v15 }
0x1b1e   :  { %v3983_v49 = vpop.xlane.xlu1 %3982 }
0x1b1f   :  { %v6513_v18 = vcvt.s32.f32 %v3963_v46  ;;  %vm3987_vm13 = vcmp.ge.f32.partialorder %v6398_v50, %v3983_v49  ;;  %v3806_v46 = vcvt.s32.f32 %v3804_v32 }
0x1b20   :  { %v6517_v58 = vsel %vm3987_vm13, %v5693_v5, 128 }
0x1b21   :  { %v4035_v31 = vshra.s32 %v6517_v58, 16  ;;  %3966 = vmin.xlane.f32.xlu1 %v6513_v18 }
0x1b23   :  { %v6521_v35 = vcvt.s32.f32 %v4035_v31  ;;  %v3878_v31 = vcvt.s32.f32 %v3876_v10 }
0x1b25   :  { %4038 = vmin.xlane.f32.xlu1 %v6521_v35 }
0x1b76   :  { %v6526_v53 = vpop.xlane.xlu0 %3780 }
0x1b77   :  { %vm3782_vm3 = vcmp.eq.f32.partialorder %v6405_v34, %v6526_v53 }
0x1b78   :  { %v3783_v50 = vsel %vm3782_vm3, %v3778_v11, inf  ;;  %v3892_v11 = vcvt.s32.f32 %v3890_v21 }
0x1b79   :  { %3784 = vmin.xlane.f32.xlu0 %v3783_v50  ;;  %v6564_v50 = vrot.slane %v6341_v8, %v6206_v23 }
0x1b7a   :  { %v6531_v24 = vpop.xlane.xlu0 %3852 }
0x1b7b   :  { %vm3854_vm2 = vcmp.eq.f32.partialorder %v6412_v13, %v6531_v24 }
0x1b7c   :  { %v3855_v19 = vsel %vm3854_vm2, %v3850_v48, inf  ;;  %v3920_v48 = vand.u32 65535, %v6461_v26 }
0x1b7d   :  { %3856 = vmin.xlane.f32.xlu0 %v3855_v19 }
0x1b7e   :  { %v6536_v4 = vpop.xlane.xlu0 %3794 }
0x1b7f   :  { %vm3796_vm10 = vcmp.eq.f32.partialorder %v6419_v7, %v6536_v4 }
0x1b80   :  { %v3797_v34 = vsel %vm3796_vm10, %v3792_v40, inf  ;;  %v4149_v40 = vld [vmem:[#allocation6 + $0x88] sm:$0xff] }
0x1b81   :  { %3798 = vmin.xlane.f32.xlu0 %v3797_v34 }
0x1b82   :  { %v6541_v30 = vpop.xlane.xlu0 %3866 }
0x1b83   :  { %vm3868_vm1 = vcmp.eq.f32.partialorder %v6426_v51, %v6541_v30 }
0x1b84   :  { %v3869_v13 = vsel %vm3868_vm1, %v3864_v47, inf  ;;  %v4133_v47 = vld [vmem:[#allocation6 + $0x8] sm:$0xff] }
0x1b85   :  { %3870 = vmin.xlane.f32.xlu0 %v3869_v13  ;;  %v5307_v32 = vpack.c.bf16 %v4133_v47, %v4132_v63  ;;  %v4150_v13 = vld [vmem:[#allocation6 + $0x90] sm:$0xff] }
0x1b86   :  { %v6546_v49 = vpop.xlane.xlu0 %3808 }
0x1b87   :  { %vm3810_vm6 = vcmp.eq.f32.partialorder %v6434_v17, %v6546_v49  ;;  %v6560_v17 = vrot.slane %v6341_v8, %v6200_v25  ;;  %v6577_v25 = vadd.f32 %v6349_v16, %v6564_v50  ;;  %v3922_v8 = vcvt.s32.f32 %v3920_v48  ;;  %v4153_v48 = vld [vmem:[#allocation6 + $0xa8] sm:$0xff] }
0x1b88   :  { %v3811_v7 = vsel %vm3810_vm6, %v3806_v46, inf  ;;  %v6592_v16 = vadd.f32 %v6358_v14, %v6564_v50  ;;  %v4151_v46 = vld [vmem:[#allocation6 + $0x98] sm:$0xff] }
0x1b89   :  { %3812 = vmin.xlane.f32.xlu0 %v3811_v7  ;;  %v6573_v2 = vadd.f32 %v6347_v42, %v6560_v17  ;;  %v6588_v42 = vadd.f32 %v6356_v59, %v6560_v17  ;;  %v4134_v59 = vld [vmem:[#allocation6 + $0x10] sm:$0xff]  ;;  %v3934_v7 = vand.u32 65535, %v6477_v56  ;;  %v4006_v56 = vand.u32 65535, %v6485_v45  ;;  %v4155_v45 = vld [vmem:[#allocation6 + $0xb8] sm:$0xff] }
0x1b8a   :  { %v6551_v37 = vpop.xlane.xlu0 %3880 }
0x1b8b   :  { %vm3882_vm4 = vcmp.eq.f32.partialorder %v6442_v39, %v6551_v37  ;;  %v3820_v39 = vcvt.s32.f32 %v3818_v9  ;;  %v3668_v26 = vmax.f32 %v6573_v2, %v6577_v25  ;;  %v3674_v21 = vmax.f32 %v6588_v42, %v6592_v16 }
0x1b8c   :  { %v3883_v51 = vsel %vm3882_vm4, %v3878_v31, inf  ;;  %v5309_v31 = vpack.c.bf16 %v4151_v46, %v4150_v13  ;;  %v3936_v9 = vcvt.s32.f32 %v3934_v7  ;;  %v4140_v46 = vld [vmem:[#allocation6 + $0x40] sm:$0xff] }
0x1b8d   :  { %3884 = vmin.xlane.f32.xlu0 %v3883_v51 }
0x1b8e   :  { %v6556_v43 = vpop.xlane.xlu0 %3894 }
0x1b8f   :  { %vm3896_vm7 = vcmp.eq.f32.partialorder %v6450_v62, %v6556_v43  ;;  %v3992_v62 = vand.u32 65535, %v6469_v61 }
0x1b90   :  { %v3897_v12 = vsel %vm3896_vm7, %v3892_v11, inf }
0x1b91   :  { %3898 = vmin.xlane.f32.xlu0 %v3897_v12  ;;  %v3994_v10 = vcvt.s32.f32 %v3992_v62  ;;  %v4137_v62 = vld [vmem:[#allocation6 + $0x28] sm:$0xff] }
0x1b92   :  { %v6569_v29 = vpop.xlane.xlu0 %3822 }
0x1b93   :  { %vm3824_vm11 = vcmp.eq.f32.partialorder %v6458_v52, %v6569_v29  ;;  %v4148_v52 = vld [vmem:[#allocation6 + $0x80] sm:$0xff] }
0x1b94   :  { %v3825_v23 = vsel %vm3824_vm11, %v3820_v39, inf  ;;  %v5305_v34 = vpack.c.bf16 %v4149_v40, %v4148_v52  ;;  %v4152_v39 = vld [vmem:[#allocation6 + $0xa0] sm:$0xff]  ;;  %v4008_v52 = vcvt.s32.f32 %v4006_v56  ;;  %v3948_v40 = vand.u32 65535, %v6493_v60  ;;  %v4143_v56 = vld [vmem:[#allocation6 + $0x58] sm:$0xff] }
0x1b95   :  { %3826 = vmin.xlane.f32.xlu0 %v3825_v23  ;;  %v4136_v23 = vld [vmem:[#allocation6 + $0x20] sm:$0xff]  ;;  %v4020_v60 = vand.u32 65535, %v6501_v22 }
0x1b96   :  { %v6582_v19 = vpop.xlane.xlu1 %3924  ;;  %5306 = vmatprep.subr.bf16.mxu1 %v5305_v34 }
0x1b97   :  { %vm3926_vm9 = vcmp.eq.f32.partialorder %v6466_v28, %v6582_v19  ;;  %v4135_v28 = vld [vmem:[#allocation6 + $0x18] sm:$0xff]  ;;  %5308 = vmatpush3.bf16.msra.mxu1 %v5307_v32 }
0x1b98   :  { %v3927_v61 = vsel %vm3926_vm9, %v3922_v8, inf  ;;  %v5311_v51 = vpack.c.bf16 %v4135_v28, %v4134_v59  ;;  %5310 = vmatprep.subr.bf16.mxu1 %v5309_v31  ;;  %v4139_v32 = vld [vmem:[#allocation6 + $0x38] sm:$0xff]  ;;  %v4141_v59 = vld [vmem:[#allocation6 + $0x48] sm:$0xff]  ;;  %v4022_v28 = vcvt.s32.f32 %v4020_v60 }
0x1b99   :  { %3928 = vmin.xlane.f32.xlu1 %v3927_v61  ;;  %3669 = vmax.xlane.f32.xlu0 %v3668_v26  ;;  %v5315_v26 = vpack.c.bf16 %v4137_v62, %v4136_v23  ;;  %v4138_v61 = vld [vmem:[#allocation6 + $0x30] sm:$0xff]  ;;  %v4145_v23 = vld [vmem:[#allocation6 + $0x68] sm:$0xff]  ;;  %v4147_v62 = vld [vmem:[#allocation6 + $0x78] sm:$0xff] }
0x1b9a   :  { %v6597_v14 = vpop.xlane.xlu1 %3996  ;;  %v5319_v13 = vpack.c.bf16 %v4139_v32, %v4138_v61  ;;  %v3801_v32 = vcvt.f32.s32 %v6536_v4 }
0x1b9b   :  { %vm3998_vm0 = vcmp.eq.f32.partialorder %v6474_v36, %v6597_v14  ;;  %5312 = vmatpush3.bf16.msra.mxu1 %v5311_v51  ;;  %v5313_v36 = vpack.c.bf16 %v4153_v48, %v4152_v39 }
0x1b9c   :  { %v3999_v11 = vsel %vm3998_vm0, %v3994_v10, inf  ;;  %v3950_v10 = vcvt.s32.f32 %v3948_v40  ;;  %v3802_v4 = vshll.u32 %v3801_v32, 16 }
0x1b9d   :  { %4000 = vmin.xlane.f32.xlu1 %v3999_v11  ;;  %3675 = vmax.xlane.f32.xlu0 %v3674_v21  ;;  %v3962_v21 = vand.u32 65535, %v6509_v27  ;;  %v4034_v11 = vand.u32 65535, %v6517_v58  ;;  %v6635_v58 = vadd.f32 %v6352_v3, %v6560_v17 }
0x1b9e   :  { %v6604_v12 = vpop.xlane.xlu1 %3938  ;;  %5314 = vmatprep.subr.bf16.mxu1 %v5313_v36  ;;  %v4146_v36 = vld [vmem:[#allocation6 + $0x70] sm:$0xff] }
0x1b9f   :  { %vm3940_vm12 = vcmp.eq.f32.partialorder %v6481_v1, %v6604_v12  ;;  %5316 = vmatpush3.bf16.msra.mxu1 %v5315_v26  ;;  %v4154_v1 = vld [vmem:[#allocation6 + $0xb0] sm:$0xff] }
0x1ba0   :  { %v3941_v8 = vsel %vm3940_vm12, %v3936_v9, inf  ;;  %v5317_v47 = vpack.c.bf16 %v4155_v45, %v4154_v1  ;;  %v3859_v1 = vcvt.f32.s32 %v6531_v24 }
0x1ba1   :  { %3942 = vmin.xlane.f32.xlu1 %v3941_v8  ;;  %v6639_v8 = vadd.f32 %v6354_v44, %v6564_v50  ;;  %v6652_v44 = vadd.f32 %v6362_v38, %v6564_v50 }
0x1ba2   :  { %v6609_v63 = vpop.xlane.xlu1 %4010  ;;  %5318 = vmatprep.subr.bf16.mxu1 %v5317_v47 }
0x1ba3   :  { %vm4012_vm15 = vcmp.eq.f32.partialorder %v6489_v6, %v6609_v63  ;;  %5320 = vmatpush3.bf16.msra.mxu1 %v5319_v13  ;;  %v5323_v6 = vpack.c.bf16 %v4141_v59, %v4140_v46  ;;  %v3671_v3 = vmax.f32 %v6635_v58, %v6639_v8  ;;  %v3873_v13 = vcvt.f32.s32 %v6541_v30 }
0x1ba4   :  { %v4013_v34 = vsel %vm4012_vm15, %v4008_v52, inf  ;;  %5322 = vmatprep.subr.bf16.mxu1 %v5813_v20  ;;  %v4142_v20 = vld [vmem:[#allocation6 + $0x50] sm:$0xff]  ;;  %v6648_v52 = vadd.f32 %v6360_v0, %v6560_v17  ;;  %v3860_v0 = vshll.u32 %v3859_v1, 16 }
0x1ba5   :  { %4014 = vmin.xlane.f32.xlu1 %v4013_v34  ;;  %v5327_v27 = vpack.c.bf16 %v4143_v56, %v4142_v20  ;;  %v3874_v30 = vshll.u32 %v3873_v13, 16 }
0x1ba6   :  { %v6614_v7 = vpop.xlane.xlu1 %3952 }
0x1ba7   :  { %vm3954_vm14 = vcmp.eq.f32.partialorder %v6497_v55, %v6614_v7  ;;  %5324 = vmatpush3.bf16.msra.mxu1 %v5323_v6  ;;  %v3964_v55 = vcvt.s32.f32 %v3962_v21  ;;  %v3815_v21 = vcvt.f32.s32 %v6546_v49 }
0x1ba8   :  { %v3955_v31 = vsel %vm3954_vm14, %v3950_v10, inf  ;;  %5326 = vmatprep.subr.bf16.mxu1 %v5827_v41  ;;  %v4144_v41 = vld [vmem:[#allocation6 + $0x60] sm:$0xff] }
0x1ba9   :  { %3956 = vmin.xlane.f32.xlu1 %v3955_v31  ;;  %v3816_v49 = vshll.u32 %v3815_v21, 16 }
0x1baa   :  { %v6620_v51 = vpop.xlane.xlu1 %4024 }
0x1bab   :  { %vm4026_vm8 = vcmp.eq.f32.partialorder %v6505_v15, %v6620_v51  ;;  %5328 = vmatpush3.bf16.msra.mxu1 %v5327_v27  ;;  %v4036_v15 = vcvt.s32.f32 %v4034_v11 }
0x1bac   :  { %v4027_v22 = vsel %vm4026_vm8, %v4022_v28, inf  ;;  %5330 = vmatprep.subr.bf16.mxu1 %v5844_v54  ;;  %v5335_v54 = vpack.c.bf16 %v4147_v62, %v4146_v36  ;;  %v3931_v36 = vcvt.f32.s32 %v6582_v19 }
0x1bad   :  { %4028 = vmin.xlane.f32.xlu1 %v4027_v22  ;;  %v3887_v22 = vcvt.f32.s32 %v6551_v37 }
0x1bae   :  { %v6626_v9 = vpop.xlane.xlu1 %3966 }
0x1baf   :  { %vm3968_vm5 = vcmp.eq.f32.partialorder %v6513_v18, %v6626_v9  ;;  %v5331_v18 = vpack.c.bf16 %v4145_v23, %v4144_v41  ;;  %v3888_v37 = vshll.u32 %v3887_v22, 16  ;;  %v3973_v56 = vcvt.f32.s32 %v6626_v9 }
0x1bb0   :  { %v3969_v39 = vsel %vm3968_vm5, %v3964_v55, inf }
0x1bb1   :  { %3970 = vmin.xlane.f32.xlu1 %v3969_v39  ;;  %5332 = vmatpush3.bf16.msra.mxu1 %v5331_v18  ;;  %v3974_v9 = vshll.u32 %v3973_v56, 16  ;;  %v4251_v56 = vld [vmem:[#allocation2 + $0x2bc] sm:$0xf] }
0x1bb2   :  { %v6630_v48 = vpop.xlane.xlu1 %4038  ;;  %5334 = vmatprep.subr.bf16.mxu1 %v5848_v57  ;;  %v3787_v57 = vcvt.f32.s32 %v6526_v53 }
0x1bb3   :  { %vm4040_vm13 = vcmp.eq.f32.partialorder %v6521_v35, %v6630_v48  ;;  %v3677_v35 = vmax.f32 %v6648_v52, %v6652_v44 }
0x1bb4   :  { %v4041_v26 = vsel %vm4040_vm13, %v4036_v15, inf  ;;  %v3788_v34 = vshll.u32 %v3787_v57, 16  ;;  %v4003_v57 = vcvt.f32.s32 %v6597_v14 }
0x1bb5   :  { %4042 = vmin.xlane.f32.xlu1 %v4041_v26  ;;  %5336 = vmatpush3.bf16.msra.mxu1 %v5335_v54 }
0x1bb6   :  { %v4004_v32 = vshll.u32 %v4003_v57, 16  ;;  %v4249_v57 = vld [vmem:[#allocation2 + $0x23c] sm:$0xf] }
0x1bb9   :  { %3672 = vmax.xlane.f32.xlu1 %v3671_v3  ;;  %v3932_v3 = vshll.u32 %v3931_v36, 16 }
0x1bbd   :  { %3678 = vmax.xlane.f32.xlu1 %v3677_v35 }
0x1c06   :  { %v3785_v40 = vpop.xlane.xlu0 %3784 }
0x1c07   :  { %v3786_v45 = vcvt.f32.s32 %v3785_v40 }
0x1c09   :  { %v6658_v47 = vadd.s32 %v3788_v34, %v3786_v45  ;;  %v3945_v34 = vcvt.f32.s32 %v6604_v12 }
0x1c0a   :  { %v3857_v61 = vpop.xlane.xlu0 %3856 }
0x1c0b   :  { %v3858_v17 = vcvt.f32.s32 %v3857_v61  ;;  %vm4048_vm3 = vcmp.eq.s32.totalorder %v5693_v5, %v6658_v47  ;;  %vm4049_vm6 = vcmp.eq.s32.totalorder %v5933_v33, %v6658_v47 }
0x1c0d   :  { %v6660_v38 = vadd.s32 %v3860_v0, %v3858_v17 }
0x1c0e   :  { %v3799_v50 = vpop.xlane.xlu0 %3798 }
0x1c0f   :  { %v4056_v46 = vadd.s32 64, %v6660_v38  ;;  %v3800_v53 = vcvt.f32.s32 %v3799_v50 }
0x1c11   :  { %vm4060_vm2 = vcmp.eq.s32.totalorder %v5693_v5, %v4056_v46  ;;  %vm4061_vm10 = vcmp.eq.s32.totalorder %v5933_v33, %v4056_v46  ;;  %v6679_v6 = vadd.s32 %v3802_v4, %v3800_v53  ;;  %v3946_v53 = vshll.u32 %v3945_v34, 16 }
0x1c12   :  { %vm6669_vm1 = vmor %vm4048_vm3, %vm4060_vm2  ;;  %v3871_v59 = vpop.xlane.xlu0 %3870  ;;  %v4017_v4 = vcvt.f32.s32 %v6609_v63  ;;  %v3959_v63 = vcvt.f32.s32 %v6614_v7  ;;  %v3829_v7 = vcvt.f32.s32 %v6569_v29 }
0x1c13   :  { %v3872_v10 = vcvt.f32.s32 %v3871_v59  ;;  %vm6675_vm4 = vmor %vm4049_vm6, %vm4061_vm10  ;;  %vm4051_vm7 = vcmp.eq.s32.totalorder %v5933_v33, %v6679_v6  ;;  %vm4050_vm12 = vcmp.eq.s32.totalorder %v5693_v5, %v6679_v6 }
0x1c14   :  { %v4018_v60 = vshll.u32 %v4017_v4, 16 }
0x1c15   :  { %v6681_v31 = vadd.s32 %v3874_v30, %v3872_v10 }
0x1c16   :  { %v3813_v28 = vpop.xlane.xlu0 %3812 }
0x1c17   :  { %v4057_v55 = vadd.s32 64, %v6681_v31  ;;  %v3814_v11 = vcvt.f32.s32 %v3813_v28 }
0x1c19   :  { %vm4063_vm11 = vcmp.eq.s32.totalorder %v5933_v33, %v4057_v55  ;;  %vm4062_vm9 = vcmp.eq.s32.totalorder %v5693_v5, %v4057_v55  ;;  %v6700_v15 = vadd.s32 %v3816_v49, %v3814_v11  ;;  %v3901_v49 = vcvt.f32.s32 %v6556_v43 }
0x1c1a   :  { %v3885_v20 = vpop.xlane.xlu0 %3884  ;;  %vm6690_vm0 = vmor %vm4051_vm7, %vm4063_vm11  ;;  %v4031_v43 = vcvt.f32.s32 %v6620_v51  ;;  %v3830_v51 = vshll.u32 %v3829_v7, 16 }
0x1c1b   :  { %v3886_v27 = vcvt.f32.s32 %v3885_v20  ;;  %vm6696_vm15 = vmor %vm4050_vm12, %vm4062_vm9  ;;  %vm4053_vm14 = vcmp.eq.s32.totalorder %v5933_v33, %v6700_v15  ;;  %vm4052_vm3 = vcmp.eq.s32.totalorder %v5693_v5, %v6700_v15 }
0x1c1d   :  { %v6702_v41 = vadd.s32 %v3888_v37, %v3886_v27  ;;  %v5580_v37 = vmov 1.0  }
0x1c1e   :  { %v6704_v23 = vpop.xlane.xlu0 %3898 }
0x1c1f   :  { %v4058_v18 = vadd.s32 64, %v6702_v41 }
0x1c21   :  { %vm4065_vm8 = vcmp.eq.s32.totalorder %v5933_v33, %v4058_v18  ;;  %vm4064_vm5 = vcmp.eq.s32.totalorder %v5693_v5, %v4058_v18  ;;  %v3960_v18 = vshll.u32 %v3959_v63, 16 }
0x1c22   :  { %v6712_v62 = vpop.xlane.xlu0 %3826  ;;  %vm6714_vm13 = vmor %vm4053_vm14, %vm4065_vm8 }
0x1c23   :  { %vm6720_vm2 = vmor %vm4052_vm3, %vm4064_vm5  ;;  %v3828_v29 = vcvt.f32.s32 %v6712_v62 }
0x1c25   :  { %v6803_v62 = vadd.s32 %v3830_v51, %v3828_v29  ;;  %v4250_v29 = vld [vmem:[#allocation2 + $0x27c] sm:$0xf] }
0x1c26   :  { %v3929_v35 = vpop.xlane.xlu1 %3928  ;;  %v3670_v40 = vpop.xlane.xlu0 %3669  ;;  %v4651_v51 = vcombine.low %v4249_v57, %v4250_v29 }
0x1c27   :  { %v3930_v1 = vcvt.f32.s32 %v3929_v35  ;;  %vm3680_vm10 = vcmp.ge.f32.partialorder %v6573_v2, %v3670_v40  ;;  %vm3681_vm6 = vcmp.ge.f32.partialorder %v6577_v25, %v3670_v40 }
0x1c28   :  { %v3688_v19 = vsel %vm3680_vm10, %v5693_v5, 256  ;;  %v3689_v45 = vsel %vm3681_vm6, %v5933_v33, 256 }
0x1c29   :  { %v6729_v61 = vadd.s32 %v3932_v3, %v3930_v1  ;;  %vm3696_vm7 = vcmp.lt.s32.totalorder %v3688_v19, %v3689_v45  ;;  %v3900_v3 = vcvt.f32.s32 %v6704_v23  ;;  %v3902_v1 = vshll.u32 %v3901_v49, 16  ;;  %v4242_v49 = vld [vmem:[#allocation2 + $0x7c] sm:$0xf] }
0x1c2a   :  { %v6732_v0 = vsel %vm3696_vm7, %v3688_v19, %v3689_v45  ;;  %v4001_v17 = vpop.xlane.xlu1 %4000  ;;  %v3676_v50 = vpop.xlane.xlu0 %3675  ;;  %v4032_v45 = vshll.u32 %v4031_v43, 16  ;;  %v4246_v43 = vld [vmem:[#allocation2 + $0x17c] sm:$0xf] }
0x1c2b   :  { %v4076_v14 = vadd.s32 128, %v6729_v61  ;;  %v4002_v13 = vcvt.f32.s32 %v4001_v17  ;;  %vm3684_vm11 = vcmp.ge.f32.partialorder %v6588_v42, %v3676_v50  ;;  %vm3685_vm9 = vcmp.ge.f32.partialorder %v6592_v16, %v3676_v50 }
0x1c2c   :  { %v3692_v2 = vsel %vm3684_vm11, %v5693_v5, 256  ;;  %v3699_v25 = vshra.s32 %v6732_v0, 16  ;;  %v3693_v12 = vsel %vm3685_vm9, %v5933_v33, 256  ;;  %v6796_v39 = vadd.s32 %v3902_v1, %v3900_v3 }
0x1c2d   :  { %vm4080_vm12 = vcmp.eq.s32.totalorder %v5693_v5, %v4076_v14  ;;  %v6740_v46 = vadd.s32 %v4004_v32, %v4002_v13  ;;  %vm4081_vm14 = vcmp.eq.s32.totalorder %v5933_v33, %v4076_v14  ;;  %vm3728_vm5 = vcmp.lt.s32.totalorder %v3692_v2, %v3693_v12 }
0x1c2e   :  { %vm6746_vm8 = vmor %vm6669_vm1, %vm4080_vm12  ;;  %v3943_v42 = vpop.xlane.xlu1 %3942  ;;  %v6750_v16 = vcvt.s32.f32 %v3699_v25  ;;  %v6754_v10 = vsel %vm3728_vm5, %v3692_v2, %v3693_v12  ;;  %v4045_v14 = vcvt.f32.s32 %v6630_v48  ;;  %v4059_v13 = vadd.s32 64, %v6796_v39 }
0x1c2f   :  { %v4096_v30 = vadd.s32 192, %v6740_v46  ;;  %v3944_v28 = vcvt.f32.s32 %v3943_v42  ;;  %vm4089_vm3 = vmor %vm6675_vm4, %vm4081_vm14  ;;  %v3731_v24 = vshra.s32 %v6754_v10, 16 }
0x1c30   :  { %3702 = vmin.xlane.f32.xlu0 %v6750_v16  ;;  %v4046_v48 = vshll.u32 %v4045_v14, 16  ;;  %v4256_v14 = vld [vmem:[#allocation2 + $0x3fc] sm:$0xf] }
0x1c31   :  { %vm4100_vm1 = vcmp.eq.s32.totalorder %v5693_v5, %v4096_v30  ;;  %v6761_v21 = vadd.s32 %v3946_v53, %v3944_v28  ;;  %vm4101_vm10 = vcmp.eq.s32.totalorder %v5933_v33, %v4096_v30  ;;  %v6767_v55 = vcvt.s32.f32 %v3731_v24 }
0x1c32   :  { %vm4108_vm6 = vmor %vm6746_vm8, %vm4100_vm1  ;;  %v4015_v22 = vpop.xlane.xlu1 %4014 }
0x1c33   :  { %v4077_v11 = vadd.s32 128, %v6761_v21  ;;  %v4016_v20 = vcvt.f32.s32 %v4015_v22  ;;  %vm4109_vm4 = vmor %vm4089_vm3, %vm4101_vm10 }
0x1c34   :  { %4639 = vmatprep.mubr.msk.f32.mxu1 %vm4109_vm4, %v5580_v37  ;;  %3734 = vmin.xlane.f32.xlu0 %v6767_v55 }
0x1c35   :  { %v6773_v27 = vadd.s32 %v4018_v60, %v4016_v20  ;;  %4640 = vmatmul.mubr.msk.f32.vlgmr.msra.gmra.mrb[56].mxu1 %vm4108_vm6, %v5580_v37  ;;  %vm4083_vm7 = vcmp.eq.s32.totalorder %v5933_v33, %v4077_v11  ;;  %vm4082_vm11 = vcmp.eq.s32.totalorder %v5693_v5, %v4077_v11  ;;  %v4241_v20 = vld [vmem:[#allocation2 + $0x3c] sm:$0xf] }
0x1c36   :  { %v3957_v36 = vpop.xlane.xlu1 %3956  ;;  %vm4091_vm9 = vmor %vm6690_vm0, %vm4083_vm7  ;;  %vm4055_vm7 = vcmp.eq.s32.totalorder %v5933_v33, %v6803_v62  ;;  %v4647_v7 = vcombine.low %v4241_v20, %v4242_v49 }
0x1c37   :  { %v4097_v35 = vadd.s32 192, %v6773_v27  ;;  %v3958_v40 = vcvt.f32.s32 %v3957_v36  ;;  %vm6786_vm12 = vmor %vm6696_vm15, %vm4082_vm11  ;;  %vm4054_vm11 = vcmp.eq.s32.totalorder %v5693_v5, %v6803_v62 }
0x1c38   :  { %5173 = vmatprep.subr.bf16.mxu0 %v4647_v7 }
0x1c39   :  { %v6791_v19 = vadd.s32 %v3960_v18, %v3958_v40  ;;  %vm4103_vm0 = vcmp.eq.s32.totalorder %v5933_v33, %v4097_v35  ;;  %vm4102_vm14 = vcmp.eq.s32.totalorder %v5693_v5, %v4097_v35  ;;  %5174 = vmatpush3.bf16.msra.mxu0 %v4647_v7  ;;  %v4245_v18 = vld [vmem:[#allocation2 + $0x13c] sm:$0xf] }
0x1c3a   :  { %v4029_v23 = vpop.xlane.xlu1 %4028  ;;  %vm4111_vm8 = vmor %vm4091_vm9, %vm4103_vm0  ;;  %vm4067_vm9 = vcmp.eq.s32.totalorder %v5933_v33, %v4059_v13  ;;  %vm4066_vm0 = vcmp.eq.s32.totalorder %v5693_v5, %v4059_v13  ;;  %v4649_v3 = vcombine.low %v4245_v18, %v4246_v43  ;;  %v4247_v35 = vld [vmem:[#allocation2 + $0x1bc] sm:$0xf] }
0x1c3b   :  { %v4078_v34 = vadd.s32 128, %v6791_v19  ;;  %v4030_v17 = vcvt.f32.s32 %v4029_v23  ;;  %4641 = vmatprep.mubr.msk.f32.mxu1 %vm4111_vm8, %v5580_v37  ;;  %vm4110_vm15 = vmor %vm6786_vm12, %vm4102_vm14  ;;  %v4248_v40 = vld [vmem:[#allocation2 + $0x1fc] sm:$0xf] }
0x1c3c   :  { %4642 = vmatmul.mubr.msk.f32.gmra.mrb[58].mxu1 %vm4110_vm15, %v5580_v37  ;;  %vm4075_vm12 = vmor %vm4055_vm7, %vm4067_vm9  ;;  %v4650_v1 = vcombine.low %v4247_v35, %v4248_v40  ;;  %v4252_v23 = vld [vmem:[#allocation2 + $0x2fc] sm:$0xf] }
0x1c3d   :  { %v6805_v50 = vadd.s32 %v4032_v45, %v4030_v17  ;;  %vm4085_vm5 = vcmp.eq.s32.totalorder %v5933_v33, %v4078_v34  ;;  %vm4084_vm3 = vcmp.eq.s32.totalorder %v5693_v5, %v4078_v34  ;;  %vm4074_vm8 = vmor %vm4054_vm11, %vm4066_vm0  ;;  %v4253_v45 = vld [vmem:[#allocation2 + $0x33c] sm:$0xf]  ;;  %v4652_v34 = vcombine.low %v4251_v56, %v4252_v23 }
0x1c3e   :  { %v3971_v32 = vpop.xlane.xlu1 %3970  ;;  %vm4093_vm1 = vmor %vm6714_vm13, %vm4085_vm5  ;;  %v4254_v17 = vld [vmem:[#allocation2 + $0x37c] sm:$0xf] }
0x1c3f   :  { %v4098_v2 = vadd.s32 192, %v6805_v50  ;;  %v3972_v25 = vcvt.f32.s32 %v3971_v32  ;;  %vm4092_vm10 = vmor %vm6720_vm2, %vm4084_vm3  ;;  %v4255_v32 = vld [vmem:[#allocation2 + $0x3bc] sm:$0xf] }
0x1c40   :  { %v4654_v13 = vcombine.low %v4255_v32, %v4256_v14 }
0x1c41   :  { %v6816_v12 = vadd.s32 %v3974_v9, %v3972_v25  ;;  %vm4105_vm6 = vcmp.eq.s32.totalorder %v5933_v33, %v4098_v2  ;;  %vm4104_vm4 = vcmp.eq.s32.totalorder %v5693_v5, %v4098_v2  ;;  %v4653_v9 = vcombine.low %v4253_v45, %v4254_v17 }
0x1c42   :  { %v4043_v26 = vpop.xlane.xlu1 %4042  ;;  %vm4113_vm13 = vmor %vm4093_vm1, %vm4105_vm6  ;;  %v3698_v2 = vand.u32 65535, %v6732_v0 }
0x1c43   :  { %v4079_v53 = vadd.s32 128, %v6816_v12  ;;  %v4044_v59 = vcvt.f32.s32 %v4043_v26  ;;  %4643 = vmatprep.mubr.msk.f32.mxu1 %vm4113_vm13, %v5580_v37  ;;  %vm4112_vm2 = vmor %vm4092_vm10, %vm4104_vm4 }
0x1c44   :  { %4644 = vmatmul.mubr.msk.f32.gmra.mrb[60].mxu1 %vm4112_vm2, %v5580_v37  ;;  %v3700_v26 = vcvt.s32.f32 %v3698_v2 }
0x1c45   :  { %v6829_v54 = vadd.s32 %v4046_v48, %v4044_v59  ;;  %vm4087_vm14 = vcmp.eq.s32.totalorder %v5933_v33, %v4079_v53  ;;  %vm4086_vm15 = vcmp.eq.s32.totalorder %v5693_v5, %v4079_v53  ;;  %v3730_v48 = vand.u32 65535, %v6754_v10 }
0x1c46   :  { %v3673_v42 = vpop.xlane.xlu1 %3672  ;;  %vm4095_vm5 = vmor %vm4075_vm12, %vm4087_vm14 }
0x1c47   :  { %v4099_v4 = vadd.s32 192, %v6829_v54  ;;  %vm3682_vm3 = vcmp.ge.f32.partialorder %v6635_v58, %v3673_v42  ;;  %vm3683_vm1 = vcmp.ge.f32.partialorder %v6639_v8, %v3673_v42  ;;  %vm4094_vm10 = vmor %vm4074_vm8, %vm4086_vm15  ;;  %v3732_v42 = vcvt.s32.f32 %v3730_v48 }
0x1c48   :  { %v3690_v30 = vsel %vm3682_vm3, %v5693_v5, 256  ;;  %v3691_v28 = vsel %vm3683_vm1, %v5933_v33, 256  ;;  %vm4366_vm3 = vcmp.eq.s32.totalorder %v5693_v5, 1  ;;  %vm4375_vm1 = vcmp.eq.s32.totalorder %v5693_v5, 2 }
0x1c49   :  { %vm3712_vm6 = vcmp.lt.s32.totalorder %v3690_v30, %v3691_v28  ;;  %vm4107_vm4 = vcmp.eq.s32.totalorder %v5933_v33, %v4099_v4  ;;  %vm4106_vm7 = vcmp.eq.s32.totalorder %v5693_v5, %v4099_v4  ;;  %v4367_v56 = vsel %vm4366_vm3, %v6658_v47, 0 }
0x1c4a   :  { %v6840_v24 = vsel %vm3712_vm6, %v3690_v30, %v3691_v28  ;;  %v3679_v63 = vpop.xlane.xlu1 %3678  ;;  %vm4115_vm13 = vmor %vm4095_vm5, %vm4107_vm4  ;;  %vm4361_vm5 = vcmp.eq.s32.totalorder %v5693_v5, 0  ;;  %v4376_v17 = vsel %vm4375_vm1, %v6660_v38, 0  ;;  %vm4393_vm6 = vcmp.eq.s32.totalorder %v5693_v5, 4 }
0x1c4b   :  { %vm3686_vm11 = vcmp.ge.f32.partialorder %v6648_v52, %v3679_v63  ;;  %vm3687_vm2 = vcmp.ge.f32.partialorder %v6652_v44, %v3679_v63  ;;  %4645 = vmatprep.mubr.msk.f32.mxu1 %vm4115_vm13, %v5580_v37  ;;  %vm4114_vm9 = vmor %vm4094_vm10, %vm4106_vm7  ;;  %v3715_v58 = vshra.s32 %v6840_v24, 16  ;;  %v3714_v30 = vand.u32 65535, %v6840_v24 }
0x1c4c   :  { %v3694_v8 = vsel %vm3686_vm11, %v5693_v5, 256  ;;  %v3695_v22 = vsel %vm3687_vm2, %v5933_v33, 256  ;;  %4646 = vmatmul.mubr.msk.f32.gmra.mrb[62].mxu1 %vm4114_vm9, %v5580_v37  ;;  %v4243_v33 = vld [vmem:[#allocation2 + $0xbc] sm:$0xf]  ;;  %vm4384_vm10 = vcmp.eq.s32.totalorder %v5693_v5, 3  ;;  %v4369_v47 = vsel %vm4366_vm3, %v6700_v15, 0 }
0x1c4d   :  { %vm3744_vm12 = vcmp.lt.s32.totalorder %v3694_v8, %v3695_v22  ;;  %v6849_v60 = vcvt.s32.f32 %v3715_v58  ;;  %v4244_v37 = vld [vmem:[#allocation2 + $0xfc] sm:$0xf]  ;;  %v3716_v63 = vcvt.s32.f32 %v3714_v30  ;;  %v4385_v14 = vsel %vm4384_vm10, %v6729_v61, 0 }
0x1c4e   :  { %v6851_v11 = vsel %vm3744_vm12, %v3694_v8, %v3695_v22  ;;  %v4648_v36 = vcombine.low %v4243_v33, %v4244_v37  ;;  %v4378_v38 = vsel %vm4375_vm1, %v6702_v41, 0  ;;  %v4387_v61 = vsel %vm4384_vm10, %v6791_v19, 0 }
0x1c4f   :  { %3718 = vmin.xlane.f32.xlu1 %v6849_v60  ;;  %v3747_v52 = vshra.s32 %v6851_v11, 16  ;;  %v3746_v0 = vand.u32 65535, %v6851_v11 }
0x1c50   :  { %5175 = vmatprep.subr.bf16.mxu0 %v4648_v36 }
0x1c51   :  { %v6855_v44 = vcvt.s32.f32 %v3747_v52  ;;  %5176 = vmatpush3.bf16.msra.mxu0 %v4648_v36  ;;  %v3748_v58 = vcvt.s32.f32 %v3746_v0 }
0x1c52   :  { %5177 = vmatprep.subr.bf16.mxu0 %v4649_v3 }
0x1c53   :  { %3750 = vmin.xlane.f32.xlu1 %v6855_v44 }
0x1c55   :  { %5178 = vmatpush3.bf16.msra.mxu0 %v4649_v3 }
0x1c56   :  { %5179 = vmatprep.subr.bf16.mxu0 %v4650_v1 }
0x1c59   :  { %5180 = vmatpush3.bf16.msra.mxu0 %v4650_v1 }
0x1c5a   :  { %5181 = vmatprep.subr.bf16.mxu0 %v4651_v51 }
0x1c5d   :  { %5182 = vmatpush3.bf16.msra.mxu0 %v4651_v51 }
0x1c5e   :  { %5183 = vmatprep.subr.bf16.mxu0 %v4652_v34 }
0x1c61   :  { %5184 = vmatpush3.bf16.msra.mxu0 %v4652_v34 }
0x1c62   :  { %5185 = vmatprep.subr.bf16.mxu0 %v4653_v9 }
0x1c65   :  { %5186 = vmatpush3.bf16.msra.mxu0 %v4653_v9 }
0x1c66   :  { %5187 = vmatprep.subr.bf16.mxu0 %v4654_v13 }
0x1c69   :  { %5188 = vmatpush3.bf16.msra.mxu0 %v4654_v13 }
0x1cbd   :  { %v3703_v25 = vpop.xlane.xlu0 %3702 }
0x1cbe   :  { %vm3704_vm0 = vcmp.eq.f32.partialorder %v6750_v16, %v3703_v25  ;;  %v3709_v3 = vcvt.f32.s32 %v3703_v25 }
0x1cbf   :  { %v3705_v53 = vsel %vm3704_vm0, %v3700_v26, inf  ;;  %v4394_v26 = vsel %vm4393_vm6, %v6740_v46, 0 }
0x1cc0   :  { %3706 = vmin.xlane.f32.xlu0 %v3705_v53  ;;  %v3710_v35 = vshll.u32 %v3709_v3, 16 }
0x1cc1   :  { %v3735_v59 = vpop.xlane.xlu0 %3734 }
0x1cc2   :  { %vm3736_vm14 = vcmp.eq.f32.partialorder %v6767_v55, %v3735_v59  ;;  %v3741_v40 = vcvt.f32.s32 %v3735_v59  ;;  %v4396_v59 = vsel %vm4393_vm6, %v6805_v50, 0 }
0x1cc3   :  { %v3737_v4 = vsel %vm3736_vm14, %v3732_v42, inf }
0x1cc4   :  { %3738 = vmin.xlane.f32.xlu0 %v3737_v4  ;;  %v3742_v51 = vshll.u32 %v3741_v40, 16 }
0x1cdc   :  { %v6863_v28 = vpop.xlane.xlu1 %3718 }
0x1cdd   :  { %vm3720_vm8 = vcmp.eq.f32.partialorder %v6849_v60, %v6863_v28  ;;  %v3725_v46 = vcvt.f32.s32 %v6863_v28  ;;  %v4377_v28 = vsel %vm4375_vm1, %v6681_v31, 0  ;;  %v4395_v31 = vsel %vm4393_vm6, %v6773_v27, 0  ;;  %v4259_v27 = vld [vmem:[%s6963_s1 + $0x1] ss:$0 sm:$0xff] }
0x1cde   :  { %v3721_v10 = vsel %vm3720_vm8, %v3716_v63, inf }
0x1cdf   :  { %3722 = vmin.xlane.f32.xlu1 %v3721_v10  ;;  %v3726_v4 = vshll.u32 %v3725_v46, 16 }
0x1ce0   :  { %v6868_v16 = vpop.xlane.xlu1 %3750 }
0x1ce1   :  { %vm3752_vm15 = vcmp.eq.f32.partialorder %v6855_v44, %v6868_v16  ;;  %v3757_v19 = vcvt.f32.s32 %v6868_v16  ;;  %v4386_v16 = vsel %vm4384_vm10, %v6761_v21, 0  ;;  %v4388_v21 = vsel %vm4384_vm10, %v6816_v12, 0 }
0x1ce2   :  { %v3753_v55 = vsel %vm3752_vm15, %v3748_v58, inf  ;;  %v4368_v58 = vsel %vm4366_vm3, %v6679_v6, 0 }
0x1ce3   :  { %3754 = vmin.xlane.f32.xlu1 %v3753_v55  ;;  %v3758_v10 = vshll.u32 %v3757_v19, 16 }
0x1d08   :  { %v4921_v8 = vpop.f32.mrb[56].mxu1 }
0x1d09   :  { %v4922_v24 = vpop.f32.mrb[57].mxu1 }
0x1d0a   :  { %v4923_v22 = vadd.f32 %v4922_v24, %v4921_v8 }
0x1d0f   :  { %v4924_v52 = vpop.f32.mrb[58].mxu1 }
0x1d10   :  { %v4925_v20 = vpop.f32.mrb[59].mxu1 }
0x1d11   :  { %v4926_v49 = vadd.f32 %v4925_v20, %v4924_v52  ;;  %v4370_v52 = vsel %vm4366_vm3, %v6803_v62, 0 }
0x1d13   :  { %v4257_v11 = vpack.c.bf16 %v4926_v49, %v4923_v22 }
0x1d15   :  { %5189 = vmatprep.mubr.bf16.mxu0 %v4257_v11  ;;  %v4379_v11 = vsel %vm4375_vm1, %v6796_v39, 0 }
0x1d17   :  { %v4927_v7 = vpop.f32.mrb[60].mxu1 }
0x1d18   :  { %v4928_v60 = vpop.f32.mrb[61].mxu1 }
0x1d19   :  { %v4929_v33 = vadd.f32 %v4928_v60, %v4927_v7 }
0x1d1f   :  { %v4930_v37 = vpop.f32.mrb[62].mxu1 }
0x1d20   :  { %v4931_v18 = vpop.f32.mrb[63].mxu1 }
0x1d21   :  { %v4932_v36 = vadd.f32 %v4931_v18, %v4930_v37 }
0x1d23   :  { %v4258_v43 = vpack.c.bf16 %v4932_v36, %v4929_v33  ;;  %v4397_v33 = vsel %vm4393_vm6, %v6829_v54, 0 }
0x1d25   :  { %5190 = vmatmul.mubr.bf16.vlgmr.msra.gmra.mrb[72].mxu0 %v4258_v43 }
0x1d4d   :  { %v3707_v44 = vpop.xlane.xlu0 %3706 }
0x1d4e   :  { %v3708_v57 = vcvt.f32.s32 %v3707_v44 }
0x1d50   :  { %v3711_v1 = vadd.s32 %v3710_v35, %v3708_v57 }
0x1d51   :  { %v3739_v29 = vpop.xlane.xlu0 %3738 }
0x1d52   :  { %v4362_v23 = vsel %vm4361_vm5, %v3711_v1, 0  ;;  %v3740_v45 = vcvt.f32.s32 %v3739_v29 }
0x1d53   :  { %v4371_v34 = vadd.s32 %v4367_v56, %v4362_v23 }
0x1d54   :  { %v3743_v9 = vadd.s32 %v3742_v51, %v3740_v45 }
0x1d55   :  { %v4380_v32 = vadd.s32 %v4376_v17, %v4371_v34 }
0x1d56   :  { %v4364_v13 = vsel %vm4361_vm5, %v3743_v9, 0 }
0x1d57   :  { %v4389_v2 = vadd.s32 %v4385_v14, %v4380_v32  ;;  %v4373_v25 = vadd.s32 %v4369_v47, %v4364_v13 }
0x1d59   :  { %v4398_v48 = vadd.s32 %v4394_v26, %v4389_v2  ;;  %v4382_v53 = vadd.s32 %v4378_v38, %v4373_v25 }
0x1d5b   :  { %4402 = vst [vmem:[%s6967_s5] sm:$0xff] %v4398_v48  ;;  %v4391_v15 = vadd.s32 %v4387_v61, %v4382_v53 }
0x1d5d   :  { %v4400_v41 = vadd.s32 %v4396_v59, %v4391_v15 }
0x1d5f   :  { %4404 = vst [vmem:[%s6967_s5 + $0x10] sm:$0xff] %v4400_v41 }
0x1d6c   :  { %v3723_v42 = vpop.xlane.xlu1 %3722 }
0x1d6d   :  { %v3724_v30 = vcvt.f32.s32 %v3723_v42 }
0x1d6f   :  { %v3727_v63 = vadd.s32 %v3726_v4, %v3724_v30 }
0x1d70   :  { %v3755_v0 = vpop.xlane.xlu1 %3754 }
0x1d71   :  { %v4363_v50 = vsel %vm4361_vm5, %v3727_v63, 0  ;;  %v3756_v55 = vcvt.f32.s32 %v3755_v0 }
0x1d72   :  { %v4372_v8 = vadd.s32 %v4368_v58, %v4363_v50 }
0x1d73   :  { %v3759_v24 = vadd.s32 %v3758_v10, %v3756_v55 }
0x1d74   :  { %v4381_v22 = vadd.s32 %v4377_v28, %v4372_v8 }
0x1d75   :  { %v4365_v6 = vsel %vm4361_vm5, %v3759_v24, 0 }
0x1d76   :  { %v4390_v20 = vadd.s32 %v4386_v16, %v4381_v22  ;;  %v4374_v49 = vadd.s32 %v4370_v52, %v4365_v6 }
0x1d78   :  { %v4399_v7 = vadd.s32 %v4395_v31, %v4390_v20  ;;  %v4383_v60 = vadd.s32 %v4379_v11, %v4374_v49 }
0x1d7a   :  { %4403 = vst [vmem:[%s6967_s5 + $0x8] sm:$0xff] %v4399_v7  ;;  %v4392_v62 = vadd.s32 %v4388_v21, %v4383_v60 }
0x1d7c   :  { %v4401_v39 = vadd.s32 %v4397_v33, %v4392_v62 }
0x1d7e   :  { %4405 = vst [vmem:[%s6967_s5 + $0x18] sm:$0xff] %v4401_v39 }
0x1df8   :  { %v5191_v37 = vpop.f32.mrb[72].mxu0 }
0x1df9   :  { %v4351_v12 = vadd.f32 %v5191_v37, %v4259_v27  ;;  %v4342_v18 = vpop.f32.mrb[73].mxu0 }
0x1dfa   :  { %v4343_v36 = vadd.f32 %v4342_v18, %v4259_v27  ;;  %v5192_v43 = vpop.f32.mrb[74].mxu0 }
0x1dfb   :  { %4359 = vst [vmem:[%s6968_s6 + $0x10] sm:$0xff] %v4351_v12  ;;  %v4354_v5 = vadd.f32 %v5192_v43, %v4259_v27  ;;  %v4345_v54 = vpop.f32.mrb[75].mxu0 }
0x1dfc   :  { %4357 = vst [vmem:[%s6968_s6] sm:$0xff] %v4343_v36  ;;  %v4346_v3 = vadd.f32 %v4345_v54, %v4259_v27 }
0x1dfd   :  { %4360 = vst [vmem:[%s6968_s6 + $0x18] sm:$0xff] %v4354_v5 }
0x1dfe   :  { %4358 = vst [vmem:[%s6968_s6 + $0x8] sm:$0xff] %v4346_v3 }
0x1dff   :  { %4414 = vsyncpa [#allocation3], 1 }
0x1e00   :  { %4415 = vsyncpa [#allocation5], 1 }

</bundles_post_ra>
